<compile_context>
chip_gen: v5e
topology: v5e:2x2
jax: 0.10.0
libtpu: 0.0.40
codegen_flags: <defaults>
</compile_context>

<pallas_src>
import functools

import jax
import jax.numpy as jnp
from jax.experimental import pallas as pl
from jax.experimental.pallas import tpu as pltpu


# ----------------------------------------------------------------------------
# Fused kernel: 3x3 conv (as 9 accumulated matmuls) + bias + ReLU
#               + global average pool + linear classifier.
# One batch element per grid step.
# ----------------------------------------------------------------------------
def _fused_conv_head_kernel(x_ref, w_ref, b_ref, fcw_ref, fcb_ref,
                            y_ref, logit_ref, *, H, W):
    """Refs (per grid step n):
      x_ref     : [1, H+2, W+2, C_in]  bf16  (spatially pre-padded, NHWC)
      w_ref     : [9, C_in, C_mid]     bf16  (tap-major conv weights)
      b_ref     : [1, C_mid]           f32
      fcw_ref   : [C_mid, F]           f32
      fcb_ref   : [1, F]               f32
      y_ref     : [1, C_mid, H*W]      f32   (lane-dense conv activation)
      logit_ref : [1, 1, F]            f32
    """
    HW = H * W
    O = y_ref.shape[1]

    # 3x3 conv = 9 shifted views x small matmuls, accumulated in f32 on-chip.
    acc = jnp.zeros((HW, O), jnp.float32)
    for dh in range(3):
        for dw in range(3):
            tap = dh * 3 + dw
            xs = x_ref[0, dh:dh + H, dw:dw + W, :].reshape(HW, -1)  # [HW, C_in]
            acc = acc + jnp.dot(xs, w_ref[tap],
                                preferred_element_type=jnp.float32)

    acc = jnp.maximum(acc + b_ref[...], 0.0)              # bias + ReLU (f32)

    # Lane-dense store: [C_mid, H*W] (last dim multiple of 128).
    y_ref[0] = acc.T.astype(y_ref.dtype)

    # Fused aux head: global average pool + linear classifier.
    pooled = jnp.sum(acc, axis=0, keepdims=True) * (1.0 / HW)       # [1, C_mid]
    logits = jnp.dot(pooled, fcw_ref[...],
                     preferred_element_type=jnp.float32) + fcb_ref[...]
    logit_ref[0] = logits.astype(logit_ref.dtype)


# ----------------------------------------------------------------------------
# Concat_models: forward(x) -> (rst_tmp, rst)
# ----------------------------------------------------------------------------
def concat_models_forward(x_nchw, params):
    N, C, H, W = x_nchw.shape
    O = params["conv_w"].shape[0]
    F = params["fc_w"].shape[1]
    HW = H * W

    # Single layout pass: NCHW -> padded NHWC; cast the matmul stream to bf16.
    x_pad = jnp.pad(jnp.transpose(x_nchw, (0, 2, 3, 1)),
                    ((0, 0), (1, 1), (1, 1), (0, 0))).astype(jnp.bfloat16)
    # Conv weights [O, C, 3, 3] -> tap-major [9, C, O].
    w_taps = jnp.transpose(params["conv_w"], (2, 3, 1, 0)).reshape(9, C, O)
    w_taps = w_taps.astype(jnp.bfloat16)
    b = params["conv_b"].reshape(1, O).astype(jnp.float32)
    fcw = params["fc_w"].astype(jnp.float32)
    fcb = params["fc_b"].reshape(1, F).astype(jnp.float32)

    kernel = functools.partial(_fused_conv_head_kernel, H=H, W=W)

    flops = 2 * N * HW * (9 * C * O) + 2 * N * O * F
    bytes_accessed = (x_pad.size * 2 + w_taps.size * 2
                      + (b.size + fcw.size + fcb.size) * 4
                      + N * O * HW * 4 + N * F * 4)

    y_flat, logits = pl.pallas_call(
        kernel,
        out_shape=(jax.ShapeDtypeStruct((N, O, HW), jnp.float32),
                   jax.ShapeDtypeStruct((N, 1, F), jnp.float32)),
        grid=(N,),
        in_specs=[
            pl.BlockSpec((1, H + 2, W + 2, C), lambda n: (n, 0, 0, 0)),
            pl.BlockSpec((9, C, O), lambda n: (0, 0, 0)),
            pl.BlockSpec((1, O), lambda n: (0, 0)),
            pl.BlockSpec((O, F), lambda n: (0, 0)),
            pl.BlockSpec((1, F), lambda n: (0, 0)),
        ],
        out_specs=(
            pl.BlockSpec((1, O, HW), lambda n: (n, 0, 0)),
            pl.BlockSpec((1, 1, F), lambda n: (n, 0, 0)),
        ),
        compiler_params=pltpu.CompilerParams(
            dimension_semantics=("parallel",),
            vmem_limit_bytes=32 * 1024 * 1024,
        ),
        cost_estimate=pl.CostEstimate(
            flops=flops, transcendentals=0, bytes_accessed=bytes_accessed),
    )(x_pad, w_taps, b, fcw, fcb)

    rst_tmp = y_flat.reshape(N, O, H, W)   # free row-major bitcast back to NCHW
    rst = logits.reshape(N, F)
    return rst_tmp, rst


def init_params(key, c_in=4, c_mid=8, num_classes=10):
    k1, k2, k3, k4 = jax.random.split(key, 4)
    conv_fan_in = c_in * 9
    fc_fan_in = c_mid
    return {
        "conv_w": jax.random.normal(k1, (c_mid, c_in, 3, 3), jnp.float32)
                  * (2.0 / conv_fan_in) ** 0.5,
        "conv_b": jax.random.normal(k2, (c_mid,), jnp.float32) * 0.01,
        "fc_w":   jax.random.normal(k3, (c_mid, num_classes), jnp.float32)
                  * (1.0 / fc_fan_in) ** 0.5,
        "fc_b":   jax.random.normal(k4, (num_classes,), jnp.float32) * 0.01,
    }


def _reference_forward(x, params):
    out = jax.lax.conv_general_dilated(
        x, params["conv_w"], window_strides=(1, 1), padding=((1, 1), (1, 1)),
        dimension_numbers=("NCHW", "OIHW", "NCHW"))
    out = jnp.maximum(out + params["conv_b"][None, :, None, None], 0.0)
    pooled = out.mean(axis=(2, 3))
    logits = pooled @ params["fc_w"] + params["fc_b"]
    return out, logits


if __name__ == "__main__":
    key = jax.random.PRNGKey(0)
    kx, kp = jax.random.split(key)

    # small shapes: batch=2, channels=4, spatial=16x16 (NCHW like PyTorch)
    x = jax.random.normal(kx, (2, 4, 16, 16), jnp.float32)
    params = init_params(kp, c_in=4, c_mid=8, num_classes=10)

    rst_tmp, rst = jax.jit(concat_models_forward)(x, params)
    jax.block_until_ready((rst_tmp, rst))

    assert rst_tmp.shape == (2, 8, 16, 16)
    assert rst.shape == (2, 10)

    # Loose tolerance: conv matmuls run with bf16 inputs / f32 accumulation.
    ref_tmp, ref_rst = _reference_forward(x, params)
    import numpy as np
    np.testing.assert_allclose(np.asarray(rst_tmp), np.asarray(ref_tmp),
                               atol=5e-2, rtol=5e-2)
    np.testing.assert_allclose(np.asarray(rst), np.asarray(ref_rst),
                               atol=5e-2, rtol=5e-2)

    print("KERNEL_OK")
</pallas_src>

<mosaic_0001>
module attributes {stable_mosaic.version = 11 : i64} {
  func.func @_fused_conv_head_kernel(%arg0: i32, %arg1: memref<1x18x18x4xbf16, #tpu.memory_space<vmem>>, %arg2: memref<9x4x8xbf16, #tpu.memory_space<vmem>>, %arg3: memref<1x8xf32, #tpu.memory_space<vmem>>, %arg4: memref<8x10xf32, #tpu.memory_space<vmem>>, %arg5: memref<1x10xf32, #tpu.memory_space<vmem>>, %arg6: memref<1x8x256xf32, #tpu.memory_space<vmem>>, %arg7: memref<1x1x10xf32, #tpu.memory_space<vmem>>) attributes {dimension_semantics = [#tpu.dimension_semantics<parallel>], iteration_bounds = array<i64: 2>, scalar_prefetch = 0 : i64, scratch_operands = 0 : i64, tpu.core_type = #tpu.core_type<tc>, window_params = [{transform_indices = @transform_0, window_bounds = array<i64: 1, 18, 18, 4>}, {pipeline_mode = #tpu.pipeline_mode<synchronous>, transform_indices = @transform_1, window_bounds = array<i64: 9, 4, 8>}, {pipeline_mode = #tpu.pipeline_mode<synchronous>, transform_indices = @transform_2, window_bounds = array<i64: 1, 8>}, {pipeline_mode = #tpu.pipeline_mode<synchronous>, transform_indices = @transform_3, window_bounds = array<i64: 8, 10>}, {pipeline_mode = #tpu.pipeline_mode<synchronous>, transform_indices = @transform_4, window_bounds = array<i64: 1, 10>}, {transform_indices = @transform_5, window_bounds = array<i64: 1, 8, 256>}, {transform_indices = @transform_6, window_bounds = array<i64: 1, 1, 10>}]} {
    %cst = arith.constant 0.000000e+00 : f32
    %0 = vector.broadcast %cst : f32 to vector<256x8xf32>
    %c0 = arith.constant 0 : index
    %c0_0 = arith.constant 0 : index
    %c0_1 = arith.constant 0 : index
    %c0_2 = arith.constant 0 : index
    %1 = vector.load %arg1[%c0, %c0_0, %c0_1, %c0_2] : memref<1x18x18x4xbf16, #tpu.memory_space<vmem>>, vector<1x16x16x4xbf16>
    %2 = vector.shape_cast %1 : vector<1x16x16x4xbf16> to vector<16x16x4xbf16>
    %3 = vector.shape_cast %2 : vector<16x16x4xbf16> to vector<256x4xbf16>
    %c0_3 = arith.constant 0 : index
    %c0_4 = arith.constant 0 : index
    %c0_5 = arith.constant 0 : index
    %4 = vector.load %arg2[%c0_3, %c0_4, %c0_5] : memref<9x4x8xbf16, #tpu.memory_space<vmem>>, vector<1x4x8xbf16>
    %5 = vector.shape_cast %4 : vector<1x4x8xbf16> to vector<4x8xbf16>
    %cst_6 = arith.constant dense<0.000000e+00> : vector<256x8xf32>
    %6 = tpu.matmul %3, %5, %cst_6 {dimension_numbers = #tpu.dot_dimension_numbers<[1], [0], [0], [1], [0, 0, 1, 1], [], []>} : vector<256x4xbf16>, vector<4x8xbf16>, vector<256x8xf32> -> vector<256x8xf32>
    %7 = arith.addf %0, %6 : vector<256x8xf32>
    %c0_7 = arith.constant 0 : index
    %c0_8 = arith.constant 0 : index
    %c1 = arith.constant 1 : index
    %c0_9 = arith.constant 0 : index
    %8 = vector.load %arg1[%c0_7, %c0_8, %c1, %c0_9] : memref<1x18x18x4xbf16, #tpu.memory_space<vmem>>, vector<1x16x16x4xbf16>
    %9 = vector.shape_cast %8 : vector<1x16x16x4xbf16> to vector<16x16x4xbf16>
    %10 = vector.shape_cast %9 : vector<16x16x4xbf16> to vector<256x4xbf16>
    %c1_10 = arith.constant 1 : index
    %c0_11 = arith.constant 0 : index
    %c0_12 = arith.constant 0 : index
    %11 = vector.load %arg2[%c1_10, %c0_11, %c0_12] : memref<9x4x8xbf16, #tpu.memory_space<vmem>>, vector<1x4x8xbf16>
    %12 = vector.shape_cast %11 : vector<1x4x8xbf16> to vector<4x8xbf16>
    %cst_13 = arith.constant dense<0.000000e+00> : vector<256x8xf32>
    %13 = tpu.matmul %10, %12, %cst_13 {dimension_numbers = #tpu.dot_dimension_numbers<[1], [0], [0], [1], [0, 0, 1, 1], [], []>} : vector<256x4xbf16>, vector<4x8xbf16>, vector<256x8xf32> -> vector<256x8xf32>
    %14 = arith.addf %7, %13 : vector<256x8xf32>
    %c0_14 = arith.constant 0 : index
    %c0_15 = arith.constant 0 : index
    %c2 = arith.constant 2 : index
    %c0_16 = arith.constant 0 : index
    %15 = vector.load %arg1[%c0_14, %c0_15, %c2, %c0_16] : memref<1x18x18x4xbf16, #tpu.memory_space<vmem>>, vector<1x16x16x4xbf16>
    %16 = vector.shape_cast %15 : vector<1x16x16x4xbf16> to vector<16x16x4xbf16>
    %17 = vector.shape_cast %16 : vector<16x16x4xbf16> to vector<256x4xbf16>
    %c2_17 = arith.constant 2 : index
    %c0_18 = arith.constant 0 : index
    %c0_19 = arith.constant 0 : index
    %18 = vector.load %arg2[%c2_17, %c0_18, %c0_19] : memref<9x4x8xbf16, #tpu.memory_space<vmem>>, vector<1x4x8xbf16>
    %19 = vector.shape_cast %18 : vector<1x4x8xbf16> to vector<4x8xbf16>
    %cst_20 = arith.constant dense<0.000000e+00> : vector<256x8xf32>
    %20 = tpu.matmul %17, %19, %cst_20 {dimension_numbers = #tpu.dot_dimension_numbers<[1], [0], [0], [1], [0, 0, 1, 1], [], []>} : vector<256x4xbf16>, vector<4x8xbf16>, vector<256x8xf32> -> vector<256x8xf32>
    %21 = arith.addf %14, %20 : vector<256x8xf32>
    %c0_21 = arith.constant 0 : index
    %c1_22 = arith.constant 1 : index
    %c0_23 = arith.constant 0 : index
    %c0_24 = arith.constant 0 : index
    %22 = vector.load %arg1[%c0_21, %c1_22, %c0_23, %c0_24] : memref<1x18x18x4xbf16, #tpu.memory_space<vmem>>, vector<1x16x16x4xbf16>
    %23 = vector.shape_cast %22 : vector<1x16x16x4xbf16> to vector<16x16x4xbf16>
    %24 = vector.shape_cast %23 : vector<16x16x4xbf16> to vector<256x4xbf16>
    %c3 = arith.constant 3 : index
    %c0_25 = arith.constant 0 : index
    %c0_26 = arith.constant 0 : index
    %25 = vector.load %arg2[%c3, %c0_25, %c0_26] : memref<9x4x8xbf16, #tpu.memory_space<vmem>>, vector<1x4x8xbf16>
    %26 = vector.shape_cast %25 : vector<1x4x8xbf16> to vector<4x8xbf16>
    %cst_27 = arith.constant dense<0.000000e+00> : vector<256x8xf32>
    %27 = tpu.matmul %24, %26, %cst_27 {dimension_numbers = #tpu.dot_dimension_numbers<[1], [0], [0], [1], [0, 0, 1, 1], [], []>} : vector<256x4xbf16>, vector<4x8xbf16>, vector<256x8xf32> -> vector<256x8xf32>
    %28 = arith.addf %21, %27 : vector<256x8xf32>
    %c0_28 = arith.constant 0 : index
    %c1_29 = arith.constant 1 : index
    %c1_30 = arith.constant 1 : index
    %c0_31 = arith.constant 0 : index
    %29 = vector.load %arg1[%c0_28, %c1_29, %c1_30, %c0_31] : memref<1x18x18x4xbf16, #tpu.memory_space<vmem>>, vector<1x16x16x4xbf16>
    %30 = vector.shape_cast %29 : vector<1x16x16x4xbf16> to vector<16x16x4xbf16>
    %31 = vector.shape_cast %30 : vector<16x16x4xbf16> to vector<256x4xbf16>
    %c4 = arith.constant 4 : index
    %c0_32 = arith.constant 0 : index
    %c0_33 = arith.constant 0 : index
    %32 = vector.load %arg2[%c4, %c0_32, %c0_33] : memref<9x4x8xbf16, #tpu.memory_space<vmem>>, vector<1x4x8xbf16>
    %33 = vector.shape_cast %32 : vector<1x4x8xbf16> to vector<4x8xbf16>
    %cst_34 = arith.constant dense<0.000000e+00> : vector<256x8xf32>
    %34 = tpu.matmul %31, %33, %cst_34 {dimension_numbers = #tpu.dot_dimension_numbers<[1], [0], [0], [1], [0, 0, 1, 1], [], []>} : vector<256x4xbf16>, vector<4x8xbf16>, vector<256x8xf32> -> vector<256x8xf32>
    %35 = arith.addf %28, %34 : vector<256x8xf32>
    %c0_35 = arith.constant 0 : index
    %c1_36 = arith.constant 1 : index
    %c2_37 = arith.constant 2 : index
    %c0_38 = arith.constant 0 : index
    %36 = vector.load %arg1[%c0_35, %c1_36, %c2_37, %c0_38] : memref<1x18x18x4xbf16, #tpu.memory_space<vmem>>, vector<1x16x16x4xbf16>
    %37 = vector.shape_cast %36 : vector<1x16x16x4xbf16> to vector<16x16x4xbf16>
    %38 = vector.shape_cast %37 : vector<16x16x4xbf16> to vector<256x4xbf16>
    %c5 = arith.constant 5 : index
    %c0_39 = arith.constant 0 : index
    %c0_40 = arith.constant 0 : index
    %39 = vector.load %arg2[%c5, %c0_39, %c0_40] : memref<9x4x8xbf16, #tpu.memory_space<vmem>>, vector<1x4x8xbf16>
    %40 = vector.shape_cast %39 : vector<1x4x8xbf16> to vector<4x8xbf16>
    %cst_41 = arith.constant dense<0.000000e+00> : vector<256x8xf32>
    %41 = tpu.matmul %38, %40, %cst_41 {dimension_numbers = #tpu.dot_dimension_numbers<[1], [0], [0], [1], [0, 0, 1, 1], [], []>} : vector<256x4xbf16>, vector<4x8xbf16>, vector<256x8xf32> -> vector<256x8xf32>
    %42 = arith.addf %35, %41 : vector<256x8xf32>
    %c0_42 = arith.constant 0 : index
    %c2_43 = arith.constant 2 : index
    %c0_44 = arith.constant 0 : index
    %c0_45 = arith.constant 0 : index
    %43 = vector.load %arg1[%c0_42, %c2_43, %c0_44, %c0_45] : memref<1x18x18x4xbf16, #tpu.memory_space<vmem>>, vector<1x16x16x4xbf16>
    %44 = vector.shape_cast %43 : vector<1x16x16x4xbf16> to vector<16x16x4xbf16>
    %45 = vector.shape_cast %44 : vector<16x16x4xbf16> to vector<256x4xbf16>
    %c6 = arith.constant 6 : index
    %c0_46 = arith.constant 0 : index
    %c0_47 = arith.constant 0 : index
    %46 = vector.load %arg2[%c6, %c0_46, %c0_47] : memref<9x4x8xbf16, #tpu.memory_space<vmem>>, vector<1x4x8xbf16>
    %47 = vector.shape_cast %46 : vector<1x4x8xbf16> to vector<4x8xbf16>
    %cst_48 = arith.constant dense<0.000000e+00> : vector<256x8xf32>
    %48 = tpu.matmul %45, %47, %cst_48 {dimension_numbers = #tpu.dot_dimension_numbers<[1], [0], [0], [1], [0, 0, 1, 1], [], []>} : vector<256x4xbf16>, vector<4x8xbf16>, vector<256x8xf32> -> vector<256x8xf32>
    %49 = arith.addf %42, %48 : vector<256x8xf32>
    %c0_49 = arith.constant 0 : index
    %c2_50 = arith.constant 2 : index
    %c1_51 = arith.constant 1 : index
    %c0_52 = arith.constant 0 : index
    %50 = vector.load %arg1[%c0_49, %c2_50, %c1_51, %c0_52] : memref<1x18x18x4xbf16, #tpu.memory_space<vmem>>, vector<1x16x16x4xbf16>
    %51 = vector.shape_cast %50 : vector<1x16x16x4xbf16> to vector<16x16x4xbf16>
    %52 = vector.shape_cast %51 : vector<16x16x4xbf16> to vector<256x4xbf16>
    %c7 = arith.constant 7 : index
    %c0_53 = arith.constant 0 : index
    %c0_54 = arith.constant 0 : index
    %53 = vector.load %arg2[%c7, %c0_53, %c0_54] : memref<9x4x8xbf16, #tpu.memory_space<vmem>>, vector<1x4x8xbf16>
    %54 = vector.shape_cast %53 : vector<1x4x8xbf16> to vector<4x8xbf16>
    %cst_55 = arith.constant dense<0.000000e+00> : vector<256x8xf32>
    %55 = tpu.matmul %52, %54, %cst_55 {dimension_numbers = #tpu.dot_dimension_numbers<[1], [0], [0], [1], [0, 0, 1, 1], [], []>} : vector<256x4xbf16>, vector<4x8xbf16>, vector<256x8xf32> -> vector<256x8xf32>
    %56 = arith.addf %49, %55 : vector<256x8xf32>
    %c0_56 = arith.constant 0 : index
    %c2_57 = arith.constant 2 : index
    %c2_58 = arith.constant 2 : index
    %c0_59 = arith.constant 0 : index
    %57 = vector.load %arg1[%c0_56, %c2_57, %c2_58, %c0_59] : memref<1x18x18x4xbf16, #tpu.memory_space<vmem>>, vector<1x16x16x4xbf16>
    %58 = vector.shape_cast %57 : vector<1x16x16x4xbf16> to vector<16x16x4xbf16>
    %59 = vector.shape_cast %58 : vector<16x16x4xbf16> to vector<256x4xbf16>
    %c8 = arith.constant 8 : index
    %c0_60 = arith.constant 0 : index
    %c0_61 = arith.constant 0 : index
    %60 = vector.load %arg2[%c8, %c0_60, %c0_61] : memref<9x4x8xbf16, #tpu.memory_space<vmem>>, vector<1x4x8xbf16>
    %61 = vector.shape_cast %60 : vector<1x4x8xbf16> to vector<4x8xbf16>
    %cst_62 = arith.constant dense<0.000000e+00> : vector<256x8xf32>
    %62 = tpu.matmul %59, %61, %cst_62 {dimension_numbers = #tpu.dot_dimension_numbers<[1], [0], [0], [1], [0, 0, 1, 1], [], []>} : vector<256x4xbf16>, vector<4x8xbf16>, vector<256x8xf32> -> vector<256x8xf32>
    %63 = arith.addf %56, %62 : vector<256x8xf32>
    %c0_63 = arith.constant 0 : index
    %c0_64 = arith.constant 0 : index
    %64 = vector.load %arg3[%c0_63, %c0_64] : memref<1x8xf32, #tpu.memory_space<vmem>>, vector<1x8xf32>
    %65 = vector.broadcast %64 : vector<1x8xf32> to vector<256x8xf32>
    %66 = arith.addf %63, %65 : vector<256x8xf32>
    %cst_65 = arith.constant 0.000000e+00 : f32
    %67 = vector.broadcast %cst_65 : f32 to vector<256x8xf32>
    %68 = arith.maximumf %66, %67 : vector<256x8xf32>
    %69 = tpu.transpose %68, [1, 0] : vector<256x8xf32> -> vector<8x256xf32>
    %c0_66 = arith.constant 0 : index
    %c0_67 = arith.constant 0 : index
    %c0_68 = arith.constant 0 : index
    %70 = vector.load %arg6[%c0_66, %c0_67, %c0_68] : memref<1x8x256xf32, #tpu.memory_space<vmem>>, vector<1x8x256xf32>
    %71 = vector.shape_cast %70 : vector<1x8x256xf32> to vector<8x256xf32>
    %72 = vector.shape_cast %69 : vector<8x256xf32> to vector<1x8x256xf32>
    tpu.vector_store %arg6[%c0_66, %c0_67, %c0_68], %72 {strides = array<i32>} : memref<1x8x256xf32, #tpu.memory_space<vmem>>, vector<1x8x256xf32>,
    %cst_69 = arith.constant dense<0.000000e+00> : vector<8xf32>
    %73 = vector.multi_reduction <add>, %68, %cst_69 [0] : vector<256x8xf32> to vector<8xf32>
    %74 = vector.shape_cast %73 : vector<8xf32> to vector<1x8xf32>
    %cst_70 = arith.constant 3.906250e-03 : f32
    %75 = vector.broadcast %cst_70 : f32 to vector<1x8xf32>
    %76 = arith.mulf %74, %75 : vector<1x8xf32>
    %c0_71 = arith.constant 0 : index
    %c0_72 = arith.constant 0 : index
    %77 = vector.load %arg4[%c0_71, %c0_72] : memref<8x10xf32, #tpu.memory_space<vmem>>, vector<8x10xf32>
    %cst_73 = arith.constant dense<0.000000e+00> : vector<1x10xf32>
    %78 = tpu.matmul %76, %77, %cst_73 {dimension_numbers = #tpu.dot_dimension_numbers<[1], [0], [0], [1], [0, 0, 1, 1], [], []>} : vector<1x8xf32>, vector<8x10xf32>, vector<1x10xf32> -> vector<1x10xf32>
    %c0_74 = arith.constant 0 : index
    %c0_75 = arith.constant 0 : index
    %79 = vector.load %arg5[%c0_74, %c0_75] : memref<1x10xf32, #tpu.memory_space<vmem>>, vector<1x10xf32>
    %80 = arith.addf %78, %79 : vector<1x10xf32>
    %c0_76 = arith.constant 0 : index
    %c0_77 = arith.constant 0 : index
    %c0_78 = arith.constant 0 : index
    %81 = vector.load %arg7[%c0_76, %c0_77, %c0_78] : memref<1x1x10xf32, #tpu.memory_space<vmem>>, vector<1x1x10xf32>
    %82 = vector.shape_cast %81 : vector<1x1x10xf32> to vector<1x10xf32>
    %83 = vector.shape_cast %80 : vector<1x10xf32> to vector<1x1x10xf32>
    tpu.vector_store %arg7[%c0_76, %c0_77, %c0_78], %83 {strides = array<i32>} : memref<1x1x10xf32, #tpu.memory_space<vmem>>, vector<1x1x10xf32>,
    return
  }
  func.func @transform_0(%arg0: i32) -> (i32, i32, i32, i32) {
    %c0_i32 = arith.constant 0 : i32
    %c0_i32_0 = arith.constant 0 : i32
    %c0_i32_1 = arith.constant 0 : i32
    %c0_i32_2 = arith.constant 0 : i32
    return %arg0, %c0_i32, %c0_i32_0, %c0_i32_1 : i32, i32, i32, i32
  }
  func.func @transform_1(%arg0: i32) -> (i32, i32, i32) {
    %c0_i32 = arith.constant 0 : i32
    %c0_i32_0 = arith.constant 0 : i32
    %c0_i32_1 = arith.constant 0 : i32
    %c0_i32_2 = arith.constant 0 : i32
    return %c0_i32, %c0_i32_0, %c0_i32_1 : i32, i32, i32
  }
  func.func @transform_2(%arg0: i32) -> (i32, i32) {
    %c0_i32 = arith.constant 0 : i32
    %c0_i32_0 = arith.constant 0 : i32
    %c0_i32_1 = arith.constant 0 : i32
    return %c0_i32, %c0_i32_0 : i32, i32
  }
  func.func @transform_3(%arg0: i32) -> (i32, i32) {
    %c0_i32 = arith.constant 0 : i32
    %c0_i32_0 = arith.constant 0 : i32
    %c0_i32_1 = arith.constant 0 : i32
    return %c0_i32, %c0_i32_0 : i32, i32
  }
  func.func @transform_4(%arg0: i32) -> (i32, i32) {
    %c0_i32 = arith.constant 0 : i32
    %c0_i32_0 = arith.constant 0 : i32
    %c0_i32_1 = arith.constant 0 : i32
    return %c0_i32, %c0_i32_0 : i32, i32
  }
  func.func @transform_5(%arg0: i32) -> (i32, i32, i32) {
    %c0_i32 = arith.constant 0 : i32
    %c0_i32_0 = arith.constant 0 : i32
    %c0_i32_1 = arith.constant 0 : i32
    return %arg0, %c0_i32, %c0_i32_0 : i32, i32, i32
  }
  func.func @transform_6(%arg0: i32) -> (i32, i32, i32) {
    %c0_i32 = arith.constant 0 : i32
    %c0_i32_0 = arith.constant 0 : i32
    %c0_i32_1 = arith.constant 0 : i32
    return %arg0, %c0_i32, %c0_i32_0 : i32, i32, i32
  }
}

</mosaic_0001>

<bundles_post_ra>
// kernel: concat_models_forward.1
= control target key start
LH: loop header
LB: loop body
LE: loop exit
PB: predicated region body
PF: predicated region fallthrough
CT: control target
= control target key end

     0   :  { %12 = vsyncpa [#allocation3], 0  ;;  %s6912_s0 = inlined_call_operand.vmem [shape: bf16[2,18,18,4], index: 0, kind: input, shape index: {}]   ;;  %s6913_s1 = inlined_call_operand.vmem [shape: bf16[9,4,8], index: 1, kind: input, shape index: {}]   ;;  %s6914_s2 = inlined_call_operand.vmem [shape: f32[1,8], index: 2, kind: input, shape index: {}]   ;;  %s6915_s3 = inlined_call_operand.vmem [shape: f32[8,10], index: 3, kind: input, shape index: {}]   ;;  %s6916_s4 = inlined_call_operand.vmem [shape: f32[1,10], index: 4, kind: input, shape index: {}]   ;;  %s6917_s5 = inlined_call_operand.vmem [shape: f32[2,8,256], index: 5, kind: output, shape index: {0}]   ;;  %s6918_s6 = inlined_call_operand.hbm [shape: f32[2,1,10], index: 6, kind: output, shape index: {1}]  }
   0x1   :  { %14 = vsyncpa [#allocation3 + $0x1], 0  ;;  %s5346_s21 = smov 0   ;;  %s5348_s22 = smov 0  }
   0x2   :  { %s5350_s23 = smov 0   ;;  %s5352_s24 = smov 0  }
   0x3 LB: > { %s5367_s25 = sadd.s32 4294967295, %s5309_s24   ;;  %s4507_s26 = sadd.s32 4294967294, %s5309_s24   ;;  %s5309_s24 = sphi %s5352_s24, %s6950_s24   ;;  %s5305_s23 = sphi %s5350_s23, %s6949_s23   ;;  %s5301_s22 = sphi %s5348_s22, %s6948_s22   ;;  %s5297_s21 = sphi %s5346_s21, %s6947_s21  }
   0x4   : > { %s5371_s27 = sadd.s32 1, %s5309_s24   ;;  %s163_s28 = sadd.s32 1, %s5305_s23 }
   0x5   : > { %s160_s29 = ssub.s32 %s5309_s24, %s5371_s27  ;;  %p173_p0 = scmp.ne.s32.totalorder %s5305_s23, %s5301_s22 }
   0x6   : > { %p161_p1 = scmp.eq.s32.totalorder %s160_s29, 0  ;;  %p174_p2 = scmp.eq.s32.totalorder %s5367_s25, 1 }
   0x7   : > { %p179_p3 = scmp.ne.s32.totalorder %s5301_s22, %s5297_s21  ;;  %p180_p4 = scmp.eq.s32.totalorder %s4507_s26, 1 }
   0x8   : > { %s5382_s30 = scalar_select %p161_p1, %s5305_s23, %s163_s28  }
   0x9   : > { %p5384_p5 = por %p174_p2, %p173_p0  ;;  %p5388_p6 = por %p180_p4, %p179_p3 }
   0xa   : > { %p4510_p7 = scmp.ge.s32.totalorder %s5309_s24, 1  ;;  %p218_p8 = scmp.lt.s32.totalorder %s5309_s24, 3 }
   0xc   : > { %p219_p9 = pnand %p4510_p7, %p218_p8 }
   0xe   : > { %222 = sbr.rel (%p219_p9) target bundleno = 920 (0x398), region = 40 }
  0x13   : > { %v4514_v0 = vld [vmem:[%s6913_s1 + $0x2] sm:$0x3]  ;;  %vm798_vm0 = vcmask 1041408   ;;  %p252_p10 = scmp.lt.s32.totalorder %s5367_s25, 1  ;;  %v4627_v2 = vld [vmem:[%s6913_s1 + $0x4] sm:$0x3]  ;;  %s4423_s17 = scalar_lea.hbm %s6918_s6, %s5367_s25 }
  0x14   : > { %v800_v1 = vsel %vm798_vm0, %v4514_v0, 0  ;;  %v1373_v3 = vsel %vm798_vm0, %v4627_v2, 0  ;;  %v4676_v4 = vld [vmem:[%s6913_s1 + $0x6] sm:$0x3]  ;;  %v4805_v5 = vld [vmem:[%s6913_s1 + $0x8] sm:$0x3] }
  0x15   : > { %5150 = vmatpush.bf16.msra.mxu1 %v800_v1  ;;  %5151 = vmatpush.bf16.msra.mxu2 %v800_v1  ;;  %s5403_s13 = scalar_select %p252_p10, %s5367_s25, 1  ;;  %v295_v6 = vld [vmem:[%s6913_s1] sm:$0x3]  ;;  %v1660_v7 = vsel %vm798_vm0, %v4676_v4, 0  ;;  %v2314_v8 = vsel %vm798_vm0, %v4805_v5, 0  ;;  %vm749_vm3 = vcmask 31744  }
  0x16   : > { %5152 = vmatpush.bf16.msra.mxu3 %v800_v1  ;;  %809 = vmatpush.bf16.msra.mxu0 %v800_v1  ;;  %v1020_v9 = vsel %vm798_vm0, %v295_v6, 0  ;;  %vm312_vm1 = vsmask.f32 3328  ;;  %vm313_vm2 = vsmask.f32 7440  ;;  %vm1159_vm5 = vcmask 1042432  }
  0x17   : > { %s5153_s20 = smul.u32 216, %s5403_s13  ;;  %vm5434_vm4 = vmor %vm312_vm1, %vm313_vm2  ;;  %vm1160_vm6 = vcmask 1046532   ;;  %vm4308_vm8 = vcmask 64512   ;;  %s5101_s9 = sshll.u32 %s5403_s13, 4  ;;  %vm4404_vm9 = vcmask 73728  }
  0x18   : > { %vm5600_vm7 = vmor %vm1159_vm5, %vm1160_vm6  ;;  %s261_s12 = scalar_lea.vmem %s6917_s5, %s5101_s9  ;;  %s250_s14 = sand.u32 1, %s5301_s22  }
  0x19   : > { %1382 = vmatpush.bf16.msrb.mxu2 %v1373_v3  ;;  %s5422_s29 = scalar_lea.vmem %s6912_s0, %s5153_s20  ;;  %1029 = vmatpush.bf16.msrb.mxu1 %v1020_v9  ;;  %s251_s20 = scalar_lea.vmem [#allocation2], %s250_s14 }
  0x1a   : > { %1669 = vmatpush.bf16.msrb.mxu3 %v1660_v7  ;;  %2323 = vmatpush.bf16.msrb.mxu0 %v2314_v8  ;;  %v273_v10 = vld [vmem:[%s5422_s29 + $0x3c] sm:$0xf]  ;;  %v274_v11 = vld [vmem:[%s5422_s29 + $0x40] sm:$0xf]  ;;  %v301_v12 = vld [vmem:[%s5422_s29 + $0x44] sm:$0x1] }
  0x1b   : > { %v436_v13 = vshrl.u32 %v273_v10, 16  ;;  %v439_v14 = vshll.u32 %v273_v10, 16  ;;  %v445_v15 = vshll.u32 %v274_v11, 16  ;;  %v449_v16 = vshrl.u32 %v274_v11, 16  ;;  %v275_v17 = vld [vmem:[%s5422_s29 + $0x48] sm:$0xf] }
  0x1c   : > { %v455_v18 = vshll.u32 %v301_v12, 16  ;;  %v276_v19 = vld [vmem:[%s5422_s29 + $0x4c] sm:$0xf]  ;;  %v302_v20 = vld [vmem:[%s5422_s29 + $0x50] sm:$0x1]  ;;  %v460_v21 = vshrl.u32 %v275_v17, 16 }
  0x1d   : > { %v438_v22 = vrot.slane %v436_v13, 4  ;;  %v441_v23 = vrot.slane %v439_v14, 5  ;;  %v447_v24 = vrot.slane %v445_v15, 5  ;;  %v451_v25 = vrot.slane %v449_v16, 4  ;;  %v285_v26 = vld [vmem:[%s5422_s29 + $0x84] sm:$0xf] }
  0x1e   : > { %v457_v27 = vrot.slane %v455_v18, 5  ;;  %v462_v28 = vrot.slane %v460_v21, 4  ;;  %v463_v29 = vshll.u32 %v275_v17, 16  ;;  %v469_v30 = vshll.u32 %v276_v19, 16  ;;  %v286_v35 = vld [vmem:[%s5422_s29 + $0x88] sm:$0xf] }
  0x1f   : > { %v442_v31 = vor.u32 %v441_v23, %v438_v22  ;;  %v452_v32 = vor.u32 %v451_v25, %v447_v24  ;;  %v473_v33 = vshrl.u32 %v276_v19, 16  ;;  %v479_v34 = vshll.u32 %v302_v20, 16  ;;  %v307_v46 = vld [vmem:[%s5422_s29 + $0x8c] sm:$0x1]  ;;  %v263_v62 = vld [vmem:[%s5422_s29] sm:$0xf] }
  0x20   : > { %v465_v37 = vrot.slane %v463_v29, 5  ;;  %v471_v38 = vrot.slane %v469_v30, 5  ;;  %v580_v39 = vshrl.u32 %v285_v26, 16  ;;  %v583_v40 = vshll.u32 %v285_v26, 16  ;;  %v5447_v2 = vld [vmem:[%s5422_s29 + $0x4] sm:$0xf] }
  0x21   : > { %v443_v41 = vrot.slane %v442_v31, 4  ;;  %v453_v42 = vrot.slane %v452_v32, 4  ;;  %v475_v43 = vrot.slane %v473_v33, 4  ;;  %v481_v44 = vrot.slane %v479_v34, 5  ;;  %v5452_v7 = vld [vmem:[%s5422_s29 + $0x8] sm:$0x1] }
  0x22   : > { %v466_v45 = vor.u32 %v465_v37, %v462_v28  ;;  %v582_v47 = vrot.slane %v580_v39, 4  ;;  %v585_v48 = vrot.slane %v583_v40, 5  ;;  %v589_v49 = vshll.u32 %v286_v35, 16  ;;  %v277_v16 = vld [vmem:[%s5422_s29 + $0x54] sm:$0xf]  ;;  %s4425_s13 = sshll.u32 %s251_s20, 4  ;;  %s4426_s13 = int_to_ptr.vmem [resolvable:$true] %s4425_s13 }
  0x23   : > { %v448_v50 = vsel %vm5434_vm4, %v443_v41, %v447_v24  ;;  %v458_v51 = vsel %vm5434_vm4, %v453_v42, %v457_v27  ;;  %v476_v52 = vor.u32 %v475_v43, %v471_v38  ;;  %v593_v53 = vshrl.u32 %v286_v35, 16  ;;  %v278_v21 = vld [vmem:[%s5422_s29 + $0x58] sm:$0xf]  ;;  %v303_v25 = vld [vmem:[%s5422_s29 + $0x5c] sm:$0x1]  ;;  %s4427_s26 = sshll.u32 %s4423_s17, 4  ;;  %s4428_s26 = int_to_ptr.hbm [resolvable:$true] %s4427_s26 }
  0x24   : > { %v711_v54 = vunpack.c.l.b16 %v448_v50  ;;  %v712_v55 = vunpack.c.l.b16 %v458_v51  ;;  %v467_v56 = vrot.slane %v466_v45, 4  ;;  %v586_v57 = vor.u32 %v585_v48, %v582_v47  ;;  %v287_v34 = vld [vmem:[%s5422_s29 + $0x90] sm:$0xf]  ;;  %v308_v47 = vld [vmem:[%s5422_s29 + $0x98] sm:$0x1]  ;;  %s4412_s28 = scalar_lea.sflag [#allocation3], %s250_s14 }
  0x25   : > { %v477_v58 = vrot.slane %v476_v52, 4  ;;  %v591_v59 = vrot.slane %v589_v49, 5  ;;  %v595_v60 = vrot.slane %v593_v53, 4  ;;  %v599_v61 = vshll.u32 %v307_v46, 16  ;;  %s5267_s11 = scalar_lea.hbm %s6918_s6, 2 }
  0x26   : > { %v738_v63 = vpack.c.b16 %v712_v55, %v711_v54  ;;  %v472_v0 = vsel %vm5434_vm4, %v467_v56, %v471_v38  ;;  %v587_v1 = vrot.slane %v586_v57, 4  ;;  %v316_v10 = vshrl.u32 %v263_v62, 16 }
  0x27   : > { %v482_v3 = vsel %vm5434_vm4, %v477_v58, %v481_v44  ;;  %v713_v4 = vunpack.c.l.b16 %v472_v0  ;;  %v596_v5 = vor.u32 %v595_v60, %v591_v59  ;;  %v601_v6 = vrot.slane %v599_v61, 5  ;;  %v288_v44 = vld [vmem:[%s5422_s29 + $0x94] sm:$0xf]  ;;  %v265_v61 = vld [vmem:[%s5422_s29 + $0xc] sm:$0xf] }
  0x28   : > { %4520 = vmatmul.msk.bf16.vlgmr.msra.gmra.mxu1 %vm749_vm3, %v738_v63  ;;  %v714_v8 = vunpack.c.l.b16 %v482_v3  ;;  %v592_v9 = vsel %vm5434_vm4, %v587_v1, %v591_v59  ;;  %v319_v11 = vshll.u32 %v263_v62, 16  ;;  %v325_v14 = vshll.u32 %v5447_v2, 16  ;;  %v5102_v1 = vld [vmem:[%s5422_s29] sm:$0xff]  ;;  %v5477_v3 = vld [vmem:[%s5422_s29 + $0x10] sm:$0xf] }
  0x29   : > { %v597_v12 = vrot.slane %v596_v5, 4  ;;  %v723_v13 = vunpack.c.l.b16 %v592_v9  ;;  %v329_v15 = vshrl.u32 %v5447_v2, 16  ;;  %v318_v18 = vrot.slane %v316_v10, 4  ;;  %v5484_v9 = vld [vmem:[%s5422_s29 + $0x14] sm:$0x1] }
  0x2a   : > { %v739_v17 = vpack.c.b16 %v714_v8, %v713_v4  ;;  %v321_v19 = vrot.slane %v319_v11, 5  ;;  %v335_v20 = vshll.u32 %v5452_v7, 16  ;;  %v327_v23 = vrot.slane %v325_v14, 5 }
  0x2b   : > { %v602_v22 = vsel %vm5434_vm4, %v597_v12, %v601_v6  ;;  %v331_v24 = vrot.slane %v329_v15, 4  ;;  %v484_v29 = vshrl.u32 %v277_v16, 16  ;;  %v487_v31 = vshll.u32 %v277_v16, 16 }
  0x2c   : > { %4521 = vmatmul.msk.bf16.vlgmr.msra.gmra.mxu2 %vm749_vm3, %v739_v17  ;;  %v724_v26 = vunpack.c.l.b16 %v602_v22  ;;  %v322_v27 = vor.u32 %v321_v19, %v318_v18  ;;  %v337_v28 = vrot.slane %v335_v20, 5  ;;  %v493_v32 = vshll.u32 %v278_v21, 16  ;;  %v279_v18 = vld [vmem:[%s5422_s29 + $0x60] sm:$0xf] }
  0x2d   : > { %v332_v30 = vor.u32 %v331_v24, %v327_v23  ;;  %v497_v33 = vshrl.u32 %v278_v21, 16  ;;  %v486_v38 = vrot.slane %v484_v29, 4  ;;  %v503_v39 = vshll.u32 %v303_v25, 16 }
  0x2e   : > { %v744_v35 = vpack.c.b16 %v724_v26, %v723_v13  ;;  %v323_v37 = vrot.slane %v322_v27, 4  ;;  %v489_v41 = vrot.slane %v487_v31, 5  ;;  %v495_v42 = vrot.slane %v493_v32, 5  ;;  %v280_v27 = vld [vmem:[%s5422_s29 + $0x64] sm:$0xf] }
  0x2f   : > { %v333_v40 = vrot.slane %v332_v30, 4  ;;  %v499_v43 = vrot.slane %v497_v33, 4  ;;  %v505_v46 = vrot.slane %v503_v39, 5  ;;  %v604_v48 = vshrl.u32 %v287_v34, 16  ;;  %v304_v30 = vld [vmem:[%s5422_s29 + $0x68] sm:$0x1] }
  0x30   : > { %4526 = vmatmul.msk.bf16.vlgmr.msra.gmra.mxu3 %vm749_vm3, %v744_v35  ;;  %v328_v45 = vsel %vm5434_vm4, %v323_v37, %v327_v23  ;;  %v490_v51 = vor.u32 %v489_v41, %v486_v38  ;;  %v607_v55 = vshll.u32 %v287_v34, 16  ;;  %v613_v56 = vshll.u32 %v288_v44, 16 }
  0x31   : > { %v338_v49 = vsel %vm5434_vm4, %v333_v40, %v337_v28  ;;  %v701_v50 = vunpack.c.l.b16 %v328_v45  ;;  %v500_v52 = vor.u32 %v499_v43, %v495_v42  ;;  %v606_v54 = vrot.slane %v604_v48, 4 }
  0x32   : > { %v702_v53 = vunpack.c.l.b16 %v338_v49  ;;  %v491_v57 = vrot.slane %v490_v51, 4  ;;  %v617_v59 = vshrl.u32 %v288_v44, 16  ;;  %v623_v60 = vshll.u32 %v308_v47, 16 }
  0x33   : > { %v501_v58 = vrot.slane %v500_v52, 4  ;;  %v609_v63 = vrot.slane %v607_v55, 5  ;;  %v615_v0 = vrot.slane %v613_v56, 5  ;;  %v340_v13 = vshrl.u32 %v265_v61, 16  ;;  %v309_v55 = vld [vmem:[%s5422_s29 + $0xa4] sm:$0x1] }
  0x34   : > { %v733_v62 = vpack.c.b16 %v702_v53, %v701_v50  ;;  %v496_v4 = vsel %vm5434_vm4, %v491_v57, %v495_v42  ;;  %v619_v6 = vrot.slane %v617_v59, 4  ;;  %v625_v8 = vrot.slane %v623_v60, 5  ;;  %v290_v50 = vld [vmem:[%s5422_s29 + $0xa0] sm:$0xf] }
  0x35   : > { %v506_v5 = vsel %vm5434_vm4, %v501_v58, %v505_v46  ;;  %v715_v10 = vunpack.c.l.b16 %v496_v4  ;;  %v610_v12 = vor.u32 %v609_v63, %v606_v54  ;;  %v343_v15 = vshll.u32 %v265_v61, 16  ;;  %v289_v46 = vld [vmem:[%s5422_s29 + $0x9c] sm:$0xf] }
  0x36   : > { %4515 = vmatmul.msk.bf16.vlgmr.msra.gmra.mxu0 %vm749_vm3, %v733_v62  ;;  %v716_v11 = vunpack.c.l.b16 %v506_v5  ;;  %v620_v14 = vor.u32 %v619_v6, %v615_v0  ;;  %v349_v16 = vshll.u32 %v5477_v3, 16  ;;  %v353_v17 = vshrl.u32 %v5477_v3, 16 }
  0x37   : > { %v611_v20 = vrot.slane %v610_v12, 4  ;;  %v342_v21 = vrot.slane %v340_v13, 4  ;;  %v359_v22 = vshll.u32 %v5484_v9, 16  ;;  %v345_v24 = vrot.slane %v343_v15, 5 }
  0x38   : > { %v740_v19 = vpack.c.b16 %v716_v11, %v715_v10  ;;  %4595 = vmatmul.msk.bf16.vlgmr.msrb.gmra.mxu1 %vm749_vm3, %v5102_v1  ;;  %v621_v23 = vrot.slane %v620_v14, 4  ;;  %v351_v25 = vrot.slane %v349_v16, 5  ;;  %v355_v26 = vrot.slane %v353_v17, 4  ;;  %v5103_v16 = vld [vmem:[%s5422_s29 + $0xc] sm:$0xff]  ;;  %v5515_v17 = vld [vmem:[%s5422_s29 + $0x20] sm:$0x1] }
  0x39   : > { %v616_v28 = vsel %vm5434_vm4, %v611_v20, %v615_v0  ;;  %v361_v29 = vrot.slane %v359_v22, 5  ;;  %v508_v31 = vshrl.u32 %v279_v18, 16  ;;  %v511_v32 = vshll.u32 %v279_v18, 16  ;;  %v267_v0 = vld [vmem:[%s5422_s29 + $0x18] sm:$0xf] }
  0x3a   : > { %v626_v33 = vsel %vm5434_vm4, %v621_v23, %v625_v8  ;;  %v725_v34 = vunpack.c.l.b16 %v616_v28  ;;  %v346_v35 = vor.u32 %v345_v24, %v342_v21  ;;  %v356_v37 = vor.u32 %v355_v26, %v351_v25  ;;  %v5511_v8 = vld [vmem:[%s5422_s29 + $0x1c] sm:$0xf]  ;;  %v281_v23 = vld [vmem:[%s5422_s29 + $0x6c] sm:$0xf] }
  0x3b   : > { %v726_v38 = vunpack.c.l.b16 %v626_v33  ;;  %v510_v39 = vrot.slane %v508_v31, 4  ;;  %v513_v40 = vrot.slane %v511_v32, 5  ;;  %v517_v41 = vshll.u32 %v280_v27, 16 }
  0x3c   : > { %4522 = vmatmul.msk.bf16.gmra.mxu2 %vm749_vm3, %v740_v19  ;;  %v347_v42 = vrot.slane %v346_v35, 4  ;;  %v357_v43 = vrot.slane %v356_v37, 4  ;;  %v521_v44 = vshrl.u32 %v280_v27, 16  ;;  %v527_v45 = vshll.u32 %v304_v30, 16  ;;  %v282_v35 = vld [vmem:[%s5422_s29 + $0x70] sm:$0xf] }
  0x3d   : > { %v745_v47 = vpack.c.b16 %v726_v38, %v725_v34  ;;  %v514_v48 = vor.u32 %v513_v40, %v510_v39  ;;  %v519_v49 = vrot.slane %v517_v41, 5  ;;  %v628_v59 = vshrl.u32 %v289_v46, 16  ;;  %v305_v41 = vld [vmem:[%s5422_s29 + $0x74] sm:$0x1] }
  0x3e   : > { %v352_v51 = vsel %vm5434_vm4, %v347_v42, %v351_v25  ;;  %v362_v52 = vsel %vm5434_vm4, %v357_v43, %v361_v29  ;;  %v523_v53 = vrot.slane %v521_v44, 4  ;;  %v529_v54 = vrot.slane %v527_v45, 5 }
  0x3f   : > { %v703_v56 = vunpack.c.l.b16 %v352_v51  ;;  %v704_v57 = vunpack.c.l.b16 %v362_v52  ;;  %v515_v58 = vrot.slane %v514_v48, 4  ;;  %v631_v61 = vshll.u32 %v289_v46, 16 }
  0x40   : > { %4527 = vmatmul.msk.bf16.gmra.mxu3 %vm749_vm3, %v745_v47  ;;  %v524_v60 = vor.u32 %v523_v53, %v519_v49  ;;  %v637_v62 = vshll.u32 %v290_v50, 16  ;;  %v641_v63 = vshrl.u32 %v290_v50, 16  ;;  %v630_v5 = vrot.slane %v628_v59, 4  ;;  %v292_v59 = vld [vmem:[%s5422_s29 + $0xac] sm:$0xf] }
  0x41   : > { %v734_v1 = vpack.c.b16 %v704_v57, %v703_v56  ;;  %v520_v4 = vsel %vm5434_vm4, %v515_v58, %v519_v49  ;;  %v647_v6 = vshll.u32 %v309_v55, 16  ;;  %v633_v11 = vrot.slane %v631_v61, 5 }
  0x42   : > { %v525_v10 = vrot.slane %v524_v60, 4  ;;  %v639_v12 = vrot.slane %v637_v62, 5  ;;  %v717_v13 = vunpack.c.l.b16 %v520_v4  ;;  %v643_v14 = vrot.slane %v641_v63, 4  ;;  %v310_v60 = vld [vmem:[%s5422_s29 + $0xb0] sm:$0x1] }
  0x43   : > { %v649_v15 = vrot.slane %v647_v6, 5  ;;  %v364_v18 = vshrl.u32 %v267_v0, 16  ;;  %v634_v20 = vor.u32 %v633_v11, %v630_v5  ;;  %v367_v21 = vshll.u32 %v267_v0, 16 }
  0x44   : > { %v530_v19 = vsel %vm5434_vm4, %v525_v10, %v529_v54  ;;  %v373_v22 = vshll.u32 %v5511_v8, 16  ;;  %v644_v25 = vor.u32 %v643_v14, %v639_v12  ;;  %v377_v27 = vshrl.u32 %v5511_v8, 16  ;;  %v291_v54 = vld [vmem:[%s5422_s29 + $0xa8] sm:$0xf]  ;;  %v269_v14 = vld [vmem:[%s5422_s29 + $0x24] sm:$0xf] }
  0x45   : > { %v718_v24 = vunpack.c.l.b16 %v530_v19  ;;  %v366_v26 = vrot.slane %v364_v18, 4  ;;  %v635_v28 = vrot.slane %v634_v20, 4  ;;  %v369_v29 = vrot.slane %v367_v21, 5  ;;  %v5544_v19 = vld [vmem:[%s5422_s29 + $0x28] sm:$0xf] }
  0x46   : > { %4516 = vmatmul.msk.bf16.gmra.mxu0 %vm749_vm3, %v734_v1  ;;  %v375_v30 = vrot.slane %v373_v22, 5  ;;  %v383_v31 = vshll.u32 %v5515_v17, 16  ;;  %v645_v33 = vrot.slane %v644_v25, 4  ;;  %v379_v34 = vrot.slane %v377_v27, 4  ;;  %v5547_v27 = vld [vmem:[%s5422_s29 + $0x2c] sm:$0x1] }
  0x47   : > { %v741_v32 = vpack.c.b16 %v718_v24, %v717_v13  ;;  %v532_v37 = vshrl.u32 %v281_v23, 16  ;;  %v640_v38 = vsel %vm5434_vm4, %v635_v28, %v639_v12  ;;  %v370_v39 = vor.u32 %v369_v29, %v366_v26 }
  0x48   : > { %4596 = vmatmul.msk.bf16.gmra.mxu1 %vm749_vm3, %v5103_v16  ;;  %v385_v40 = vrot.slane %v383_v31, 5  ;;  %v535_v42 = vshll.u32 %v281_v23, 16  ;;  %v650_v43 = vsel %vm5434_vm4, %v645_v33, %v649_v15  ;;  %v727_v44 = vunpack.c.l.b16 %v640_v38  ;;  %v5104_v31 = vld [vmem:[%s5422_s29 + $0x18] sm:$0xff] }
  0x49   : > { %v380_v45 = vor.u32 %v379_v34, %v375_v30  ;;  %v534_v46 = vrot.slane %v532_v37, 4  ;;  %v728_v47 = vunpack.c.l.b16 %v650_v43  ;;  %v371_v48 = vrot.slane %v370_v39, 4  ;;  %v283_v34 = vld [vmem:[%s5422_s29 + $0x78] sm:$0xf] }
  0x4a   : > { %v537_v49 = vrot.slane %v535_v42, 5  ;;  %v541_v50 = vshll.u32 %v282_v35, 16  ;;  %v545_v52 = vshrl.u32 %v282_v35, 16  ;;  %v551_v53 = vshll.u32 %v305_v41, 16 }
  0x4b   : > { %v381_v51 = vrot.slane %v380_v45, 4  ;;  %v746_v55 = vpack.c.b16 %v728_v47, %v727_v44  ;;  %v376_v56 = vsel %vm5434_vm4, %v371_v48, %v375_v30  ;;  %v652_v5 = vshrl.u32 %v291_v54, 16  ;;  %v284_v47 = vld [vmem:[%s5422_s29 + $0x7c] sm:$0xf]  ;;  %v306_v48 = vld [vmem:[%s5422_s29 + $0x80] sm:$0x1] }
  0x4c   : > { %4523 = vmatmul.msk.bf16.gmra.mxu2 %vm749_vm3, %v741_v32  ;;  %v538_v57 = vor.u32 %v537_v49, %v534_v46  ;;  %v543_v58 = vrot.slane %v541_v50, 5  ;;  %v705_v62 = vunpack.c.l.b16 %v376_v56  ;;  %v547_v63 = vrot.slane %v545_v52, 4 }
  0x4d   : > { %v386_v61 = vsel %vm5434_vm4, %v381_v51, %v385_v40  ;;  %v553_v0 = vrot.slane %v551_v53, 5  ;;  %v655_v6 = vshll.u32 %v291_v54, 16  ;;  %v661_v11 = vshll.u32 %v292_v59, 16 }
  0x4e   : > { %v706_v1 = vunpack.c.l.b16 %v386_v61  ;;  %v539_v4 = vrot.slane %v538_v57, 4  ;;  %v548_v10 = vor.u32 %v547_v63, %v543_v58  ;;  %v665_v12 = vshrl.u32 %v292_v59, 16 }
  0x4f   : > { %v671_v13 = vshll.u32 %v310_v60, 16  ;;  %v654_v16 = vrot.slane %v652_v5, 4  ;;  %v657_v18 = vrot.slane %v655_v6, 5  ;;  %v663_v22 = vrot.slane %v661_v11, 5 }
  0x50   : > { %4528 = vmatmul.msk.bf16.gmra.mxu3 %vm749_vm3, %v746_v55  ;;  %v544_v15 = vsel %vm5434_vm4, %v539_v4, %v543_v58  ;;  %v735_v20 = vpack.c.b16 %v706_v1, %v705_v62  ;;  %v549_v21 = vrot.slane %v548_v10, 4  ;;  %v667_v23 = vrot.slane %v665_v12, 4  ;;  %v293_v62 = vld [vmem:[%s5422_s29 + $0xb4] sm:$0xf]  ;;  %v294_v4 = vld [vmem:[%s5422_s29 + $0xb8] sm:$0xf] }
  0x51   : > { %v719_v24 = vunpack.c.l.b16 %v544_v15  ;;  %v658_v25 = vor.u32 %v657_v18, %v654_v16  ;;  %v673_v26 = vrot.slane %v671_v13, 5  ;;  %v388_v28 = vshrl.u32 %v269_v14, 16  ;;  %v311_v12 = vld [vmem:[%s5422_s29 + $0xbc] sm:$0x1] }
  0x52   : > { %v554_v29 = vsel %vm5434_vm4, %v549_v21, %v553_v0  ;;  %v668_v30 = vor.u32 %v667_v23, %v663_v22  ;;  %v391_v32 = vshll.u32 %v269_v14, 16  ;;  %v397_v33 = vshll.u32 %v5544_v19, 16 }
  0x53   : > { %v720_v35 = vunpack.c.l.b16 %v554_v29  ;;  %v659_v37 = vrot.slane %v658_v25, 4  ;;  %v390_v38 = vrot.slane %v388_v28, 4  ;;  %v401_v39 = vshrl.u32 %v5544_v19, 16  ;;  %v271_v28 = vld [vmem:[%s5422_s29 + $0x30] sm:$0xf] }
  0x54   : > { %v669_v40 = vrot.slane %v668_v30, 4  ;;  %v393_v41 = vrot.slane %v391_v32, 5  ;;  %v399_v42 = vrot.slane %v397_v33, 5  ;;  %v407_v43 = vshll.u32 %v5547_v27, 16  ;;  %v5576_v33 = vld [vmem:[%s5422_s29 + $0x34] sm:$0xf] }
  0x55   : > { %v742_v44 = vpack.c.b16 %v720_v35, %v719_v24  ;;  %v664_v45 = vsel %vm5434_vm4, %v659_v37, %v663_v22  ;;  %v403_v46 = vrot.slane %v401_v39, 4  ;;  %v556_v49 = vshrl.u32 %v283_v34, 16  ;;  %v5581_v39 = vld [vmem:[%s5422_s29 + $0x38] sm:$0x1] }
  0x56   : > { %4517 = vmatmul.msk.bf16.gmra.mxu0 %vm749_vm3, %v735_v20  ;;  %v674_v50 = vsel %vm5434_vm4, %v669_v40, %v673_v26  ;;  %v729_v51 = vunpack.c.l.b16 %v664_v45  ;;  %v394_v52 = vor.u32 %v393_v41, %v390_v38  ;;  %v409_v53 = vrot.slane %v407_v43, 5  ;;  %v5105_v45 = vld [vmem:[%s5422_s29 + $0x24] sm:$0xff] }
  0x57   : > { %v730_v54 = vunpack.c.l.b16 %v674_v50  ;;  %v404_v55 = vor.u32 %v403_v46, %v399_v42  ;;  %v558_v56 = vrot.slane %v556_v49, 4  ;;  %v559_v57 = vshll.u32 %v283_v34, 16 }
  0x58   : > { %4597 = vmatmul.msk.bf16.gmra.mxu1 %vm749_vm3, %v5104_v31  ;;  %v395_v58 = vrot.slane %v394_v52, 4  ;;  %v565_v59 = vshll.u32 %v284_v47, 16  ;;  %v569_v60 = vshrl.u32 %v284_v47, 16  ;;  %v575_v61 = vshll.u32 %v306_v48, 16  ;;  %v1111_v52 = vld [vmem:[%s5422_s29] sm:$0xe] }
  0x59   : > { %v747_v63 = vpack.c.b16 %v730_v54, %v729_v51  ;;  %v405_v0 = vrot.slane %v404_v55, 4  ;;  %v561_v1 = vrot.slane %v559_v57, 5  ;;  %v676_v16 = vshrl.u32 %v293_v62, 16  ;;  %v4757_v57 = vld [vmem:[%s5422_s29 + $0xc] sm:$0xf] }
  0x5a   : > { %v400_v5 = vsel %vm5434_vm4, %v395_v58, %v399_v42  ;;  %v567_v6 = vrot.slane %v565_v59, 5  ;;  %v571_v10 = vrot.slane %v569_v60, 4  ;;  %v577_v11 = vrot.slane %v575_v61, 5  ;;  %v4903_v61 = vld [vmem:[%s6913_s1 + $0xc] sm:$0x3] }
  0x5b   : > { %v410_v13 = vsel %vm5434_vm4, %v405_v0, %v409_v53  ;;  %v707_v14 = vunpack.c.l.b16 %v400_v5  ;;  %v562_v15 = vor.u32 %v561_v1, %v558_v56  ;;  %v679_v21 = vshll.u32 %v293_v62, 16 }
  0x5c   : > { %4524 = vmatmul.msk.bf16.gmra.mxu2 %vm749_vm3, %v742_v44  ;;  %v708_v18 = vunpack.c.l.b16 %v410_v13  ;;  %v572_v20 = vor.u32 %v571_v10, %v567_v6  ;;  %v685_v22 = vshll.u32 %v294_v4, 16  ;;  %v678_v24 = vrot.slane %v676_v16, 4  ;;  %v5607_v13 = vld [vmem:[%s5422_s29 + $0x10] sm:$0xf] }
  0x5d   : > { %v563_v23 = vrot.slane %v562_v15, 4  ;;  %v689_v25 = vshrl.u32 %v294_v4, 16  ;;  %v695_v26 = vshll.u32 %v311_v12, 16  ;;  %v1167_v29 = vrot.slane %v5452_v7, 5 }
  0x5e   : > { %v573_v30 = vrot.slane %v572_v20, 4  ;;  %v681_v31 = vrot.slane %v679_v21, 5  ;;  %v687_v32 = vrot.slane %v685_v22, 5  ;;  %v736_v34 = vpack.c.b16 %v708_v18, %v707_v14 }
  0x5f   : > { %v568_v35 = vsel %vm5434_vm4, %v563_v23, %v567_v6  ;;  %v691_v37 = vrot.slane %v689_v25, 4  ;;  %v697_v38 = vrot.slane %v695_v26, 5  ;;  %v412_v42 = vshrl.u32 %v271_v28, 16 }
  0x60   : > { %4529 = vmatmul.msk.bf16.gmra.mxu3 %vm749_vm3, %v747_v63  ;;  %v578_v7 = vsel %vm5434_vm4, %v573_v30, %v577_v11  ;;  %v721_v40 = vunpack.c.l.b16 %v568_v35  ;;  %v682_v41 = vor.u32 %v681_v31, %v678_v24  ;;  %v415_v46 = vshll.u32 %v271_v28, 16  ;;  %v5032_v30 = vld [vmem:[%s6913_s1 + $0xe] sm:$0x3]  ;;  %v4854_v31 = vld [vmem:[%s6913_s1 + $0xa] sm:$0x3] }
  0x61   : > { %v722_v43 = vunpack.c.l.b16 %v578_v7  ;;  %v692_v44 = vor.u32 %v691_v37, %v687_v32  ;;  %v421_v47 = vshll.u32 %v5576_v33, 16  ;;  %v414_v49 = vrot.slane %v412_v42, 4  ;;  %v5632_v42 = vld [vmem:[%s5422_s29 + $0x14] sm:$0x1] }
  0x62   : > { %v683_v48 = vrot.slane %v682_v41, 4  ;;  %v425_v50 = vshrl.u32 %v5576_v33, 16  ;;  %v431_v51 = vshll.u32 %v5581_v39, 16  ;;  %v417_v55 = vrot.slane %v415_v46, 5 }
  0x63   : > { %v743_v53 = vpack.c.b16 %v722_v43, %v721_v40  ;;  %v693_v54 = vrot.slane %v692_v44, 4  ;;  %v423_v56 = vrot.slane %v421_v47, 5  ;;  %v4611_v6 = vrot.slane %v1111_v52, 9 }
  0x64   : > { %v688_v58 = vsel %vm5434_vm4, %v683_v48, %v687_v32  ;;  %v427_v59 = vrot.slane %v425_v50, 4  ;;  %v433_v60 = vrot.slane %v431_v51, 5  ;;  %v418_v0 = vor.u32 %v417_v55, %v414_v49 }
  0x65   : > { %v698_v62 = vsel %vm5434_vm4, %v693_v54, %v697_v38  ;;  %v731_v63 = vunpack.c.l.b16 %v688_v58  ;;  %v1164_v10 = vrot.slane %v5447_v2, 5  ;;  %v2999_v12 = vsel %vm798_vm0, %v4903_v61, 0  ;;  %v1112_v38 = vld [vmem:[%s5422_s29 + $0xc] sm:$0xe]  ;;  %v4761_v61 = vld [vmem:[%s5422_s29 + $0x1c] sm:$0xf] }
  0x66   : > { %4518 = vmatmul.msk.bf16.gmra.mxu0 %vm749_vm3, %v736_v34  ;;  %v732_v1 = vunpack.c.l.b16 %v698_v62  ;;  %v428_v4 = vor.u32 %v427_v59, %v423_v56  ;;  %v419_v11 = vrot.slane %v418_v0, 4  ;;  %v1832_v14 = vshrl.u32 %v4757_v57, 16  ;;  %3008 = vmatpush.bf16.msra.mxu2 %v2999_v12  ;;  %v1113_v62 = vld [vmem:[%s5422_s29 + $0x18] sm:$0xe] }
  0x67   : > { %v1165_v16 = vsel %vm5600_vm7, %v4611_v6, %v1164_v10  ;;  %v1166_v18 = vrot.slane %v1164_v10, 4  ;;  %v1835_v20 = vshll.u32 %v4757_v57, 16  ;;  %v1841_v25 = vshll.u32 %v5607_v13, 16 }
  0x68   : > { %4598 = vmatmul.msk.bf16.gmra.mxu1 %vm749_vm3, %v5105_v45  ;;  %v429_v15 = vrot.slane %v428_v4, 4  ;;  %v424_v21 = vsel %vm5434_vm4, %v419_v11, %v423_v56  ;;  %v1276_v22 = vunpack.c.l.b16 %v1165_v16  ;;  %v748_v2 = vpack.c.b16 %v732_v1, %v731_v63 }
  0x69   : > { %v1168_v24 = vsel %vm5600_vm7, %v1166_v18, %v1167_v29  ;;  %v1845_v28 = vshrl.u32 %v5607_v13, 16  ;;  %v709_v32 = vunpack.c.l.b16 %v424_v21  ;;  %v1834_v35 = vrot.slane %v1832_v14, 4  ;;  %v5081_v29 = vld [vmem:[%s6913_s1 + $0x10] sm:$0x3] }
  0x6a   : > { %v434_v23 = vsel %vm5434_vm4, %v429_v15, %v433_v60  ;;  %v1277_v26 = vunpack.c.l.b16 %v1168_v24  ;;  %v1837_v37 = vrot.slane %v1835_v20, 5  ;;  %v1843_v40 = vrot.slane %v1841_v25, 5  ;;  %v4762_v24 = vld [vmem:[%s5422_s29 + $0x20] sm:$0x1] }
  0x6b   : > { %v710_v34 = vunpack.c.l.b16 %v434_v23  ;;  %v1847_v41 = vrot.slane %v1845_v28, 4  ;;  %v3653_v43 = vsel %vm798_vm0, %v5032_v30, 0  ;;  %v2712_v44 = vsel %vm798_vm0, %v4854_v31, 0 }
  0x6c   : > { %4525 = vmatmul.msk.bf16.gmra.mxu2 %vm749_vm3, %v743_v53  ;;  %v1308_v7 = vpack.c.b16 %v1277_v26, %v1276_v22  ;;  %3662 = vmatpush.bf16.msra.mxu3 %v3653_v43  ;;  %v4051_v45 = vsel %vm798_vm0, %v5081_v29, 0  ;;  %v4612_v46 = vrot.slane %v1112_v38, 9  ;;  %v1838_v48 = vor.u32 %v1837_v37, %v1834_v35  ;;  %v5106_v53 = vld [vmem:[%s5422_s29 + $0x30] sm:$0xff]  ;;  %v5107_v37 = vld [vmem:[%s5422_s29 + $0x3c] sm:$0xff] }
  0x6d   : > { %2721 = vmatpush.bf16.msra.mxu1 %v2712_v44  ;;  %v737_v47 = vpack.c.b16 %v710_v34, %v709_v32  ;;  %4060 = vmatpush.bf16.msra.mxu0 %v4051_v45  ;;  %v1171_v49 = vrot.slane %v5477_v3, 5  ;;  %v1174_v50 = vrot.slane %v5484_v9, 5  ;;  %v1848_v51 = vor.u32 %v1847_v41, %v1843_v40  ;;  %v4760_v9 = vld [vmem:[%s5422_s29 + $0x18] sm:$0xf]  ;;  %v4764_v41 = vld [vmem:[%s5422_s29 + $0x28] sm:$0xf] }
  0x6e   : > { %v1851_v52 = vshll.u32 %v5632_v42, 16  ;;  %v1839_v57 = vrot.slane %v1838_v48, 4  ;;  %v1178_v63 = vrot.slane %v5511_v8, 5  ;;  %v1181_v0 = vrot.slane %v5515_v17, 5  ;;  %v5118_v8 = vld [vmem:[%s5422_s29 + $0xc] sm:$0xff] }
  0x6f   : > { %v1172_v54 = vsel %vm5600_vm7, %v4612_v46, %v1171_v49  ;;  %v1173_v55 = vrot.slane %v1171_v49, 4  ;;  %v1849_v3 = vrot.slane %v1848_v51, 4  ;;  %v4613_v4 = vrot.slane %v1113_v62, 9  ;;  %v1114_v51 = vld [vmem:[%s5422_s29 + $0x24] sm:$0xe] }
  0x70   : > { %4530 = vmatmul.msk.bf16.gmra.mxu3 %vm749_vm3, %v748_v2  ;;  %v1278_v56 = vunpack.c.l.b16 %v1172_v54  ;;  %v1853_v59 = vrot.slane %v1851_v52, 5  ;;  %v1844_v6 = vsel %vm5434_vm4, %v1839_v57, %v1843_v40  ;;  %v1856_v10 = vshrl.u32 %v4760_v9, 16  ;;  %v4763_v40 = vld [vmem:[%s5422_s29 + $0x24] sm:$0xf] }
  0x71   : > { %v1175_v58 = vsel %vm5600_vm7, %v1173_v55, %v1174_v50  ;;  %v1859_v11 = vshll.u32 %v4760_v9, 16  ;;  %v1180_v12 = vrot.slane %v1178_v63, 4  ;;  %v1865_v15 = vshll.u32 %v4761_v61, 16  ;;  %v5119_v50 = vld [vmem:[%s5422_s29 + $0x18] sm:$0xff]  ;;  %v4765_v9 = vld [vmem:[%s5422_s29 + $0x2c] sm:$0x1] }
  0x72   : > { %v1279_v60 = vunpack.c.l.b16 %v1175_v58  ;;  %v1854_v14 = vsel %vm5434_vm4, %v1849_v3, %v1853_v59  ;;  %v1869_v16 = vshrl.u32 %v4761_v61, 16  ;;  %v1179_v18 = vsel %vm5600_vm7, %v4613_v4, %v1178_v63 }
  0x73   : > { %v1182_v17 = vsel %vm5600_vm7, %v1180_v12, %v1181_v0  ;;  %v1280_v20 = vunpack.c.l.b16 %v1179_v18  ;;  %v2217_v22 = vunpack.c.l.b16 %v1844_v6  ;;  %v2218_v2 = vunpack.c.l.b16 %v1854_v14  ;;  %v5108_v6 = vld [vmem:[%s5422_s29 + $0x48] sm:$0xff]  ;;  %v4766_v14 = vld [vmem:[%s5422_s29 + $0x30] sm:$0xf] }
  0x74   : > { %v1309_v1 = vpack.c.b16 %v1279_v60, %v1278_v56  ;;  %v1281_v21 = vunpack.c.l.b16 %v1182_v17  ;;  %v1858_v23 = vrot.slane %v1856_v10, 4  ;;  %v1861_v25 = vrot.slane %v1859_v11, 5 }
  0x75   : > { %v1867_v26 = vrot.slane %v1865_v15, 5  ;;  %v1871_v28 = vrot.slane %v1869_v16, 4  ;;  %v2249_v31 = vpack.c.b16 %v2218_v2, %v2217_v22  ;;  %v1875_v32 = vshll.u32 %v4762_v24, 16  ;;  %v4767_v15 = vld [vmem:[%s5422_s29 + $0x34] sm:$0xf]  ;;  %v5120_v2 = vld [vmem:[%s5422_s29 + $0x24] sm:$0xff] }
  0x76   : > { %4519 = vmatmul.msk.bf16.gmra.mxu0 %vm749_vm3, %v737_v47  ;;  %v1310_v30 = vpack.c.b16 %v1281_v21, %v1280_v20  ;;  %v1862_v34 = vor.u32 %v1861_v25, %v1858_v23  ;;  %v1880_v43 = vshrl.u32 %v4763_v40, 16  ;;  %v1883_v44 = vshll.u32 %v4763_v40, 16  ;;  %v1115_v23 = vld [vmem:[%s5422_s29 + $0x30] sm:$0xe] }
  0x77   : > { %v1872_v35 = vor.u32 %v1871_v28, %v1867_v26  ;;  %v1877_v29 = vrot.slane %v1875_v32, 5  ;;  %v1889_v45 = vshll.u32 %v4764_v41, 16  ;;  %v1893_v48 = vshrl.u32 %v4764_v41, 16 }
  0x78   : > { %4599 = vmatmul.msk.bf16.gmra.mxu1 %vm749_vm3, %v5106_v53  ;;  %v1863_v38 = vrot.slane %v1862_v34, 4  ;;  %v1185_v49 = vrot.slane %v5544_v19, 5  ;;  %v4614_v52 = vrot.slane %v1114_v51, 9  ;;  %v1188_v54 = vrot.slane %v5547_v27, 5  ;;  %v4770_v51 = vld [vmem:[%s5422_s29 + $0x40] sm:$0xf] }
  0x79   : > { %v1882_v57 = vrot.slane %v1880_v43, 4  ;;  %v1885_v58 = vrot.slane %v1883_v44, 5  ;;  %v1891_v3 = vrot.slane %v1889_v45, 5  ;;  %v1895_v59 = vrot.slane %v1893_v48, 4  ;;  %v5109_v45 = vld [vmem:[%s5422_s29 + $0x54] sm:$0xff] }
  0x7a   : > { %v1868_v46 = vsel %vm5434_vm4, %v1863_v38, %v1867_v26  ;;  %v1187_v53 = vrot.slane %v1185_v49, 4  ;;  %v1186_v60 = vsel %vm5600_vm7, %v4614_v52, %v1185_v49  ;;  %v1899_v4 = vshll.u32 %v4765_v9, 16 }
  0x7b   : > { %v2219_v55 = vunpack.c.l.b16 %v1868_v46  ;;  %v1282_v61 = vunpack.c.l.b16 %v1186_v60  ;;  %v1886_v63 = vor.u32 %v1885_v58, %v1882_v57  ;;  %v1904_v18 = vshrl.u32 %v4766_v14, 16  ;;  %v5121_v58 = vld [vmem:[%s5422_s29 + $0x30] sm:$0xff] }
  0x7c   : > { %4628 = vmatmul.msk.bf16.vlgmr.msrb.gmra.mxu2 %vm749_vm3, %v1308_v7  ;;  %v1873_v7 = vrot.slane %v1872_v35, 4  ;;  %v1189_v19 = vsel %vm5600_vm7, %v1187_v53, %v1188_v54  ;;  %v1901_v12 = vrot.slane %v1899_v4, 5  ;;  %v1913_v20 = vshll.u32 %v4767_v15, 16 }
  0x7d   : > { %v1283_v27 = vunpack.c.l.b16 %v1189_v19  ;;  %v1887_v10 = vrot.slane %v1886_v63, 4  ;;  %v1917_v21 = vshrl.u32 %v4767_v15, 16  ;;  %v1192_v22 = vrot.slane %v5576_v33, 5  ;;  %v4771_v63 = vld [vmem:[%s5422_s29 + $0x44] sm:$0x1] }
  0x7e   : > { %v1878_v47 = vsel %vm5434_vm4, %v1873_v7, %v1877_v29  ;;  %v4615_v24 = vrot.slane %v1115_v23, 9  ;;  %v1195_v26 = vrot.slane %v5581_v39, 5  ;;  %v1906_v32 = vrot.slane %v1904_v18, 4 }
  0x7f   : > { %v2220_v56 = vunpack.c.l.b16 %v1878_v47  ;;  %v1311_v0 = vpack.c.b16 %v1283_v27, %v1282_v61  ;;  %v1892_v16 = vsel %vm5434_vm4, %v1887_v10, %v1891_v3  ;;  %v1194_v25 = vrot.slane %v1192_v22, 4 }
  0x80   : > { %4741 = vmatmul.msk.bf16.vlgmr.msrb.gmra.mxu3 %vm749_vm3, %v5118_v8  ;;  %v1907_v8 = vshll.u32 %v4766_v14, 16  ;;  %v2221_v28 = vunpack.c.l.b16 %v1892_v16  ;;  %v1915_v35 = vrot.slane %v1913_v20, 5  ;;  %v1193_v29 = vsel %vm5600_vm7, %v4615_v24, %v1192_v22  ;;  %v4772_v20 = vld [vmem:[%s5422_s29 + $0x48] sm:$0xf]  ;;  %v5194_v22 = vld [vmem:[%s5422_s29 + $0x40] sm:$0xf] }
  0x81   : > { %v2250_v62 = vpack.c.b16 %v2220_v56, %v2219_v55  ;;  %v1196_v33 = vsel %vm5600_vm7, %v1194_v25, %v1195_v26  ;;  %v1284_v38 = vunpack.c.l.b16 %v1193_v29  ;;  %v1937_v56 = vshll.u32 %v4770_v51, 16  ;;  %v1116_v24 = vld [vmem:[%s5422_s29 + $0x3c] sm:$0xe] }
  0x82   : > { %v1909_v34 = vrot.slane %v1907_v8, 5  ;;  %v1285_v39 = vunpack.c.l.b16 %v1196_v33  ;;  %v1941_v57 = vshrl.u32 %v4770_v51, 16  ;;  %v1952_v25 = vshrl.u32 %v4772_v20, 16 }
  0x83   : > { %v1939_v27 = vrot.slane %v1937_v56, 5  ;;  %v1955_v26 = vshll.u32 %v4772_v20, 16 }
  0x84   : > { %v1312_v40 = vpack.c.b16 %v1285_v39, %v1284_v38  ;;  %v1910_v41 = vor.u32 %v1909_v34, %v1906_v32  ;;  %v5195_v39 = vld [vmem:[%s5422_s29 + $0x44] sm:$0x1] }
  0x86   : > { %4806 = vmatmul.msk.bf16.vlgmr.msrb.gmra.mxu0 %vm749_vm3, %v2249_v31  ;;  %v1911_v47 = vrot.slane %v1910_v41, 4 }
  0x88   : > { %4600 = vmatmul.msk.bf16.gmra.mxu1 %vm749_vm3, %v5107_v37  ;;  %v1919_v37 = vrot.slane %v1917_v21, 4  ;;  %v1916_v54 = vsel %vm5434_vm4, %v1911_v47, %v1915_v35  ;;  %v4773_v21 = vld [vmem:[%s5422_s29 + $0x4c] sm:$0xf] }
  0x89   : > { %v1961_v34 = vshll.u32 %v4773_v21, 16 }
  0x8a   : > { %v1920_v43 = vor.u32 %v1919_v37, %v1915_v35  ;;  %v1965_v35 = vshrl.u32 %v4773_v21, 16  ;;  %v5122_v37 = vld [vmem:[%s5422_s29 + $0x3c] sm:$0xff] }
  0x8c   : > { %4629 = vmatmul.msk.bf16.gmra.mxu2 %vm749_vm3, %v1309_v1  ;;  %v1896_v1 = vor.u32 %v1895_v59, %v1891_v3  ;;  %v1921_v48 = vrot.slane %v1920_v43, 4  ;;  %v2223_v59 = vunpack.c.l.b16 %v1916_v54 }
  0x8e   : > { %v1897_v11 = vrot.slane %v1896_v1, 4 }
  0x90   : > { %4742 = vmatmul.msk.bf16.gmra.mxu3 %vm749_vm3, %v5119_v50  ;;  %v1902_v17 = vsel %vm5434_vm4, %v1897_v11, %v1901_v12  ;;  %v4769_v50 = vld [vmem:[%s5422_s29 + $0x3c] sm:$0xf]  ;;  %v1947_v11 = vshll.u32 %v4771_v63, 16  ;;  %v5110_v12 = vld [vmem:[%s5422_s29 + $0x60] sm:$0xff] }
  0x91   : > { %v2222_v31 = vunpack.c.l.b16 %v1902_v17  ;;  %v1928_v52 = vshrl.u32 %v4769_v50, 16  ;;  %v1931_v53 = vshll.u32 %v4769_v50, 16 }
  0x92   : > { %v1949_v17 = vrot.slane %v1947_v11, 5  ;;  %v5196_v11 = vld [vmem:[%s5422_s29 + $0x4c] sm:$0xf] }
  0x93   : > { %v2251_v7 = vpack.c.b16 %v2222_v31, %v2221_v28  ;;  %v1930_v19 = vrot.slane %v1928_v52, 4  ;;  %v1933_v9 = vrot.slane %v1931_v53, 5 }
  0x95   : > { %v1934_v4 = vor.u32 %v1933_v9, %v1930_v19 }
  0x96   : > { %4807 = vmatmul.msk.bf16.gmra.mxu0 %vm749_vm3, %v2250_v62  ;;  %v1943_v62 = vrot.slane %v1941_v57, 4 }
  0x97   : > { %v1935_v16 = vrot.slane %v1934_v4, 4  ;;  %v4775_v4 = vld [vmem:[%s5422_s29 + $0x54] sm:$0xf] }
  0x98   : > { %4601 = vmatmul.msk.bf16.gmra.mxu1 %vm749_vm3, %v5108_v6  ;;  %v1944_v10 = vor.u32 %v1943_v62, %v1939_v27 }
  0x99   : > { %v1940_v23 = vsel %vm5434_vm4, %v1935_v16, %v1939_v27  ;;  %v1117_v16 = vld [vmem:[%s5422_s29 + $0x48] sm:$0xe] }
  0x9a   : > { %v1945_v8 = vrot.slane %v1944_v10, 4  ;;  %v2225_v29 = vunpack.c.l.b16 %v1940_v23  ;;  %v4776_v10 = vld [vmem:[%s5422_s29 + $0x58] sm:$0xf] }
  0x9b   : > { %v1989_v23 = vshrl.u32 %v4776_v10, 16 }
  0x9c   : > { %4630 = vmatmul.msk.bf16.gmra.mxu2 %vm749_vm3, %v1310_v30  ;;  %v4768_v30 = vld [vmem:[%s5422_s29 + $0x38] sm:$0x1]  ;;  %v1950_v32 = vsel %vm5434_vm4, %v1945_v8, %v1949_v17  ;;  %v1976_v8 = vshrl.u32 %v4775_v4, 16  ;;  %v1979_v17 = vshll.u32 %v4775_v4, 16  ;;  %v4779_v4 = vld [vmem:[%s5422_s29 + $0x64] sm:$0xf] }
  0x9d   : > { %v1923_v44 = vshll.u32 %v4768_v30, 16  ;;  %v4616_v30 = vrot.slane %v1116_v24, 9  ;;  %v2226_v41 = vunpack.c.l.b16 %v1950_v32  ;;  %v5123_v24 = vld [vmem:[%s5422_s29 + $0x48] sm:$0xff] }
  0x9f   : > { %v1925_v49 = vrot.slane %v1923_v44, 5  ;;  %v1954_v44 = vrot.slane %v1952_v25, 4  ;;  %v2253_v52 = vpack.c.b16 %v2226_v41, %v2225_v29  ;;  %v4777_v41 = vld [vmem:[%s5422_s29 + $0x5c] sm:$0x1] }
  0xa0   : > { %4743 = vmatmul.msk.bf16.gmra.mxu3 %vm749_vm3, %v5120_v2  ;;  %v1199_v2 = vrot.slane %v5194_v22, 5 }
  0xa1   : > { %v1926_v55 = vsel %vm5434_vm4, %v1921_v48, %v1925_v49  ;;  %v1963_v48 = vrot.slane %v1961_v34, 5  ;;  %v1967_v49 = vrot.slane %v1965_v35, 4  ;;  %v5197_v34 = vld [vmem:[%s5422_s29 + $0x50] sm:$0x1] }
  0xa2   : > { %v2224_v60 = vunpack.c.l.b16 %v1926_v55  ;;  %v1201_v38 = vrot.slane %v1199_v2, 4  ;;  %v1200_v50 = vsel %vm5600_vm7, %v4616_v30, %v1199_v2  ;;  %v1985_v2 = vshll.u32 %v4776_v10, 16 }
  0xa3   : > { %v1968_v56 = vor.u32 %v1967_v49, %v1963_v48  ;;  %v1209_v35 = vrot.slane %v5197_v34, 5  ;;  %v1981_v30 = vrot.slane %v1979_v17, 5 }
  0xa4   : > { %v2252_v1 = vpack.c.b16 %v2224_v60, %v2223_v59  ;;  %v1286_v59 = vunpack.c.l.b16 %v1200_v50 }
  0xa5   : > { %v5705_v46 = vpop.f32.mrf.mxu1  ;;  %v1969_v63 = vrot.slane %v1968_v56, 4 }
  0xa6   : > { %4808 = vmatmul.msk.bf16.gmra.mxu0 %vm749_vm3, %v2251_v7  ;;  %v1202_v7 = vrot.slane %v5195_v39, 5  ;;  %v1987_v39 = vrot.slane %v1985_v2, 5  ;;  %v2013_v2 = vshrl.u32 %v4779_v4, 16 }
  0xa8   : > { %4602 = vmatmul.msk.bf16.gmra.mxu1 %vm749_vm3, %v5109_v45  ;;  %v1957_v45 = vrot.slane %v1955_v26, 5  ;;  %v1203_v51 = vsel %vm5600_vm7, %v1201_v38, %v1202_v7  ;;  %v1991_v7 = vrot.slane %v1989_v23, 4  ;;  %v5124_v23 = vld [vmem:[%s5422_s29 + $0x54] sm:$0xff] }
  0xa9   : > { %v1287_v60 = vunpack.c.l.b16 %v1203_v51 }
  0xaa   : > { %v1958_v53 = vor.u32 %v1957_v45, %v1954_v44  ;;  %v1992_v51 = vor.u32 %v1991_v7, %v1987_v39 }
  0xac   : > { %4631 = vmatmul.msk.bf16.gmra.mxu2 %vm749_vm3, %v1311_v0  ;;  %v1959_v27 = vrot.slane %v1958_v53, 4  ;;  %v5112_v53 = vld [vmem:[%s5422_s29 + $0x78] sm:$0xff] }
  0xad   : > { %v5717_v3 = vpop.f32.mrf.mxu1 }
  0xaf   : > { %v5719_v61 = vpop.f32.mrf.mxu2 }
  0xb0   : > { %4744 = vmatmul.msk.bf16.gmra.mxu3 %vm749_vm3, %v5121_v58  ;;  %v5111_v58 = vld [vmem:[%s5422_s29 + $0x6c] sm:$0xff] }
  0xb3   : > { %v811_v0 = vpop.f32.mrf.mxu0  ;;  %v5723_v6 = vpop.f32.mrf.mxu3 }
  0xb5   : > { %v1031_v14 = vpop.f32.mrf.mxu1 }
  0xb6   : > { %4809 = vmatmul.msk.bf16.gmra.mxu0 %vm749_vm3, %v2252_v1  ;;  %v5727_v15 = vadd.f32 %v1031_v14, %v811_v0  ;;  %v1313_v0 = vpack.c.b16 %v1287_v60, %v1286_v59  ;;  %v1964_v14 = vsel %vm5434_vm4, %v1959_v27, %v1963_v48 }
  0xb7   : > { %v5729_v18 = vpop.f32.mrf.mxu2  ;;  %v2227_v25 = vunpack.c.l.b16 %v1964_v14 }
  0xb8   : > { %4603 = vmatmul.msk.bf16.gmra.mxu1 %vm749_vm3, %v5110_v12  ;;  %v1206_v12 = vrot.slane %v5196_v11, 5 }
  0xba   : > { %v1208_v32 = vrot.slane %v1206_v12, 4 }
  0xbb   : > { %v813_v28 = vpop.f32.mrf.mxu0  ;;  %v5738_v31 = vpop.f32.mrf.mxu3 }
  0xbc   : > { %4632 = vmatmul.msk.bf16.gmra.mxu2 %vm749_vm3, %v1312_v40  ;;  %v4774_v40 = vld [vmem:[%s5422_s29 + $0x50] sm:$0x1]  ;;  %v1210_v45 = vsel %vm5600_vm7, %v1208_v32, %v1209_v35 }
  0xbd   : > { %v1033_v33 = vpop.f32.mrf.mxu1  ;;  %v1971_v57 = vshll.u32 %v4774_v40, 16  ;;  %v1289_v56 = vunpack.c.l.b16 %v1210_v45 }
  0xbe   : > { %v5745_v43 = vadd.f32 %v1033_v33, %v813_v28  ;;  %v4617_v28 = vrot.slane %v1117_v16, 9  ;;  %v1978_v33 = vrot.slane %v1976_v8, 4 }
  0xbf   : > { %v5747_v47 = vpop.f32.mrf.mxu2  ;;  %v1973_v1 = vrot.slane %v1971_v57, 5 }
  0xc0   : > { %4745 = vmatmul.msk.bf16.gmra.mxu3 %vm749_vm3, %v5122_v37  ;;  %v1207_v44 = vsel %vm5600_vm7, %v4617_v28, %v1206_v12  ;;  %v1982_v49 = vor.u32 %v1981_v30, %v1978_v33  ;;  %v1118_v12 = vld [vmem:[%s5422_s29 + $0x54] sm:$0xe] }
  0xc1   : > { %v1974_v22 = vsel %vm5434_vm4, %v1969_v63, %v1973_v1  ;;  %v4778_v63 = vld [vmem:[%s5422_s29 + $0x60] sm:$0xf]  ;;  %v4618_v32 = vrot.slane %v1118_v12, 9  ;;  %v4782_v12 = vld [vmem:[%s5422_s29 + $0x70] sm:$0xf] }
  0xc2   : > { %v2228_v37 = vunpack.c.l.b16 %v1974_v22  ;;  %v1983_v59 = vrot.slane %v1982_v49, 4  ;;  %v2000_v14 = vshrl.u32 %v4778_v63, 16  ;;  %v2003_v16 = vshll.u32 %v4778_v63, 16 }
  0xc3   : > { %v816_v54 = vpop.f32.mrf.mxu0  ;;  %v5755_v55 = vpop.f32.mrf.mxu3  ;;  %v2009_v22 = vshll.u32 %v4779_v4, 16 }
  0xc4   : > { %v2254_v48 = vpack.c.b16 %v2228_v37, %v2227_v25  ;;  %v1988_v11 = vsel %vm5434_vm4, %v1983_v59, %v1987_v39  ;;  %v2002_v33 = vrot.slane %v2000_v14, 4  ;;  %v2005_v30 = vrot.slane %v2003_v16, 5  ;;  %v5200_v14 = vld [vmem:[%s5422_s29 + $0x64] sm:$0xf] }
  0xc5   : > { %v1036_v19 = vpop.f32.mrf.mxu1  ;;  %v2011_v7 = vrot.slane %v2009_v22, 5  ;;  %v1220_v16 = vrot.slane %v5200_v14, 5 }
  0xc6   : > { %4810 = vmatmul.msk.bf16.gmra.mxu0 %vm749_vm3, %v2253_v52  ;;  %v5759_v9 = vadd.f32 %v1036_v19, %v816_v54  ;;  %v1995_v52 = vshll.u32 %v4777_v41, 16  ;;  %v1288_v54 = vunpack.c.l.b16 %v1207_v44  ;;  %v1993_v19 = vrot.slane %v1992_v51, 4  ;;  %v4780_v44 = vld [vmem:[%s5422_s29 + $0x68] sm:$0x1] }
  0xc7   : > { %v5761_v62 = vpop.f32.mrf.mxu2  ;;  %v2015_v41 = vrot.slane %v2013_v2, 4 }
  0xc8   : > { %4604 = vmatmul.msk.bf16.gmra.mxu1 %vm749_vm3, %v5111_v58  ;;  %v1997_v27 = vrot.slane %v1995_v52, 5  ;;  %v1314_v1 = vpack.c.b16 %v1289_v56, %v1288_v54  ;;  %v2019_v54 = vshll.u32 %v4780_v44, 16  ;;  %v5113_v56 = vld [vmem:[%s5422_s29 + $0x84] sm:$0xff] }
  0xcb   : > { %v818_v20 = vpop.f32.mrf.mxu0  ;;  %v5770_v21 = vpop.f32.mrf.mxu3 }
  0xcc   : > { %4633 = vmatmul.msk.bf16.gmra.mxu2 %vm749_vm3, %v1313_v0  ;;  %v5198_v0 = vld [vmem:[%s5422_s29 + $0x58] sm:$0xf] }
  0xcd   : > { %v1038_v26 = vpop.f32.mrf.mxu1  ;;  %v1213_v10 = vrot.slane %v5198_v0, 5  ;;  %v2021_v0 = vrot.slane %v2019_v54, 5  ;;  %v4783_v54 = vld [vmem:[%s5422_s29 + $0x74] sm:$0x1] }
  0xce   : > { %v5777_v29 = vadd.f32 %v1038_v26, %v818_v20  ;;  %v1998_v20 = vsel %vm5434_vm4, %v1993_v19, %v1997_v27  ;;  %v2229_v26 = vunpack.c.l.b16 %v1988_v11 }
  0xcf   : > { %v5779_v38 = vpop.f32.mrf.mxu2  ;;  %v1215_v34 = vrot.slane %v1213_v10, 4  ;;  %v2230_v35 = vunpack.c.l.b16 %v1998_v20  ;;  %v1214_v45 = vsel %vm5600_vm7, %v4618_v32, %v1213_v10  ;;  %v4781_v10 = vld [vmem:[%s5422_s29 + $0x6c] sm:$0xf]  ;;  %v1119_v20 = vld [vmem:[%s5422_s29 + $0x60] sm:$0xe] }
  0xd0   : > { %4746 = vmatmul.msk.bf16.gmra.mxu3 %vm749_vm3, %v5123_v24  ;;  %v5199_v24 = vld [vmem:[%s5422_s29 + $0x5c] sm:$0x1]  ;;  %v2024_v22 = vshrl.u32 %v4781_v10, 16  ;;  %v2027_v2 = vshll.u32 %v4781_v10, 16  ;;  %v5125_v32 = vld [vmem:[%s5422_s29 + $0x60] sm:$0xff]  ;;  %v2043_v10 = vshll.u32 %v4783_v54, 16 }
  0xd1   : > { %v1216_v25 = vrot.slane %v5199_v24, 5  ;;  %v2255_v49 = vpack.c.b16 %v2230_v35, %v2229_v26  ;;  %v2033_v26 = vshll.u32 %v4782_v12, 16  ;;  %v5126_v54 = vld [vmem:[%s5422_s29 + $0x6c] sm:$0xff] }
  0xd3   : > { %v821_v40 = vpop.f32.mrf.mxu0  ;;  %v5787_v50 = vpop.f32.mrf.mxu3 }
  0xd5   : > { %v1041_v57 = vpop.f32.mrf.mxu1 }
  0xd6   : > { %4811 = vmatmul.msk.bf16.gmra.mxu0 %vm749_vm3, %v2254_v48  ;;  %v5791_v58 = vadd.f32 %v1041_v57, %v821_v40  ;;  %v1217_v48 = vsel %vm5600_vm7, %v1215_v34, %v1216_v25  ;;  %v2006_v40 = vor.u32 %v2005_v30, %v2002_v33  ;;  %v1290_v57 = vunpack.c.l.b16 %v1214_v45  ;;  %v5201_v34 = vld [vmem:[%s5422_s29 + $0x68] sm:$0x1] }
  0xd7   : > { %v5793_v60 = vpop.f32.mrf.mxu2  ;;  %v1291_v59 = vunpack.c.l.b16 %v1217_v48  ;;  %v1223_v35 = vrot.slane %v5201_v34, 5  ;;  %v2026_v48 = vrot.slane %v2024_v22, 4 }
  0xd8   : > { %4605 = vmatmul.msk.bf16.gmra.mxu1 %vm749_vm3, %v5112_v53  ;;  %v2016_v53 = vor.u32 %v2015_v41, %v2011_v7  ;;  %v2007_v63 = vrot.slane %v2006_v40, 4  ;;  %v1222_v41 = vrot.slane %v1220_v16, 4 }
  0xd9   : > { %v1315_v11 = vpack.c.b16 %v1291_v59, %v1290_v57 }
  0xda   : > { %v2017_v4 = vrot.slane %v2016_v53, 4  ;;  %v1224_v57 = vsel %vm5600_vm7, %v1222_v41, %v1223_v35 }
  0xdb   : > { %v823_v8 = vpop.f32.mrf.mxu0  ;;  %v5802_v17 = vpop.f32.mrf.mxu3  ;;  %v1293_v14 = vunpack.c.l.b16 %v1224_v57 }
  0xdc   : > { %4634 = vmatmul.msk.bf16.gmra.mxu2 %vm749_vm3, %v1314_v1  ;;  %v2022_v25 = vsel %vm5434_vm4, %v2017_v4, %v2021_v0 }
  0xdd   : > { %v1043_v28 = vpop.f32.mrf.mxu1  ;;  %v2232_v44 = vunpack.c.l.b16 %v2022_v25  ;;  %v4784_v25 = vld [vmem:[%s5422_s29 + $0x78] sm:$0xf] }
  0xde   : > { %v5809_v37 = vadd.f32 %v1043_v28, %v823_v8  ;;  %v2012_v8 = vsel %vm5434_vm4, %v2007_v63, %v2011_v7  ;;  %v2037_v28 = vshrl.u32 %v4782_v12, 16  ;;  %v4619_v7 = vrot.slane %v1119_v20, 9 }
  0xdf   : > { %v5811_v39 = vpop.f32.mrf.mxu2  ;;  %v2231_v33 = vunpack.c.l.b16 %v2012_v8 }
  0xe0   : > { %4747 = vmatmul.msk.bf16.gmra.mxu3 %vm749_vm3, %v5124_v23  ;;  %v2039_v53 = vrot.slane %v2037_v28, 4  ;;  %v4785_v28 = vld [vmem:[%s5422_s29 + $0x7c] sm:$0xf] }
  0xe1   : > { %v2256_v59 = vpack.c.b16 %v2232_v44, %v2231_v33  ;;  %v1120_v33 = vld [vmem:[%s5422_s29 + $0x6c] sm:$0xe] }
  0xe3   : > { %v826_v51 = vpop.f32.mrf.mxu0  ;;  %v5819_v52 = vpop.f32.mrf.mxu3 }
  0xe5   : > { %v1046_v19 = vpop.f32.mrf.mxu1 }
  0xe6   : > { %4812 = vmatmul.msk.bf16.gmra.mxu0 %vm749_vm3, %v2255_v49  ;;  %v5823_v27 = vadd.f32 %v1046_v19, %v826_v51  ;;  %v2029_v49 = vrot.slane %v2027_v2, 5  ;;  %v2035_v51 = vrot.slane %v2033_v26, 5 }
  0xe7   : > { %v5825_v1 = vpop.f32.mrf.mxu2 }
  0xe8   : > { %4606 = vmatmul.msk.bf16.gmra.mxu1 %vm749_vm3, %v5113_v56  ;;  %v1221_v56 = vsel %vm5600_vm7, %v4619_v7, %v1220_v16  ;;  %v2030_v19 = vor.u32 %v2029_v49, %v2026_v48  ;;  %v2040_v0 = vor.u32 %v2039_v53, %v2035_v51  ;;  %v2051_v7 = vshll.u32 %v4784_v25, 16 }
  0xe9   : > { %v1292_v12 = vunpack.c.l.b16 %v1221_v56  ;;  %v2057_v49 = vshll.u32 %v4785_v28, 16  ;;  %v2061_v53 = vshrl.u32 %v4785_v28, 16  ;;  %v5203_v56 = vld [vmem:[%s5422_s29 + $0x74] sm:$0x1] }
  0xea   : > { %v2031_v20 = vrot.slane %v2030_v19, 4  ;;  %v2041_v2 = vrot.slane %v2040_v0, 4  ;;  %v1230_v57 = vrot.slane %v5203_v56, 5 }
  0xeb   : > { %v828_v23 = vpop.f32.mrf.mxu0  ;;  %v5834_v24 = vpop.f32.mrf.mxu3  ;;  %v1316_v26 = vpack.c.b16 %v1293_v14, %v1292_v12  ;;  %v2053_v12 = vrot.slane %v2051_v7, 5 }
  0xec   : > { %4635 = vmatmul.msk.bf16.gmra.mxu2 %vm749_vm3, %v1315_v11  ;;  %v5114_v11 = vld [vmem:[%s5422_s29 + $0x90] sm:$0xff]  ;;  %v2036_v35 = vsel %vm5434_vm4, %v2031_v20, %v2035_v51  ;;  %v4620_v51 = vrot.slane %v1120_v33, 9  ;;  %v2063_v20 = vrot.slane %v2061_v53, 4 }
  0xed   : > { %v1048_v30 = vpop.f32.mrf.mxu1 }
  0xee   : > { %v5841_v45 = vadd.f32 %v1048_v30, %v828_v23  ;;  %v2045_v23 = vrot.slane %v2043_v10, 5  ;;  %v2048_v30 = vshrl.u32 %v4784_v25, 16 }
  0xef   : > { %v5843_v40 = vpop.f32.mrf.mxu2 }
  0xf0   : > { %4748 = vmatmul.msk.bf16.gmra.mxu3 %vm749_vm3, %v5125_v32  ;;  %v5202_v32 = vld [vmem:[%s5422_s29 + $0x70] sm:$0xf]  ;;  %v2046_v48 = vsel %vm5434_vm4, %v2041_v2, %v2045_v23  ;;  %v4786_v23 = vld [vmem:[%s5422_s29 + $0x80] sm:$0x1] }
  0xf1   : > { %v1227_v34 = vrot.slane %v5202_v32, 5  ;;  %v2234_v0 = vunpack.c.l.b16 %v2046_v48  ;;  %v2067_v7 = vshll.u32 %v4786_v23, 16  ;;  %v5115_v48 = vld [vmem:[%s5422_s29 + $0x9c] sm:$0xff] }
  0xf3   : > { %v831_v63 = vpop.f32.mrf.mxu0  ;;  %v5851_v4 = vpop.f32.mrf.mxu3  ;;  %v1228_v25 = vsel %vm5600_vm7, %v4620_v51, %v1227_v34 }
  0xf4   : > { %6925 = vst [vmem:[#allocation5_spill] sm:$0xff] %v5851_v4 }
  0xf5   : > { %v1051_v8 = vpop.f32.mrf.mxu1 }
  0xf6   : > { %4813 = vmatmul.msk.bf16.gmra.mxu0 %vm749_vm3, %v2256_v59  ;;  %v5855_v16 = vadd.f32 %v1051_v8, %v831_v63  ;;  %v2233_v59 = vunpack.c.l.b16 %v2036_v35  ;;  %v1229_v63 = vrot.slane %v1227_v34, 4  ;;  %v2059_v8 = vrot.slane %v2057_v49, 5 }
  0xf7   : > { %v5857_v22 = vpop.f32.mrf.mxu2  ;;  %v1294_v49 = vunpack.c.l.b16 %v1228_v25 }
  0xf8   : > { %4607 = vmatmul.msk.bf16.gmra.mxu1 %vm749_vm3, %v5114_v11  ;;  %v2050_v11 = vrot.slane %v2048_v30, 4  ;;  %v2257_v28 = vpack.c.b16 %v2234_v0, %v2233_v59  ;;  %v2064_v30 = vor.u32 %v2063_v20, %v2059_v8  ;;  %v2069_v59 = vrot.slane %v2067_v7, 5  ;;  %v5204_v0 = vld [vmem:[%s5422_s29 + $0x7c] sm:$0xf] }
  0xf9   : > { %v5127_v7 = vld [vmem:[%s5422_s29 + $0x78] sm:$0xff] }
  0xfa   : > { %v2054_v32 = vor.u32 %v2053_v12, %v2050_v11  ;;  %v1234_v11 = vrot.slane %v5204_v0, 5  ;;  %v4788_v12 = vld [vmem:[%s5422_s29 + $0x88] sm:$0xf] }
  0xfb   : > { %v833_v41 = vpop.f32.mrf.mxu0  ;;  %v5866_v44 = vpop.f32.mrf.mxu3 }
  0xfc   : > { %6926 = vst [vmem:[#allocation6_spill] sm:$0xff] %v5866_v44  ;;  %4636 = vmatmul.msk.bf16.gmra.mxu2 %vm749_vm3, %v1316_v26  ;;  %v1231_v26 = vsel %vm5600_vm7, %v1229_v63, %v1230_v57  ;;  %v2055_v34 = vrot.slane %v2054_v32, 4  ;;  %v2065_v57 = vrot.slane %v2064_v30, 4  ;;  %v2081_v32 = vshll.u32 %v4788_v12, 16 }
  0xfd   : > { %v1053_v19 = vpop.f32.mrf.mxu1 }
  0xfe   : > { %v5873_v10 = vadd.f32 %v1053_v19, %v833_v41  ;;  %v4787_v19 = vld [vmem:[%s5422_s29 + $0x84] sm:$0xf]  ;;  %v2060_v20 = vsel %vm5434_vm4, %v2055_v34, %v2059_v8 }
  0xff   : > { %v1384_v14 = vpop.f32.mrf.mxu2  ;;  %v2075_v23 = vshll.u32 %v4787_v19, 16 }
 0x100   : > { %4749 = vmatmul.msk.bf16.gmra.mxu3 %vm749_vm3, %v5126_v54  ;;  %v1464_v2 = vadd.f32 %v1384_v14, %v5727_v15  ;;  %v1295_v15 = vunpack.c.l.b16 %v1231_v26  ;;  %v1121_v14 = vld [vmem:[%s5422_s29 + $0x78] sm:$0xe] }
 0x102   : > { %v1317_v63 = vpack.c.b16 %v1295_v15, %v1294_v49  ;;  %v2235_v49 = vunpack.c.l.b16 %v2060_v20 }
 0x103   : > { %v2325_v35 = vpop.f32.mrf.mxu0  ;;  %v1671_v33 = vpop.f32.mrf.mxu3 }
 0x104   : > { %v1751_v41 = vadd.f32 %v1671_v33, %v1464_v2  ;;  %v2072_v2 = vshrl.u32 %v4787_v19, 16 }
 0x105   : > { %v5883_v53 = vpop.f32.mrf.mxu1 }
 0x106   : > { %4814 = vmatmul.msk.bf16.gmra.mxu0 %vm749_vm3, %v2257_v28  ;;  %v5886_v54 = vadd.f32 %v2325_v35, %v1751_v41  ;;  %v2070_v28 = vsel %vm5434_vm4, %v2065_v57, %v2069_v59  ;;  %v5205_v35 = vld [vmem:[%s5422_s29 + $0x80] sm:$0x1]  ;;  %v4621_v41 = vrot.slane %v1121_v14, 9  ;;  %v2074_v34 = vrot.slane %v2072_v2, 4  ;;  %v4789_v14 = vld [vmem:[%s5422_s29 + $0x8c] sm:$0x1] }
 0x107   : > { %v1386_v56 = vpop.f32.mrf.mxu2  ;;  %v1237_v33 = vrot.slane %v5205_v35, 5  ;;  %v2236_v15 = vunpack.c.l.b16 %v2070_v28  ;;  %v2083_v59 = vrot.slane %v2081_v32, 5 }
 0x108   : > { %6927 = vst [vmem:[#allocation7_spill] sm:$0xff] %v5886_v54  ;;  %v1465_v51 = vadd.f32 %v1386_v56, %v5745_v43  ;;  %4608 = vmatmul.msk.bf16.gmra.mxu1 %vm749_vm3, %v5115_v48  ;;  %v2085_v43 = vshrl.u32 %v4788_v12, 16  ;;  %v1236_v48 = vrot.slane %v1234_v11, 4  ;;  %v2077_v56 = vrot.slane %v2075_v23, 5 }
 0x109   : > { %v2258_v20 = vpack.c.b16 %v2236_v15, %v2235_v49 }
 0x10a   : > { %v2087_v0 = vrot.slane %v2085_v43, 4  ;;  %v1238_v12 = vsel %vm5600_vm7, %v1236_v48, %v1237_v33  ;;  %v2078_v2 = vor.u32 %v2077_v56, %v2074_v34  ;;  %v2091_v43 = vshll.u32 %v4789_v14, 16 }
 0x10b   : > { %v2327_v25 = vpop.f32.mrf.mxu0  ;;  %v1673_v26 = vpop.f32.mrf.mxu3  ;;  %v1297_v28 = vunpack.c.l.b16 %v1238_v12 }
 0x10c   : > { %v1752_v30 = vadd.f32 %v1673_v26, %v1465_v51  ;;  %4637 = vmatmul.msk.bf16.gmra.mxu2 %vm749_vm3, %v1317_v63  ;;  %v1235_v63 = vsel %vm5600_vm7, %v4621_v41, %v1234_v11  ;;  %v2088_v32 = vor.u32 %v2087_v0, %v2083_v59  ;;  %v2503_v11 = vrot.slane %v5607_v13, 5  ;;  %v5206_v13 = vld [vmem:[%s5422_s29 + $0x88] sm:$0xf] }
 0x10d   : > { %v5901_v8 = vpop.f32.mrf.mxu1  ;;  %v1296_v26 = vunpack.c.l.b16 %v1235_v63  ;;  %v2079_v49 = vrot.slane %v2078_v2, 4  ;;  %v2093_v34 = vrot.slane %v2091_v43, 5  ;;  %v1241_v12 = vrot.slane %v5206_v13, 5  ;;  %v4822_v13 = vld [vmem:[%s5422_s29 + $0xc] sm:$0xe] }
 0x10e   : > { %v5903_v19 = vadd.f32 %v2327_v25, %v1752_v30  ;;  %v5116_v30 = vld [vmem:[%s5422_s29 + $0xa8] sm:$0xff]  ;;  %v2089_v15 = vrot.slane %v2088_v32, 4  ;;  %v2506_v2 = vrot.slane %v5632_v42, 5  ;;  %v4838_v44 = vrot.slane %v4822_v13, 9 }
 0x10f   : > { %v1389_v57 = vpop.f32.mrf.mxu2  ;;  %v1318_v48 = vpack.c.b16 %v1297_v28, %v1296_v26  ;;  %v1243_v42 = vrot.slane %v1241_v12, 4 }
 0x110   : > { %6928 = vst [vmem:[#allocation8_spill] sm:$0xff] %v5903_v19  ;;  %4750 = vmatmul.msk.bf16.gmra.mxu3 %vm749_vm3, %v5127_v7  ;;  %v1466_v51 = vadd.f32 %v1389_v57, %v5759_v9  ;;  %v4790_v9 = vld [vmem:[%s5422_s29 + $0x90] sm:$0xf]  ;;  %v4791_v57 = vld [vmem:[%s5422_s29 + $0x94] sm:$0xf]  ;;  %v2094_v32 = vsel %vm5434_vm4, %v2089_v15, %v2093_v34 }
 0x111   : > { %v2096_v0 = vshrl.u32 %v4790_v9, 16  ;;  %v2105_v63 = vshll.u32 %v4791_v57, 16  ;;  %v2109_v14 = vshrl.u32 %v4791_v57, 16  ;;  %v4792_v19 = vld [vmem:[%s5422_s29 + $0x98] sm:$0x1] }
 0x113   : > { %v2330_v23 = vpop.f32.mrf.mxu0  ;;  %v1676_v25 = vpop.f32.mrf.mxu3  ;;  %v2111_v54 = vrot.slane %v2109_v14, 4 }
 0x114   : > { %v1753_v35 = vadd.f32 %v1676_v25, %v1466_v51  ;;  %v2099_v51 = vshll.u32 %v4790_v9, 16  ;;  %v1122_v25 = vld [vmem:[%s5422_s29 + $0x84] sm:$0xe]  ;;  %v2098_v9 = vrot.slane %v2096_v0, 4 }
 0x115   : > { %v5913_v7 = vpop.f32.mrf.mxu1 }
 0x116   : > { %4815 = vmatmul.msk.bf16.gmra.mxu0 %vm749_vm3, %v2258_v20  ;;  %v5919_v33 = vadd.f32 %v2330_v23, %v1753_v35  ;;  %v5207_v20 = vld [vmem:[%s5422_s29 + $0x8c] sm:$0x1]  ;;  %v2505_v35 = vrot.slane %v2503_v11, 4  ;;  %v2101_v57 = vrot.slane %v2099_v51, 5  ;;  %v2115_v51 = vshll.u32 %v4792_v19, 16 }
 0x117   : > { %v1391_v41 = vpop.f32.mrf.mxu2  ;;  %v1244_v23 = vrot.slane %v5207_v20, 5 }
 0x118   : > { %6929 = vst [vmem:[#allocation9_spill] sm:$0xff] %v5919_v33  ;;  %v1467_v56 = vadd.f32 %v1391_v41, %v5777_v29  ;;  %4609 = vmatmul.msk.bf16.gmra.mxu1 %vm749_vm3, %v5116_v30  ;;  %v2084_v29 = vsel %vm5434_vm4, %v2079_v49, %v2083_v59  ;;  %v5128_v30 = vld [vmem:[%s5422_s29 + $0x84] sm:$0xff]  ;;  %v2107_v41 = vrot.slane %v2105_v63, 5  ;;  %v4622_v33 = vrot.slane %v1122_v25, 9 }
 0x119   : > { %v2237_v4 = vunpack.c.l.b16 %v2084_v29  ;;  %v2238_v59 = vunpack.c.l.b16 %v2094_v32  ;;  %v2507_v34 = vsel %vm5600_vm7, %v2505_v35, %v2506_v2  ;;  %v2102_v0 = vor.u32 %v2101_v57, %v2098_v9  ;;  %v4794_v9 = vld [vmem:[%s5422_s29 + $0xa0] sm:$0xf] }
 0x11a   : > { %v1242_v14 = vsel %vm5600_vm7, %v4622_v33, %v1241_v12  ;;  %v1245_v25 = vsel %vm5600_vm7, %v1243_v42, %v1244_v23  ;;  %v2117_v23 = vrot.slane %v2115_v51, 5  ;;  %v2129_v51 = vshll.u32 %v4794_v9, 16 }
 0x11b   : > { %v2332_v26 = vpop.f32.mrf.mxu0  ;;  %v1678_v28 = vpop.f32.mrf.mxu3  ;;  %v1298_v32 = vunpack.c.l.b16 %v1242_v14  ;;  %v1299_v19 = vunpack.c.l.b16 %v1245_v25  ;;  %v2103_v33 = vrot.slane %v2102_v0, 4 }
 0x11c   : > { %v1754_v43 = vadd.f32 %v1678_v28, %v1467_v56  ;;  %4638 = vmatmul.msk.bf16.gmra.mxu2 %vm749_vm3, %v1318_v48  ;;  %v2504_v48 = vsel %vm5600_vm7, %v4838_v44, %v2503_v11  ;;  %v2616_v28 = vunpack.c.l.b16 %v2507_v34  ;;  %v2259_v44 = vpack.c.b16 %v2238_v59, %v2237_v4  ;;  %v1123_v34 = vld [vmem:[%s5422_s29 + $0x90] sm:$0xe] }
 0x11d   : > { %v5934_v20 = vpop.f32.mrf.mxu1  ;;  %v2615_v63 = vunpack.c.l.b16 %v2504_v48  ;;  %v1319_v13 = vpack.c.b16 %v1299_v19, %v1298_v32  ;;  %v2108_v42 = vsel %vm5434_vm4, %v2103_v33, %v2107_v41  ;;  %v2131_v33 = vrot.slane %v2129_v51, 5 }
 0x11e   : > { %v5937_v49 = vadd.f32 %v2332_v26, %v1754_v43  ;;  %v2112_v26 = vor.u32 %v2111_v54, %v2107_v41  ;;  %v2239_v41 = vunpack.c.l.b16 %v2108_v42 }
 0x11f   : > { %v1394_v15 = vpop.f32.mrf.mxu2  ;;  %v5949_v2 = vpack.c.b16 %v2616_v28, %v2615_v63  ;;  %v2133_v63 = vshrl.u32 %v4794_v9, 16 }
 0x120   : > { %4751 = vmatmul.msk.bf16.gmra.mxu3 %vm749_vm3, %v5128_v30  ;;  %v1468_v56 = vadd.f32 %v1394_v15, %v5791_v58  ;;  %v5117_v58 = vld [vmem:[%s5422_s29 + $0xb4] sm:$0xff]  ;;  %v2113_v12 = vrot.slane %v2112_v26, 4  ;;  %v4793_v30 = vld [vmem:[%s5422_s29 + $0x9c] sm:$0xf] }
 0x121   : > { %v5208_v15 = vld [vmem:[%s5422_s29 + $0x94] sm:$0xf]  ;;  %v2123_v0 = vshll.u32 %v4793_v30, 16 }
 0x122   : > { %v2118_v59 = vsel %vm5434_vm4, %v2113_v12, %v2117_v23  ;;  %v1248_v48 = vrot.slane %v5208_v15, 5  ;;  %v2135_v12 = vrot.slane %v2133_v63, 4 }
 0x123   : > { %v2335_v11 = vpop.f32.mrf.mxu0  ;;  %v1681_v35 = vpop.f32.mrf.mxu3  ;;  %v2125_v19 = vrot.slane %v2123_v0, 5 }
 0x124   : > { %v1755_v29 = vadd.f32 %v1681_v35, %v1468_v56  ;;  %v2120_v56 = vshrl.u32 %v4793_v30, 16 }
 0x125   : > { %v5952_v43 = vpop.f32.mrf.mxu1 }
 0x126   : > { %4816 = vmatmul.msk.bf16.gmra.mxu0 %vm749_vm3, %v2259_v44  ;;  %v5955_v54 = vadd.f32 %v2335_v11, %v1755_v29  ;;  %v5129_v44 = vld [vmem:[%s5422_s29 + $0x90] sm:$0xff]  ;;  %v2240_v11 = vunpack.c.l.b16 %v2118_v59  ;;  %v4623_v29 = vrot.slane %v1123_v34, 9  ;;  %v2122_v32 = vrot.slane %v2120_v56, 4 }
 0x127   : > { %v1396_v4 = vpop.f32.mrf.mxu2  ;;  %v2136_v59 = vor.u32 %v2135_v12, %v2131_v33  ;;  %v5211_v12 = vld [vmem:[%s5422_s29 + $0x20] sm:$0x1] }
 0x128   : > { %v1469_v57 = vadd.f32 %v1396_v4, %v5809_v37  ;;  %4610 = vmatmul.msk.bf16.gmra.mxu1 %vm749_vm3, %v5117_v58  ;;  %v5209_v37 = vld [vmem:[%s5422_s29 + $0x98] sm:$0x1]  ;;  %v1250_v58 = vrot.slane %v1248_v48, 4  ;;  %v4795_v4 = vld [vmem:[%s5422_s29 + $0xa4] sm:$0x1]  ;;  %v2260_v9 = vpack.c.b16 %v2240_v11, %v2239_v41  ;;  %v2126_v42 = vor.u32 %v2125_v19, %v2122_v32 }
 0x129   : > { %v1251_v26 = vrot.slane %v5209_v37, 5  ;;  %v2139_v15 = vshll.u32 %v4795_v4, 16  ;;  %v4796_v32 = vld [vmem:[%s5422_s29 + $0xa8] sm:$0xf]  ;;  %v4797_v19 = vld [vmem:[%s5422_s29 + $0xac] sm:$0xf] }
 0x12a   : > { %v5212_v4 = vld [vmem:[%s5422_s29 + $0xa0] sm:$0xf] }
 0x12b   : > { %v2337_v14 = vpop.f32.mrf.mxu0  ;;  %v1683_v25 = vpop.f32.mrf.mxu3  ;;  %v2141_v41 = vrot.slane %v2139_v15, 5 }
 0x12c   : > { %v1756_v28 = vadd.f32 %v1683_v25, %v1469_v57  ;;  %4639 = vmatmul.msk.bf16.gmra.mxu2 %vm749_vm3, %v1319_v13  ;;  %v1249_v57 = vsel %vm5600_vm7, %v4623_v29, %v1248_v48  ;;  %v1252_v13 = vsel %vm5600_vm7, %v1250_v58, %v1251_v26  ;;  %v5210_v48 = vld [vmem:[%s5422_s29 + $0x1c] sm:$0xf]  ;;  %v2127_v26 = vrot.slane %v2126_v42, 4 }
 0x12d   : > { %v5970_v35 = vpop.f32.mrf.mxu1  ;;  %v1300_v63 = vunpack.c.l.b16 %v1249_v57  ;;  %v2510_v37 = vrot.slane %v5210_v48, 5  ;;  %v1124_v42 = vld [vmem:[%s5422_s29 + $0x9c] sm:$0xe] }
 0x12e   : > { %v5979_v34 = vadd.f32 %v2337_v14, %v1756_v28  ;;  %v4823_v14 = vld [vmem:[%s5422_s29 + $0x18] sm:$0xe] }
 0x12f   : > { %v1399_v23 = vpop.f32.mrf.mxu2  ;;  %v2512_v57 = vrot.slane %v2510_v37, 4 }
 0x130   : > { %4752 = vmatmul.msk.bf16.gmra.mxu3 %vm749_vm3, %v5129_v44  ;;  %v1470_v30 = vadd.f32 %v1399_v23, %v5823_v27  ;;  %6930 = vst [vmem:[#allocation10_spill] sm:$0xff] %v5979_v34  ;;  %v1301_v27 = vunpack.c.l.b16 %v1252_v13  ;;  %v2137_v44 = vrot.slane %v2136_v59, 4  ;;  %v2513_v23 = vrot.slane %v5211_v12, 5  ;;  %v4798_v34 = vld [vmem:[%s5422_s29 + $0xb0] sm:$0x1] }
 0x131   : > { %v2132_v13 = vsel %vm5434_vm4, %v2127_v26, %v2131_v33  ;;  %v4624_v33 = vrot.slane %v1124_v42, 9 }
 0x132   : > { %v1320_v58 = vpack.c.b16 %v1301_v27, %v1300_v63  ;;  %v5213_v63 = vld [vmem:[%s5422_s29 + $0xa4] sm:$0x1] }
 0x133   : > { %v2340_v56 = vpop.f32.mrf.mxu0  ;;  %v1686_v0 = vpop.f32.mrf.mxu3  ;;  %v1258_v27 = vrot.slane %v5213_v63, 5 }
 0x134   : > { %v1757_v51 = vadd.f32 %v1686_v0, %v1470_v30  ;;  %v1255_v30 = vrot.slane %v5212_v4, 5  ;;  %v2153_v0 = vshll.u32 %v4797_v19, 16 }
 0x135   : > { %v5981_v25 = vpop.f32.mrf.mxu1 }
 0x136   : > { %4817 = vmatmul.msk.bf16.gmra.mxu0 %vm749_vm3, %v2260_v9  ;;  %v5986_v28 = vadd.f32 %v2340_v56, %v1757_v51  ;;  %v4839_v9 = vrot.slane %v4823_v14, 9  ;;  %v2147_v56 = vshll.u32 %v4796_v32, 16  ;;  %v2157_v51 = vshrl.u32 %v4797_v19, 16  ;;  %v5130_v14 = vld [vmem:[%s5422_s29 + $0x9c] sm:$0xff] }
 0x137   : > { %v1401_v11 = vpop.f32.mrf.mxu2  ;;  %v1257_v26 = vrot.slane %v1255_v30, 4 }
 0x138   : > { %6931 = vst [vmem:[#allocation11_spill] sm:$0xff] %v5986_v28  ;;  %v1471_v29 = vadd.f32 %v1401_v11, %v5841_v45  ;;  %4855 = vmatmul.msk.bf16.vlgmr.msra.gmra.mxu1 %vm749_vm3, %v5949_v2  ;;  %v2142_v45 = vsel %vm5434_vm4, %v2137_v44, %v2141_v41  ;;  %v2144_v2 = vshrl.u32 %v4796_v32, 16  ;;  %v2511_v44 = vsel %vm5600_vm7, %v4839_v9, %v2510_v37 }
 0x139   : > { %v2514_v41 = vsel %vm5600_vm7, %v2512_v57, %v2513_v23  ;;  %v2241_v32 = vunpack.c.l.b16 %v2132_v13  ;;  %v2242_v12 = vunpack.c.l.b16 %v2142_v45  ;;  %v2149_v63 = vrot.slane %v2147_v56, 5 }
 0x13a   : > { %v2146_v4 = vrot.slane %v2144_v2, 4  ;;  %v2617_v28 = vunpack.c.l.b16 %v2511_v44  ;;  %v2618_v42 = vunpack.c.l.b16 %v2514_v41  ;;  %v1256_v37 = vsel %vm5600_vm7, %v4624_v33, %v1255_v30  ;;  %v5214_v33 = vld [vmem:[%s5422_s29 + $0x28] sm:$0xf] }
 0x13b   : > { %v2342_v59 = vpop.f32.mrf.mxu0  ;;  %v1688_v15 = vpop.f32.mrf.mxu3  ;;  %v1259_v23 = vsel %vm5600_vm7, %v1257_v26, %v1258_v27  ;;  %v2261_v9 = vpack.c.b16 %v2242_v12, %v2241_v32  ;;  %v2517_v27 = vrot.slane %v5214_v33, 5  ;;  %v4799_v12 = vld [vmem:[%s5422_s29 + $0xb4] sm:$0xf]  ;;  %v1057_v33 = vadd.f32 %v5883_v53, %v5705_v46 }
 0x13c   : > { %v1758_v48 = vadd.f32 %v1688_v15, %v1471_v29  ;;  %4640 = vmatmul.msk.bf16.gmra.mxu2 %vm749_vm3, %v1320_v58  ;;  %v2155_v29 = vrot.slane %v2153_v0, 5  ;;  %v2159_v15 = vrot.slane %v2157_v51, 4  ;;  %v2150_v2 = vor.u32 %v2149_v63, %v2146_v4  ;;  %v4800_v4 = vld [vmem:[%s5422_s29 + $0xb8] sm:$0xf]  ;;  %v5215_v63 = vld [vmem:[%s5422_s29 + $0x2c] sm:$0x1] }
 0x13d   : > { %v6003_v11 = vpop.f32.mrf.mxu1  ;;  %v1302_v51 = vunpack.c.l.b16 %v1256_v37  ;;  %v2648_v44 = vpack.c.b16 %v2618_v42, %v2617_v28 }
 0x13e   : > { %v6016_v57 = vadd.f32 %v2342_v59, %v1758_v48  ;;  %v2160_v56 = vor.u32 %v2159_v15, %v2155_v29  ;;  %v4824_v48 = vld [vmem:[%s5422_s29 + $0x24] sm:$0xe]  ;;  %v2151_v41 = vrot.slane %v2150_v2, 4  ;;  %v2520_v15 = vrot.slane %v5215_v63, 5 }
 0x13f   : > { %v1404_v19 = vpop.f32.mrf.mxu2  ;;  %v4840_v37 = vrot.slane %v4824_v48, 9 }
 0x140   : > { %4753 = vmatmul.msk.bf16.gmra.mxu3 %vm749_vm3, %v5130_v14  ;;  %v1472_v58 = vadd.f32 %v1404_v19, %v5855_v16  ;;  %v2163_v16 = vshll.u32 %v4798_v34, 16  ;;  %v1303_v14 = vunpack.c.l.b16 %v1259_v23  ;;  %v2161_v34 = vrot.slane %v2160_v56, 4 }
 0x141   : > { %v2519_v23 = vrot.slane %v2517_v27, 4 }
 0x142   : > { %v2165_v32 = vrot.slane %v2163_v16, 5  ;;  %v1321_v28 = vpack.c.b16 %v1303_v14, %v1302_v51  ;;  %v2181_v51 = vshrl.u32 %v4800_v4, 16  ;;  %v5217_v14 = vld [vmem:[%s5422_s29 + $0xb0] sm:$0x1] }
 0x143   : > { %v2345_v13 = vpop.f32.mrf.mxu0  ;;  %v1691_v45 = vpop.f32.mrf.mxu3 }
 0x144   : > { %v1759_v0 = vadd.f32 %v1691_v45, %v1472_v58  ;;  %v5216_v58 = vld [vmem:[%s5422_s29 + $0xac] sm:$0xf]  ;;  %v2171_v45 = vshll.u32 %v4799_v12, 16  ;;  %v2166_v16 = vsel %vm5434_vm4, %v2161_v34, %v2165_v32 }
 0x145   : > { %v6018_v30 = vpop.f32.mrf.mxu1  ;;  %v1262_v42 = vrot.slane %v5216_v58, 5  ;;  %v2244_v32 = vunpack.c.l.b16 %v2166_v16 }
 0x146   : > { %4818 = vmatmul.msk.bf16.gmra.mxu0 %vm749_vm3, %v2261_v9  ;;  %v6022_v59 = vadd.f32 %v2345_v13, %v1759_v0  ;;  %v1125_v9 = vld [vmem:[%s5422_s29 + $0xa8] sm:$0xe]  ;;  %v2168_v13 = vshrl.u32 %v4799_v12, 16  ;;  %v2177_v0 = vshll.u32 %v4800_v4, 16 }
 0x147   : > { %v1406_v26 = vpop.f32.mrf.mxu2  ;;  %v4625_v63 = vrot.slane %v1125_v9, 9  ;;  %v1264_v58 = vrot.slane %v1262_v42, 4  ;;  %v4801_v9 = vld [vmem:[%s5422_s29 + $0xbc] sm:$0x1] }
 0x148   : > { %6932 = vst [vmem:[#allocation12_spill] sm:$0xff] %v6022_v59  ;;  %v1473_v19 = vadd.f32 %v1406_v26, %v5873_v10  ;;  %4856 = vmatmul.msk.bf16.gmra.mxu1 %vm749_vm3, %v2648_v44  ;;  %v2156_v10 = vsel %vm5434_vm4, %v2151_v41, %v2155_v29  ;;  %v1265_v44 = vrot.slane %v5217_v14, 5  ;;  %v5131_v26 = vld [vmem:[%s5422_s29 + $0xa8] sm:$0xff]  ;;  %v2518_v29 = vsel %vm5600_vm7, %v4840_v37, %v2517_v27 }
 0x149   : > { %v2521_v41 = vsel %vm5600_vm7, %v2519_v23, %v2520_v15  ;;  %v2243_v34 = vunpack.c.l.b16 %v2156_v10  ;;  %v2170_v4 = vrot.slane %v2168_v13, 4  ;;  %v2173_v14 = vrot.slane %v2171_v45, 5 }
 0x14a   : > { %v2179_v53 = vrot.slane %v2177_v0, 5  ;;  %v2620_v59 = vunpack.c.l.b16 %v2521_v41  ;;  %v1263_v27 = vsel %vm5600_vm7, %v4625_v63, %v1262_v42  ;;  %v1266_v15 = vsel %vm5600_vm7, %v1264_v58, %v1265_v44  ;;  %v5218_v42 = vld [vmem:[%s5422_s29 + $0x34] sm:$0xf]  ;;  %v4825_v63 = vld [vmem:[%s5422_s29 + $0x30] sm:$0xe] }
 0x14b   : > { %v2347_v2 = vpop.f32.mrf.mxu0  ;;  %v1693_v56 = vpop.f32.mrf.mxu3  ;;  %v2262_v37 = vpack.c.b16 %v2244_v32, %v2243_v34  ;;  %v2174_v23 = vor.u32 %v2173_v14, %v2170_v4  ;;  %v2187_v0 = vshll.u32 %v4801_v9, 16  ;;  %v2524_v44 = vrot.slane %v5218_v42, 5  ;;  %v4802_v4 = vld [vmem:[%s5422_s29 + $0xc0] sm:$0xf] }
 0x14c   : > { %v1760_v48 = vadd.f32 %v1693_v56, %v1473_v19  ;;  %4641 = vmatmul.msk.bf16.gmra.mxu2 %vm749_vm3, %v1321_v28  ;;  %v2183_v19 = vrot.slane %v2181_v51, 4  ;;  %v2619_v56 = vunpack.c.l.b16 %v2518_v29 }
 0x14d   : > { %v6041_v12 = vpop.f32.mrf.mxu1 }
 0x14e   : > { %v6053_v13 = vadd.f32 %v2347_v2, %v1760_v48  ;;  %v2184_v16 = vor.u32 %v2183_v19, %v2179_v53  ;;  %v2649_v29 = vpack.c.b16 %v2620_v59, %v2619_v56  ;;  %v1059_v2 = vadd.f32 %v5901_v8, %v5717_v3  ;;  %v1126_v19 = vld [vmem:[%s5422_s29 + $0xb4] sm:$0xe]  ;;  %v4803_v3 = vld [vmem:[%s5422_s29 + $0xc4] sm:$0xf]  ;;  %v5220_v8 = vld [vmem:[%s5422_s29 + $0x38] sm:$0x1] }
 0x14f   : > { %v1409_v46 = vpop.f32.mrf.mxu2  ;;  %v2175_v48 = vrot.slane %v2174_v23, 4  ;;  %v2189_v59 = vrot.slane %v2187_v0, 5  ;;  %v2527_v9 = vrot.slane %v5220_v8, 5  ;;  %v2192_v23 = vshrl.u32 %v4802_v4, 16 }
 0x150   : > { %4754 = vmatmul.msk.bf16.gmra.mxu3 %vm749_vm3, %v5131_v26  ;;  %v1474_v28 = vadd.f32 %v1409_v46, %v1057_v33  ;;  %v1304_v33 = vunpack.c.l.b16 %v1263_v27  ;;  %v1305_v26 = vunpack.c.l.b16 %v1266_v15  ;;  %v2185_v32 = vrot.slane %v2184_v16, 4 }
 0x151   : > { %v4841_v27 = vrot.slane %v4825_v63, 9  ;;  %v2526_v15 = vrot.slane %v2524_v44, 4  ;;  %v5132_v63 = vld [vmem:[%s5422_s29 + $0xb4] sm:$0xff] }
 0x152   : > { %v1322_v46 = vpack.c.b16 %v1305_v26, %v1304_v33  ;;  %v2190_v0 = vsel %vm5434_vm4, %v2185_v32, %v2189_v59  ;;  %v2201_v33 = vshll.u32 %v4803_v3, 16  ;;  %v2205_v26 = vshrl.u32 %v4803_v3, 16 }
 0x153   : > { %v2350_v45 = vpop.f32.mrf.mxu0  ;;  %v1696_v10 = vpop.f32.mrf.mxu3  ;;  %v2525_v32 = vsel %vm5600_vm7, %v4841_v27, %v2524_v44  ;;  %v2528_v59 = vsel %vm5600_vm7, %v2526_v15, %v2527_v9  ;;  %v4804_v15 = vld [vmem:[%s5422_s29 + $0xc8] sm:$0x1] }
 0x154   : > { %v1761_v51 = vadd.f32 %v1696_v10, %v1474_v28  ;;  %v5219_v28 = vld [vmem:[%s5422_s29 + $0xb8] sm:$0xf]  ;;  %v2207_v8 = vrot.slane %v2205_v26, 4  ;;  %v2621_v27 = vunpack.c.l.b16 %v2525_v32  ;;  %v2622_v9 = vunpack.c.l.b16 %v2528_v59  ;;  %v5222_v32 = vld [vmem:[%s5422_s29 + $0x40] sm:$0xf] }
 0x155   : > { %v6055_v41 = vpop.f32.mrf.mxu1  ;;  %v1269_v56 = vrot.slane %v5219_v28, 5  ;;  %v2211_v26 = vshll.u32 %v4804_v15, 16  ;;  %v2531_v59 = vrot.slane %v5222_v32, 5 }
 0x156   : > { %4819 = vmatmul.msk.bf16.gmra.mxu0 %vm749_vm3, %v2262_v37  ;;  %v6062_v58 = vadd.f32 %v2350_v45, %v1761_v51  ;;  %v2180_v37 = vsel %vm5434_vm4, %v2175_v48, %v2179_v53  ;;  %v2195_v45 = vshll.u32 %v4802_v4, 16  ;;  %v4626_v51 = vrot.slane %v1126_v19, 9 }
 0x157   : > { %v1411_v34 = vpop.f32.mrf.mxu2  ;;  %v1062_v53 = vadd.f32 %v5913_v7, %v5719_v61  ;;  %v2245_v48 = vunpack.c.l.b16 %v2180_v37  ;;  %v2246_v19 = vunpack.c.l.b16 %v2190_v0  ;;  %v2203_v7 = vrot.slane %v2201_v33, 5 }
 0x158   : > { %v1475_v14 = vadd.f32 %v1411_v34, %v1059_v2  ;;  %4857 = vmatmul.msk.bf16.gmra.mxu1 %vm749_vm3, %v2649_v29  ;;  %v5221_v29 = vld [vmem:[%s5422_s29 + $0xbc] sm:$0x1]  ;;  %v1271_v34 = vrot.slane %v1269_v56, 4  ;;  %v1270_v61 = vsel %vm5600_vm7, %v4626_v51, %v1269_v56 }
 0x159   : > { %v1272_v42 = vrot.slane %v5221_v29, 5  ;;  %v1306_v56 = vunpack.c.l.b16 %v1270_v61  ;;  %v2208_v33 = vor.u32 %v2207_v8, %v2203_v7  ;;  %v5223_v61 = vld [vmem:[%s5422_s29 + $0x44] sm:$0x1] }
 0x15a   : > { %v2534_v8 = vrot.slane %v5223_v61, 5 }
 0x15b   : > { %v2352_v10 = vpop.f32.mrf.mxu0  ;;  %v1698_v16 = vpop.f32.mrf.mxu3  ;;  %v1273_v44 = vsel %vm5600_vm7, %v1271_v34, %v1272_v42 }
 0x15c   : > { %v1762_v2 = vadd.f32 %v1698_v16, %v1475_v14  ;;  %4642 = vmatmul.msk.bf16.gmra.mxu2 %vm749_vm3, %v1322_v46  ;;  %v2194_v14 = vrot.slane %v2192_v23, 4  ;;  %v2197_v46 = vrot.slane %v2195_v45, 5  ;;  %v4984_v23 = vld [vmem:[%s5422_s29 + $0x18] sm:$0xf]  ;;  %v2263_v45 = vpack.c.b16 %v2246_v19, %v2245_v48  ;;  %v6095_v16 = vld [vmem:[%s5422_s29 + $0x1c] sm:$0xf] }
 0x15d   : > { %v6079_v4 = vpop.f32.mrf.mxu1  ;;  %v1307_v51 = vunpack.c.l.b16 %v1273_v44  ;;  %v3171_v42 = vshrl.u32 %v4984_v23, 16  ;;  %v3174_v34 = vshll.u32 %v4984_v23, 16  ;;  %v3180_v48 = vshll.u32 %v6095_v16, 16 }
 0x15e   : > { %v6085_v28 = vadd.f32 %v2352_v10, %v1762_v2  ;;  %v2198_v10 = vor.u32 %v2197_v46, %v2194_v14  ;;  %v3184_v19 = vshrl.u32 %v6095_v16, 16  ;;  %v1064_v14 = vadd.f32 %v5934_v20, %v5729_v18  ;;  %v4826_v46 = vld [vmem:[%s5422_s29 + $0x3c] sm:$0xe] }
 0x15f   : > { %v1414_v3 = vpop.f32.mrf.mxu2  ;;  %v1323_v23 = vpack.c.b16 %v1307_v51, %v1306_v56  ;;  %v3176_v32 = vrot.slane %v3174_v34, 5  ;;  %v4842_v18 = vrot.slane %v4826_v46, 9  ;;  %v2533_v20 = vrot.slane %v2531_v59, 4  ;;  %v5133_v56 = vld [vmem:[%s5422_s29 + $0xc0] sm:$0xff] }
 0x160   : > { %6933 = vst [vmem:[#allocation13_spill] sm:$0xff] %v6085_v28  ;;  %4755 = vmatmul.msk.bf16.gmra.mxu3 %vm749_vm3, %v5132_v63  ;;  %v1476_v37 = vadd.f32 %v1414_v3, %v1062_v53  ;;  %v2650_v63 = vpack.c.b16 %v2622_v9, %v2621_v27  ;;  %v2199_v44 = vrot.slane %v2198_v10, 4  ;;  %v2209_v27 = vrot.slane %v2208_v33, 4 }
 0x161   : > { %v2213_v9 = vrot.slane %v2211_v26, 5  ;;  %v3186_v28 = vrot.slane %v3184_v19, 4  ;;  %v2535_v34 = vsel %vm5600_vm7, %v2533_v20, %v2534_v8  ;;  %v1067_v19 = vadd.f32 %v5952_v43, %v5747_v47  ;;  %v4987_v8 = vld [vmem:[%s5422_s29 + $0x24] sm:$0xf] }
 0x162   : > { %v2204_v10 = vsel %vm5434_vm4, %v2199_v44, %v2203_v7  ;;  %v2624_v44 = vunpack.c.l.b16 %v2535_v34  ;;  %v3198_v20 = vshll.u32 %v4987_v8, 16 }
 0x163   : > { %v2355_v0 = vpop.f32.mrf.mxu0  ;;  %v1701_v29 = vpop.f32.mrf.mxu3  ;;  %v2214_v33 = vsel %vm5434_vm4, %v2209_v27, %v2213_v9 }
 0x164   : > { %v1763_v2 = vadd.f32 %v1701_v29, %v1476_v37  ;;  %v3173_v29 = vrot.slane %v3171_v42, 4  ;;  %v2532_v42 = vsel %vm5600_vm7, %v4842_v18, %v2531_v59  ;;  %v2248_v46 = vunpack.c.l.b16 %v2214_v33 }
 0x165   : > { %v6097_v53 = vpop.f32.mrf.mxu1  ;;  %v2623_v59 = vunpack.c.l.b16 %v2532_v42  ;;  %v3195_v18 = vshrl.u32 %v4987_v8, 16 }
 0x166   : > { %4820 = vmatmul.msk.bf16.gmra.mxu0 %vm749_vm3, %v2263_v45  ;;  %v6106_v3 = vadd.f32 %v2355_v0, %v1763_v2  ;;  %v3182_v45 = vrot.slane %v3180_v48, 5  ;;  %v6111_v0 = vld [vmem:[%s5422_s29 + $0x20] sm:$0x1]  ;;  %v3177_v51 = vor.u32 %v3176_v32, %v3173_v29  ;;  %v5049_v29 = vld [vmem:[%s5422_s29 + $0x18] sm:$0xe]  ;;  %v3842_v32 = vrot.slane %v6095_v16, 5 }
 0x167   : > { %v1416_v37 = vpop.f32.mrf.mxu2  ;;  %v3190_v7 = vshll.u32 %v6111_v0, 16 }
 0x168   : > { %6934 = vst [vmem:[#allocation14_spill] sm:$0xff] %v6106_v3  ;;  %v1477_v15 = vadd.f32 %v1416_v37, %v1064_v14  ;;  %4858 = vmatmul.msk.bf16.gmra.mxu1 %vm749_vm3, %v2650_v63  ;;  %v3187_v48 = vor.u32 %v3186_v28, %v3182_v45  ;;  %v2247_v14 = vunpack.c.l.b16 %v2204_v10  ;;  %v3178_v27 = vrot.slane %v3177_v51, 4  ;;  %v5224_v51 = vld [vmem:[%s5422_s29 + $0x4c] sm:$0xf] }
 0x169   : > { %v3192_v9 = vrot.slane %v3190_v7, 5  ;;  %v2651_v10 = vpack.c.b16 %v2624_v44, %v2623_v59  ;;  %v2538_v42 = vrot.slane %v5224_v51, 5  ;;  %v5065_v7 = vrot.slane %v5049_v29, 9  ;;  %v5225_v44 = vld [vmem:[%s5422_s29 + $0x50] sm:$0x1] }
 0x16a   : > { %v3188_v28 = vrot.slane %v3187_v48, 4  ;;  %v3183_v33 = vsel %vm5434_vm4, %v3178_v27, %v3182_v45  ;;  %v1069_v48 = vadd.f32 %v5970_v35, %v5761_v62  ;;  %v4827_v45 = vld [vmem:[%s5422_s29 + $0x48] sm:$0xe]  ;;  %v3200_v59 = vrot.slane %v3198_v20, 5  ;;  %v6157_v29 = vld [vmem:[%s5422_s29 + $0x2c] sm:$0x1] }
 0x16b   : > { %v2357_v2 = vpop.f32.mrf.mxu0  ;;  %v1703_v3 = vpop.f32.mrf.mxu3  ;;  %v2541_v27 = vrot.slane %v5225_v44, 5  ;;  %v3556_v62 = vunpack.c.l.b16 %v3183_v33 }
 0x16c   : > { %v1764_v26 = vadd.f32 %v1703_v3, %v1477_v15  ;;  %4643 = vmatmul.msk.bf16.gmra.mxu2 %vm749_vm3, %v1323_v23  ;;  %v2264_v15 = vpack.c.b16 %v2248_v46, %v2247_v14  ;;  %v6133_v23 = vld [vmem:[%s5422_s29 + $0x28] sm:$0xf]  ;;  %v3844_v46 = vrot.slane %v3842_v32, 4 }
 0x16d   : > { %v6119_v63 = vpop.f32.mrf.mxu1  ;;  %v3204_v34 = vshll.u32 %v6133_v23, 16  ;;  %v3208_v16 = vshrl.u32 %v6133_v23, 16 }
 0x16e   : > { %v6128_v3 = vadd.f32 %v2357_v2, %v1764_v26 }
 0x16f   : > { %v1419_v61 = vpop.f32.mrf.mxu2 }
 0x170   : > { %4756 = vmatmul.msk.bf16.gmra.mxu3 %vm749_vm3, %v5133_v56  ;;  %v1478_v37 = vadd.f32 %v1419_v61, %v1067_v19  ;;  %v3193_v56 = vsel %vm5434_vm4, %v3188_v28, %v3192_v9  ;;  %v3845_v61 = vrot.slane %v6111_v0, 5  ;;  %v5134_v28 = vld [vmem:[%s5422_s29 + $0x18] sm:$0xff]  ;;  %v4843_v9 = vrot.slane %v4827_v45, 9 }
 0x171   : > { %v3557_v35 = vunpack.c.l.b16 %v3193_v56  ;;  %v3843_v0 = vsel %vm5600_vm7, %v5065_v7, %v3842_v32  ;;  %v3214_v32 = vshll.u32 %v6157_v29, 16  ;;  %v1072_v7 = vadd.f32 %v5981_v25, %v5779_v38 }
 0x172   : > { %v2539_v56 = vsel %vm5600_vm7, %v4843_v9, %v2538_v42  ;;  %v3954_v45 = vunpack.c.l.b16 %v3843_v0 }
 0x173   : > { %v2360_v47 = vpop.f32.mrf.mxu0  ;;  %v1706_v43 = vpop.f32.mrf.mxu3 }
 0x174   : > { %v1765_v2 = vadd.f32 %v1706_v43, %v1478_v37  ;;  %v3197_v37 = vrot.slane %v3195_v18, 4  ;;  %v3206_v43 = vrot.slane %v3204_v34, 5  ;;  %v3846_v18 = vsel %vm5600_vm7, %v3844_v46, %v3845_v61 }
 0x175   : > { %v6139_v26 = vpop.f32.mrf.mxu1 }
 0x176   : > { %4821 = vmatmul.msk.bf16.gmra.mxu0 %vm749_vm3, %v2264_v15  ;;  %v6150_v19 = vadd.f32 %v2360_v47, %v1765_v2  ;;  %v2540_v15 = vrot.slane %v2538_v42, 4  ;;  %v3210_v47 = vrot.slane %v3208_v16, 4  ;;  %v3201_v20 = vor.u32 %v3200_v59, %v3197_v37 }
 0x177   : > { %v1421_v14 = vpop.f32.mrf.mxu2  ;;  %v2625_v59 = vunpack.c.l.b16 %v2539_v56 }
 0x178   : > { %v1479_v8 = vadd.f32 %v1421_v14, %v1069_v48  ;;  %4859 = vmatmul.msk.bf16.gmra.mxu1 %vm749_vm3, %v2651_v10  ;;  %v3588_v10 = vpack.c.b16 %v3557_v35, %v3556_v62  ;;  %v2542_v34 = vsel %vm5600_vm7, %v2540_v15, %v2541_v27  ;;  %v3211_v16 = vor.u32 %v3210_v47, %v3206_v43  ;;  %v6178_v35 = vld [vmem:[%s5422_s29 + $0x34] sm:$0xf] }
 0x179   : > { %v3955_v14 = vunpack.c.l.b16 %v3846_v18  ;;  %v3202_v37 = vrot.slane %v3201_v20, 4  ;;  %v2626_v44 = vunpack.c.l.b16 %v2542_v34  ;;  %v3849_v15 = vrot.slane %v6133_v23, 5 }
 0x17a   : > { %v3212_v27 = vrot.slane %v3211_v16, 4  ;;  %v3228_v34 = vshll.u32 %v6178_v35, 16  ;;  %v5227_v16 = vld [vmem:[%s5422_s29 + $0x5c] sm:$0x1] }
 0x17b   : > { %v2362_v2 = vpop.f32.mrf.mxu0  ;;  %v1708_v51 = vpop.f32.mrf.mxu3  ;;  %v3986_v62 = vpack.c.b16 %v3955_v14, %v3954_v45  ;;  %v3207_v9 = vsel %vm5434_vm4, %v3202_v37, %v3206_v43  ;;  %v3232_v43 = vshrl.u32 %v6178_v35, 16  ;;  %v2548_v23 = vrot.slane %v5227_v16, 5 }
 0x17c   : > { %v1766_v48 = vadd.f32 %v1708_v51, %v1479_v8  ;;  %4968 = vmatmul.msk.bf16.vlgmr.msra.gmra.mxu2 %vm749_vm3, %v5134_v28  ;;  %v3216_v8 = vrot.slane %v3214_v32, 5  ;;  %v4990_v28 = vld [vmem:[%s5422_s29 + $0x30] sm:$0xf]  ;;  %v5050_v51 = vld [vmem:[%s5422_s29 + $0x24] sm:$0xe]  ;;  %v1074_v32 = vadd.f32 %v6003_v11, %v5793_v60 }
 0x17d   : > { %v6164_v33 = vpop.f32.mrf.mxu1  ;;  %v3219_v0 = vshrl.u32 %v4990_v28, 16  ;;  %v3222_v18 = vshll.u32 %v4990_v28, 16  ;;  %v5066_v37 = vrot.slane %v5050_v51, 9 }
 0x17e   : > { %v6173_v46 = vadd.f32 %v2362_v2, %v1766_v48  ;;  %v2652_v2 = vpack.c.b16 %v2626_v44, %v2625_v59  ;;  %v3217_v48 = vsel %vm5434_vm4, %v3212_v27, %v3216_v8  ;;  %v3852_v59 = vrot.slane %v6157_v29, 5  ;;  %v5135_v27 = vld [vmem:[%s5422_s29 + $0x24] sm:$0xff] }
 0x17f   : > { %v1424_v61 = vpop.f32.mrf.mxu2  ;;  %v3559_v8 = vunpack.c.l.b16 %v3217_v48  ;;  %v3221_v28 = vrot.slane %v3219_v0, 4 }
 0x180   : > { %5033 = vmatmul.msk.bf16.vlgmr.msra.gmra.mxu3 %vm749_vm3, %v3588_v10  ;;  %v1480_v42 = vadd.f32 %v1424_v61, %v1072_v7  ;;  %v5226_v10 = vld [vmem:[%s5422_s29 + $0x58] sm:$0xf]  ;;  %v4828_v7 = vld [vmem:[%s5422_s29 + $0x54] sm:$0xe]  ;;  %v3558_v61 = vunpack.c.l.b16 %v3207_v9  ;;  %v3850_v9 = vsel %vm5600_vm7, %v5066_v37, %v3849_v15  ;;  %v4993_v37 = vld [vmem:[%s5422_s29 + $0x3c] sm:$0xf] }
 0x181   : > { %v2545_v56 = vrot.slane %v5226_v10, 5  ;;  %v4844_v60 = vrot.slane %v4828_v7, 9  ;;  %v3234_v10 = vrot.slane %v3232_v43, 4  ;;  %v3956_v7 = vunpack.c.l.b16 %v3850_v9 }
 0x182   : > { %v3589_v51 = vpack.c.b16 %v3559_v8, %v3558_v61 }
 0x183   : > { %v2365_v38 = vpop.f32.mrf.mxu0  ;;  %v1711_v25 = vpop.f32.mrf.mxu3  ;;  %v2547_v11 = vrot.slane %v2545_v56, 4  ;;  %v2546_v48 = vsel %vm5600_vm7, %v4844_v60, %v2545_v56  ;;  %v5051_v60 = vld [vmem:[%s5422_s29 + $0x30] sm:$0xe] }
 0x184   : > { %v1767_v47 = vadd.f32 %v1711_v25, %v1480_v42  ;;  %v3851_v42 = vrot.slane %v3849_v15, 4  ;;  %v3224_v25 = vrot.slane %v3222_v18, 5 }
 0x185   : > { %v6184_v20 = vpop.f32.mrf.mxu1 }
 0x186   : > { %5082 = vmatmul.msk.bf16.vlgmr.msra.gmra.mxu0 %vm749_vm3, %v3986_v62  ;;  %v6196_v45 = vadd.f32 %v2365_v38, %v1767_v47  ;;  %v3230_v62 = vrot.slane %v3228_v34, 5  ;;  %v6202_v38 = vld [vmem:[%s5422_s29 + $0x38] sm:$0x1]  ;;  %v3853_v29 = vsel %vm5600_vm7, %v3851_v42, %v3852_v59  ;;  %v3225_v0 = vor.u32 %v3224_v25, %v3221_v28 }
 0x187   : > { %v1426_v14 = vpop.f32.mrf.mxu2  ;;  %v2549_v34 = vsel %vm5600_vm7, %v2547_v11, %v2548_v23  ;;  %v3238_v15 = vshll.u32 %v6202_v38, 16  ;;  %v2627_v59 = vunpack.c.l.b16 %v2546_v48  ;;  %v3856_v28 = vrot.slane %v6178_v35, 5 }
 0x188   : > { %v1481_v44 = vadd.f32 %v1426_v14, %v1074_v32  ;;  %4860 = vmatmul.msk.bf16.gmra.mxu1 %vm749_vm3, %v2652_v2  ;;  %v3235_v43 = vor.u32 %v3234_v10, %v3230_v62  ;;  %v1077_v32 = vadd.f32 %v6018_v30, %v5811_v39  ;;  %v3957_v14 = vunpack.c.l.b16 %v3853_v29 }
 0x189   : > { %v3226_v56 = vrot.slane %v3225_v0, 4  ;;  %v3240_v8 = vrot.slane %v3238_v15, 5  ;;  %v3243_v39 = vshrl.u32 %v4993_v37, 16  ;;  %v3246_v30 = vshll.u32 %v4993_v37, 16  ;;  %v5228_v15 = vld [vmem:[%s5422_s29 + $0x64] sm:$0xf] }
 0x18a   : > { %v3236_v23 = vrot.slane %v3235_v43, 4  ;;  %v3987_v25 = vpack.c.b16 %v3957_v14, %v3956_v7  ;;  %v3858_v43 = vrot.slane %v3856_v28, 4 }
 0x18b   : > { %v2367_v47 = vpop.f32.mrf.mxu0  ;;  %v1713_v16 = vpop.f32.mrf.mxu3  ;;  %v3231_v35 = vsel %vm5434_vm4, %v3226_v56, %v3230_v62  ;;  %v3245_v7 = vrot.slane %v3243_v39, 4  ;;  %v3248_v14 = vrot.slane %v3246_v30, 5 }
 0x18c   : > { %v1768_v2 = vadd.f32 %v1713_v16, %v1481_v44  ;;  %4969 = vmatmul.msk.bf16.gmra.mxu2 %vm749_vm3, %v5135_v27  ;;  %v2628_v44 = vunpack.c.l.b16 %v2549_v34  ;;  %v6221_v27 = vld [vmem:[%s5422_s29 + $0x40] sm:$0xf]  ;;  %v3560_v56 = vunpack.c.l.b16 %v3231_v35 }
 0x18d   : > { %v6209_v18 = vpop.f32.mrf.mxu1  ;;  %v3252_v9 = vshll.u32 %v6221_v27, 16  ;;  %v3256_v29 = vshrl.u32 %v6221_v27, 16 }
 0x18e   : > { %v6225_v11 = vadd.f32 %v2367_v47, %v1768_v2  ;;  %v2653_v48 = vpack.c.b16 %v2628_v44, %v2627_v59  ;;  %v3241_v47 = vsel %vm5434_vm4, %v3236_v23, %v3240_v8  ;;  %v5067_v2 = vrot.slane %v5051_v60, 9  ;;  %v5136_v44 = vld [vmem:[%s5422_s29 + $0x30] sm:$0xff]  ;;  %v6246_v8 = vld [vmem:[%s5422_s29 + $0x44] sm:$0x1] }
 0x18f   : > { %v1429_v61 = vpop.f32.mrf.mxu2  ;;  %v3254_v37 = vrot.slane %v3252_v9, 5  ;;  %v3561_v23 = vunpack.c.l.b16 %v3241_v47 }
 0x190   : > { %5034 = vmatmul.msk.bf16.gmra.mxu3 %vm749_vm3, %v3589_v51  ;;  %v1482_v42 = vadd.f32 %v1429_v61, %v1077_v32  ;;  %v1079_v51 = vadd.f32 %v6041_v12, %v5825_v1  ;;  %v2552_v32 = vrot.slane %v5228_v15, 5  ;;  %v3859_v1 = vrot.slane %v6202_v38, 5  ;;  %v4829_v12 = vld [vmem:[%s5422_s29 + $0x60] sm:$0xe]  ;;  %v5229_v38 = vld [vmem:[%s5422_s29 + $0x68] sm:$0x1] }
 0x191   : > { %v3857_v39 = vsel %vm5600_vm7, %v5067_v2, %v3856_v28  ;;  %v3590_v35 = vpack.c.b16 %v3561_v23, %v3560_v56 }
 0x192   : > { %v2554_v60 = vrot.slane %v2552_v32, 4  ;;  %v3860_v30 = vsel %vm5600_vm7, %v3858_v43, %v3859_v1  ;;  %v3958_v47 = vunpack.c.l.b16 %v3857_v39  ;;  %v1082_v43 = vadd.f32 %v6055_v41, %v5843_v40  ;;  %v5052_v40 = vld [vmem:[%s5422_s29 + $0x3c] sm:$0xe] }
 0x193   : > { %v2370_v10 = vpop.f32.mrf.mxu0  ;;  %v1716_v16 = vpop.f32.mrf.mxu3  ;;  %v3959_v15 = vunpack.c.l.b16 %v3860_v30 }
 0x194   : > { %v1769_v0 = vadd.f32 %v1716_v16, %v1482_v42  ;;  %v3258_v42 = vrot.slane %v3256_v29, 4  ;;  %v2555_v16 = vrot.slane %v5229_v38, 5 }
 0x195   : > { %v6233_v34 = vpop.f32.mrf.mxu1  ;;  %v3988_v23 = vpack.c.b16 %v3959_v15, %v3958_v47  ;;  %v1084_v15 = vadd.f32 %v6079_v4, %v5857_v22 }
 0x196   : > { %5083 = vmatmul.msk.bf16.gmra.mxu0 %vm749_vm3, %v3987_v25  ;;  %v6241_v62 = vadd.f32 %v2370_v10, %v1769_v0  ;;  %v4845_v25 = vrot.slane %v4829_v12, 9  ;;  %v3249_v10 = vor.u32 %v3248_v14, %v3245_v7  ;;  %v3262_v0 = vshll.u32 %v6246_v8, 16 }
 0x197   : > { %v1431_v61 = vpop.f32.mrf.mxu2  ;;  %v2556_v2 = vsel %vm5600_vm7, %v2554_v60, %v2555_v16 }
 0x198   : > { %v1483_v59 = vadd.f32 %v1431_v61, %v1079_v51  ;;  %4861 = vmatmul.msk.bf16.gmra.mxu1 %vm749_vm3, %v2653_v48  ;;  %v3259_v51 = vor.u32 %v3258_v42, %v3254_v37  ;;  %v2553_v28 = vsel %vm5600_vm7, %v4845_v25, %v2552_v32  ;;  %v3250_v12 = vrot.slane %v3249_v10, 4  ;;  %v4996_v42 = vld [vmem:[%s5422_s29 + $0x48] sm:$0xf]  ;;  %v6266_v32 = vld [vmem:[%s5422_s29 + $0x4c] sm:$0xf] }
 0x199   : > { %v3264_v61 = vrot.slane %v3262_v0, 5  ;;  %v2630_v56 = vunpack.c.l.b16 %v2556_v2  ;;  %v3267_v41 = vshrl.u32 %v4996_v42, 16  ;;  %v3270_v60 = vshll.u32 %v4996_v42, 16 }
 0x19a   : > { %v3260_v14 = vrot.slane %v3259_v51, 4  ;;  %v3255_v25 = vsel %vm5434_vm4, %v3250_v12, %v3254_v37  ;;  %v3863_v10 = vrot.slane %v6221_v27, 5  ;;  %v3280_v51 = vshrl.u32 %v6266_v32, 16  ;;  %v5230_v37 = vld [vmem:[%s5422_s29 + $0x70] sm:$0xf] }
 0x19b   : > { %v2372_v9 = vpop.f32.mrf.mxu0  ;;  %v1718_v29 = vpop.f32.mrf.mxu3  ;;  %v2559_v47 = vrot.slane %v5230_v37, 5  ;;  %v3269_v27 = vrot.slane %v3267_v41, 4  ;;  %v6292_v41 = vld [vmem:[%s5422_s29 + $0x50] sm:$0x1] }
 0x19c   : > { %v1770_v48 = vadd.f32 %v1718_v29, %v1483_v59  ;;  %4970 = vmatmul.msk.bf16.gmra.mxu2 %vm749_vm3, %v5136_v44  ;;  %v2629_v44 = vunpack.c.l.b16 %v2553_v28  ;;  %v3265_v30 = vsel %vm5434_vm4, %v3260_v14, %v3264_v61  ;;  %v3276_v29 = vshll.u32 %v6266_v32, 16  ;;  %v4830_v28 = vld [vmem:[%s5422_s29 + $0x6c] sm:$0xe] }
 0x19d   : > { %v6261_v1 = vpop.f32.mrf.mxu1  ;;  %v3563_v2 = vunpack.c.l.b16 %v3265_v30  ;;  %v3865_v14 = vrot.slane %v3863_v10, 4  ;;  %v3866_v61 = vrot.slane %v6246_v8, 5 }
 0x19e   : > { %v6271_v38 = vadd.f32 %v2372_v9, %v1770_v48  ;;  %v3562_v9 = vunpack.c.l.b16 %v3255_v25  ;;  %v5068_v48 = vrot.slane %v5052_v40, 9  ;;  %v3278_v42 = vrot.slane %v3276_v29, 5  ;;  %v5231_v25 = vld [vmem:[%s5422_s29 + $0x74] sm:$0x1] }
 0x19f   : > { %v1434_v7 = vpop.f32.mrf.mxu2  ;;  %v2562_v40 = vrot.slane %v5231_v25, 5  ;;  %v3867_v30 = vsel %vm5600_vm7, %v3865_v14, %v3866_v61 }
 0x1a0   : > { %5035 = vmatmul.msk.bf16.gmra.mxu3 %vm749_vm3, %v3590_v35  ;;  %v1484_v59 = vadd.f32 %v1434_v7, %v1082_v43  ;;  %v2654_v35 = vpack.c.b16 %v2630_v56, %v2629_v44  ;;  %v3272_v43 = vrot.slane %v3270_v60, 5  ;;  %v5137_v44 = vld [vmem:[%s5422_s29 + $0x3c] sm:$0xff]  ;;  %v4846_v56 = vrot.slane %v4830_v28, 9 }
 0x1a1   : > { %v3864_v8 = vsel %vm5600_vm7, %v5068_v48, %v3863_v10  ;;  %v1087_v10 = vadd.f32 %v6097_v53, %v5723_v6  ;;  %v3961_v28 = vunpack.c.l.b16 %v3867_v30 }
 0x1a2   : > { %v3273_v60 = vor.u32 %v3272_v43, %v3269_v27  ;;  %v2560_v37 = vsel %vm5600_vm7, %v4846_v56, %v2559_v47  ;;  %v3960_v48 = vunpack.c.l.b16 %v3864_v8 }
 0x1a3   : > { %v2375_v16 = vpop.f32.mrf.mxu0  ;;  %v1721_v39 = vpop.f32.mrf.mxu3 }
 0x1a4   : > { %v1771_v0 = vadd.f32 %v1721_v39, %v1484_v59  ;;  %v3282_v59 = vrot.slane %v3280_v51, 4  ;;  %v3286_v51 = vshll.u32 %v6292_v41, 16  ;;  %v3274_v27 = vrot.slane %v3273_v60, 4  ;;  %v5053_v60 = vld [vmem:[%s5422_s29 + $0x48] sm:$0xe] }
 0x1a5   : > { %v6286_v4 = vpop.f32.mrf.mxu1 }
 0x1a6   : > { %5084 = vmatmul.msk.bf16.gmra.mxu0 %vm749_vm3, %v3988_v23  ;;  %v6283_v12 = vadd.f32 %v2375_v16, %v1771_v0  ;;  %v2561_v23 = vrot.slane %v2559_v47, 4  ;;  %v3283_v29 = vor.u32 %v3282_v59, %v3278_v42  ;;  %v3288_v59 = vrot.slane %v3286_v51, 5  ;;  %v6309_v47 = vld [vmem:[%s5422_s29 + $0x58] sm:$0xf] }
 0x1a7   : > { %v1436_v7 = vpop.f32.mrf.mxu2  ;;  %v3279_v25 = vsel %vm5434_vm4, %v3274_v27, %v3278_v42  ;;  %v3300_v51 = vshll.u32 %v6309_v47, 16  ;;  %v5069_v42 = vrot.slane %v5053_v60, 9 }
 0x1a8   : > { %v1485_v22 = vadd.f32 %v1436_v7, %v1084_v15  ;;  %4862 = vmatmul.msk.bf16.gmra.mxu1 %vm749_vm3, %v2654_v35  ;;  %v3591_v35 = vpack.c.b16 %v3563_v2, %v3562_v9  ;;  %v2563_v15 = vsel %vm5600_vm7, %v2561_v23, %v2562_v40  ;;  %v2631_v7 = vunpack.c.l.b16 %v2560_v37  ;;  %v4999_v2 = vld [vmem:[%s5422_s29 + $0x54] sm:$0xf] }
 0x1a9   : > { %v2632_v14 = vunpack.c.l.b16 %v2563_v15  ;;  %v3284_v61 = vrot.slane %v3283_v29, 4  ;;  %v3291_v30 = vshrl.u32 %v4999_v2, 16  ;;  %v3294_v29 = vshll.u32 %v4999_v2, 16  ;;  %v4831_v15 = vld [vmem:[%s5422_s29 + $0x78] sm:$0xe] }
 0x1aa   : > { %v1089_v37 = vadd.f32 %v6119_v63, %v5738_v31  ;;  %v6333_v63 = vrot.slane %v3300_v51, 5  ;;  %v5233_v2 = vld [vmem:[%s5422_s29 + $0x80] sm:$0x1] }
 0x1ab   : > { %v2377_v16 = vpop.f32.mrf.mxu0  ;;  %v1723_v39 = vpop.f32.mrf.mxu3  ;;  %v2655_v23 = vpack.c.b16 %v2632_v14, %v2631_v7  ;;  %v3289_v40 = vsel %vm5434_vm4, %v3284_v61, %v3288_v59  ;;  %v5138_v14 = vld [vmem:[%s5422_s29 + $0x48] sm:$0xff]  ;;  %v3293_v61 = vrot.slane %v3291_v30, 4  ;;  %v3296_v31 = vrot.slane %v3294_v29, 5 }
 0x1ac   : > { %v1772_v0 = vadd.f32 %v1723_v39, %v1485_v22  ;;  %4971 = vmatmul.msk.bf16.gmra.mxu2 %vm749_vm3, %v5137_v44  ;;  %v3989_v22 = vpack.c.b16 %v3961_v28, %v3960_v48  ;;  %v3870_v39 = vrot.slane %v6266_v32, 5  ;;  %v3564_v48 = vunpack.c.l.b16 %v3279_v25 }
 0x1ad   : > { %v6311_v44 = vpop.f32.mrf.mxu1  ;;  %v3565_v28 = vunpack.c.l.b16 %v3289_v40  ;;  %v4847_v59 = vrot.slane %v4831_v15, 9  ;;  %v3297_v29 = vor.u32 %v3296_v31, %v3293_v61  ;;  %v3877_v31 = vrot.slane %v6309_v47, 5 }
 0x1ae   : > { %v6313_v6 = vadd.f32 %v2377_v16, %v1772_v0  ;;  %v5232_v16 = vld [vmem:[%s5422_s29 + $0x7c] sm:$0xf]  ;;  %v3872_v27 = vrot.slane %v3870_v39, 4 }
 0x1af   : > { %v1439_v43 = vpop.f32.mrf.mxu2  ;;  %v2566_v0 = vrot.slane %v5232_v16, 5  ;;  %v3592_v30 = vpack.c.b16 %v3565_v28, %v3564_v48  ;;  %v5002_v48 = vld [vmem:[%s5422_s29 + $0x60] sm:$0xf] }
 0x1b0   : > { %5036 = vmatmul.msk.bf16.gmra.mxu3 %vm749_vm3, %v3591_v35  ;;  %v1486_v9 = vadd.f32 %v1439_v43, %v1087_v10  ;;  %v3304_v35 = vshrl.u32 %v6309_v47, 16  ;;  %v3873_v43 = vrot.slane %v6292_v41, 5  ;;  %v3871_v41 = vsel %vm5600_vm7, %v5069_v42, %v3870_v39 }
 0x1b1   : > { %v2567_v51 = vsel %vm5600_vm7, %v4847_v59, %v2566_v0  ;;  %v3962_v42 = vunpack.c.l.b16 %v3871_v41 }
 0x1b3   : > { %v2380_v53 = vpop.f32.mrf.mxu0  ;;  %v1726_v56 = vpop.f32.mrf.mxu3 }
 0x1b4   : > { %v1773_v8 = vadd.f32 %v1726_v56, %v1486_v9  ;;  %v2568_v9 = vrot.slane %v2566_v0, 4  ;;  %v6337_v56 = vld [vmem:[%s5422_s29 + $0x5c] sm:$0x1] }
 0x1b5   : > { %v3310_v39 = vshll.u32 %v6337_v56, 16 }
 0x1b6   : > { %5085 = vmatmul.msk.bf16.gmra.mxu0 %vm749_vm3, %v3989_v22  ;;  %v6328_v10 = vadd.f32 %v2380_v53, %v1773_v8  ;;  %v2569_v22 = vrot.slane %v5233_v2, 5  ;;  %v3306_v53 = vrot.slane %v3304_v35, 4  ;;  %v6343_v8 = vpop.f32.mrf.mxu1 }
 0x1b7   : > { %v1441_v32 = vpop.f32.mrf.mxu2  ;;  %v3312_v61 = vrot.slane %v3310_v39, 5 }
 0x1b8   : > { %v1487_v7 = vadd.f32 %v1441_v32, %v1089_v37  ;;  %4863 = vmatmul.msk.bf16.gmra.mxu1 %vm749_vm3, %v2655_v23  ;;  %v3874_v23 = vsel %vm5600_vm7, %v3872_v27, %v3873_v43  ;;  %v2570_v16 = vsel %vm5600_vm7, %v2568_v9, %v2569_v22  ;;  %v3307_v35 = vor.u32 %v3306_v53, %v6333_v63  ;;  %v5054_v9 = vld [vmem:[%s5422_s29 + $0x54] sm:$0xe] }
 0x1b9   : > { %v1092_v37 = vadd.f32 %v6139_v26, %v5755_v55  ;;  %v3963_v15 = vunpack.c.l.b16 %v3874_v23  ;;  %v2633_v27 = vunpack.c.l.b16 %v2567_v51  ;;  %v2634_v0 = vunpack.c.l.b16 %v2570_v16  ;;  %v5234_v16 = vld [vmem:[%s5422_s29 + $0x88] sm:$0xf] }
 0x1ba   : > { %v3298_v43 = vrot.slane %v3297_v29, 4  ;;  %v3315_v55 = vshrl.u32 %v5002_v48, 16  ;;  %v3318_v26 = vshll.u32 %v5002_v48, 16  ;;  %v1094_v23 = vadd.f32 %v6164_v33, %v5770_v21  ;;  %v4832_v33 = vld [vmem:[%s5422_s29 + $0x84] sm:$0xe] }
 0x1bb   : > { %v2382_v25 = vpop.f32.mrf.mxu0  ;;  %v1728_v40 = vpop.f32.mrf.mxu3  ;;  %v3990_v59 = vpack.c.b16 %v3963_v15, %v3962_v42  ;;  %v2656_v29 = vpack.c.b16 %v2634_v0, %v2633_v27  ;;  %v3879_v51 = vrot.slane %v3877_v31, 4  ;;  %v3880_v21 = vrot.slane %v6337_v56, 5  ;;  %v5139_v27 = vld [vmem:[%s5422_s29 + $0x54] sm:$0xff]  ;;  %v5235_v56 = vld [vmem:[%s5422_s29 + $0x8c] sm:$0x1] }
 0x1bc   : > { %v1774_v60 = vadd.f32 %v1728_v40, %v1487_v7  ;;  %4972 = vmatmul.msk.bf16.gmra.mxu2 %vm749_vm3, %v5138_v14  ;;  %v6357_v7 = vld [vmem:[%s5422_s29 + $0x64] sm:$0xf]  ;;  %v3308_v14 = vrot.slane %v3307_v35, 4  ;;  %v3303_v47 = vsel %vm5434_vm4, %v3298_v43, %v6333_v63  ;;  %v2573_v35 = vrot.slane %v5234_v16, 5 }
 0x1bd   : > { %v3324_v40 = vshll.u32 %v6357_v7, 16  ;;  %v3328_v41 = vshrl.u32 %v6357_v7, 16  ;;  %v3320_v42 = vrot.slane %v3318_v26, 5  ;;  %v3566_v0 = vunpack.c.l.b16 %v3303_v47 }
 0x1be   : > { %v6361_v2 = vadd.f32 %v2382_v25, %v1774_v60  ;;  %v3313_v25 = vsel %vm5434_vm4, %v3308_v14, %v3312_v61  ;;  %v5070_v60 = vrot.slane %v5054_v9, 9  ;;  %v6374_v39 = vpop.f32.mrf.mxu1  ;;  %v6383_v14 = vld [vmem:[%s5422_s29 + $0x68] sm:$0x1]  ;;  %v4848_v61 = vrot.slane %v4832_v33, 9 }
 0x1bf   : > { %v1444_v32 = vpop.f32.mrf.mxu2  ;;  %v3330_v48 = vrot.slane %v3328_v41, 4  ;;  %v3567_v43 = vunpack.c.l.b16 %v3313_v25  ;;  %v2576_v9 = vrot.slane %v5235_v56, 5  ;;  %v3881_v26 = vsel %vm5600_vm7, %v3879_v51, %v3880_v21 }
 0x1c0   : > { %5037 = vmatmul.msk.bf16.gmra.mxu3 %vm749_vm3, %v3592_v30  ;;  %v1488_v28 = vadd.f32 %v1444_v32, %v1092_v37  ;;  %v3317_v37 = vrot.slane %v3315_v55, 4  ;;  %v3326_v32 = vrot.slane %v3324_v40, 5  ;;  %v3878_v55 = vsel %vm5600_vm7, %v5070_v60, %v3877_v31 }
 0x1c1   : > { %v3964_v47 = vunpack.c.l.b16 %v3878_v55  ;;  %v3965_v25 = vunpack.c.l.b16 %v3881_v26  ;;  %v2574_v31 = vsel %vm5600_vm7, %v4848_v61, %v2573_v35  ;;  %v1097_v51 = vadd.f32 %v6184_v20, %v5787_v50  ;;  %v5055_v50 = vld [vmem:[%s5422_s29 + $0x60] sm:$0xe] }
 0x1c2   : > { %v3331_v41 = vor.u32 %v3330_v48, %v3326_v32  ;;  %v3884_v26 = vrot.slane %v6357_v7, 5 }
 0x1c3   : > { %v2385_v22 = vpop.f32.mrf.mxu0  ;;  %v1731_v53 = vpop.f32.mrf.mxu3 }
 0x1c4   : > { %v1775_v30 = vadd.f32 %v1731_v53, %v1488_v28  ;;  %v3332_v33 = vrot.slane %v3331_v41, 4 }
 0x1c6   : > { %5086 = vmatmul.msk.bf16.gmra.mxu0 %vm749_vm3, %v3990_v59  ;;  %v6378_v63 = vadd.f32 %v2385_v22, %v1775_v30  ;;  %v2575_v59 = vrot.slane %v2573_v35, 4  ;;  %v3321_v22 = vor.u32 %v3320_v42, %v3317_v37  ;;  %v5005_v42 = vld [vmem:[%s5422_s29 + $0x6c] sm:$0xf]  ;;  %v6403_v35 = vld [vmem:[%s5422_s29 + $0x70] sm:$0xf] }
 0x1c7   : > { %v1446_v15 = vpop.f32.mrf.mxu2  ;;  %v3339_v20 = vshrl.u32 %v5005_v42, 16  ;;  %v3342_v61 = vshll.u32 %v5005_v42, 16 }
 0x1c8   : > { %v1489_v28 = vadd.f32 %v1446_v15, %v1094_v23  ;;  %4864 = vmatmul.msk.bf16.gmra.mxu1 %vm749_vm3, %v2656_v29  ;;  %v3334_v23 = vshll.u32 %v6383_v14, 16  ;;  %v3593_v29 = vpack.c.b16 %v3567_v43, %v3566_v0  ;;  %v2577_v60 = vsel %vm5600_vm7, %v2575_v59, %v2576_v9  ;;  %v6399_v15 = vpop.f32.mrf.mxu1 }
 0x1c9   : > { %v3322_v16 = vrot.slane %v3321_v22, 4  ;;  %v3991_v0 = vpack.c.b16 %v3965_v25, %v3964_v47  ;;  %v3348_v22 = vshll.u32 %v6403_v35, 16  ;;  %v1099_v47 = vadd.f32 %v6209_v18, %v5802_v17  ;;  %v4833_v25 = vld [vmem:[%s5422_s29 + $0x90] sm:$0xe]  ;;  %v5140_v18 = vld [vmem:[%s5422_s29 + $0x60] sm:$0xff] }
 0x1ca   : > { %v3336_v37 = vrot.slane %v3334_v23, 5  ;;  %v3341_v7 = vrot.slane %v3339_v20, 4 }
 0x1cb   : > { %v2387_v53 = vpop.f32.mrf.mxu0  ;;  %v1733_v40 = vpop.f32.mrf.mxu3  ;;  %v3327_v43 = vsel %vm5434_vm4, %v3322_v16, %v3326_v32  ;;  %v5236_v32 = vld [vmem:[%s5422_s29 + $0x94] sm:$0xf] }
 0x1cc   : > { %v1776_v30 = vadd.f32 %v1733_v40, %v1489_v28  ;;  %4973 = vmatmul.msk.bf16.gmra.mxu2 %vm749_vm3, %v5139_v27  ;;  %v2635_v28 = vunpack.c.l.b16 %v2574_v31  ;;  %v2636_v27 = vunpack.c.l.b16 %v2577_v60  ;;  %v3337_v55 = vsel %vm5434_vm4, %v3332_v33, %v3336_v37 }
 0x1cd   : > { %v3352_v40 = vshrl.u32 %v6403_v35, 16  ;;  %v3569_v31 = vunpack.c.l.b16 %v3337_v55  ;;  %v3344_v60 = vrot.slane %v3342_v61, 5  ;;  %v3887_v33 = vrot.slane %v6383_v14, 5 }
 0x1ce   : > { %v6408_v59 = vadd.f32 %v2387_v53, %v1776_v30  ;;  %v2657_v23 = vpack.c.b16 %v2636_v27, %v2635_v28  ;;  %v3568_v53 = vunpack.c.l.b16 %v3327_v43  ;;  %v5071_v30 = vrot.slane %v5055_v50, 9  ;;  %v5237_v27 = vld [vmem:[%s5422_s29 + $0x98] sm:$0x1]  ;;  %v6427_v43 = vld [vmem:[%s5422_s29 + $0x74] sm:$0x1] }
 0x1cf   : > { %v1449_v21 = vpop.f32.mrf.mxu2  ;;  %v3350_v37 = vrot.slane %v3348_v22, 5  ;;  %v3354_v42 = vrot.slane %v3352_v40, 4  ;;  %v3345_v20 = vor.u32 %v3344_v60, %v3341_v7  ;;  %v3358_v22 = vshll.u32 %v6427_v43, 16 }
 0x1d0   : > { %5038 = vmatmul.msk.bf16.gmra.mxu3 %vm749_vm3, %v3593_v29  ;;  %v1490_v48 = vadd.f32 %v1449_v21, %v1097_v51  ;;  %v2580_v29 = vrot.slane %v5236_v32, 5  ;;  %v3886_v21 = vrot.slane %v3884_v26, 4  ;;  %v6429_v50 = vpop.f32.mrf.mxu1  ;;  %v3885_v14 = vsel %vm5600_vm7, %v5071_v30, %v3884_v26 }
 0x1d1   : > { %v3355_v55 = vor.u32 %v3354_v42, %v3350_v37  ;;  %v1102_v26 = vadd.f32 %v6233_v34, %v5819_v52 }
 0x1d2   : > { %v2582_v28 = vrot.slane %v2580_v29, 4 }
 0x1d3   : > { %v2390_v56 = vpop.f32.mrf.mxu0  ;;  %v1736_v9 = vpop.f32.mrf.mxu3 }
 0x1d4   : > { %v1777_v41 = vadd.f32 %v1736_v9, %v1490_v48  ;;  %v4849_v48 = vrot.slane %v4833_v25, 9  ;;  %v3888_v9 = vsel %vm5600_vm7, %v3886_v21, %v3887_v33  ;;  %v3346_v25 = vrot.slane %v3345_v20, 4 }
 0x1d5   : > { %v3967_v30 = vunpack.c.l.b16 %v3888_v9  ;;  %v3356_v21 = vrot.slane %v3355_v55, 4  ;;  %v3360_v33 = vrot.slane %v3358_v22, 5  ;;  %v5238_v55 = vld [vmem:[%s5422_s29 + $0xa0] sm:$0xf] }
 0x1d6   : > { %5087 = vmatmul.msk.bf16.gmra.mxu0 %vm749_vm3, %v3991_v0  ;;  %v6420_v51 = vadd.f32 %v2390_v56, %v1777_v41  ;;  %v2583_v0 = vrot.slane %v5237_v27, 5  ;;  %v3594_v41 = vpack.c.b16 %v3569_v31, %v3568_v53  ;;  %v5008_v31 = vld [vmem:[%s5422_s29 + $0x78] sm:$0xf]  ;;  %v5056_v27 = vld [vmem:[%s5422_s29 + $0x6c] sm:$0xe]  ;;  %v2587_v22 = vrot.slane %v5238_v55, 5 }
 0x1d7   : > { %v1451_v16 = vpop.f32.mrf.mxu2  ;;  %v3366_v9 = vshll.u32 %v5008_v31, 16  ;;  %v6935_v55 = vld [vmem:[#allocation5_spill] sm:$0xff] }
 0x1d8   : > { %v1491_v17 = vadd.f32 %v1451_v16, %v1099_v47  ;;  %4865 = vmatmul.msk.bf16.gmra.mxu1 %vm749_vm3, %v2657_v23  ;;  %v2581_v23 = vsel %vm5600_vm7, %v4849_v48, %v2580_v29  ;;  %v2584_v32 = vsel %vm5600_vm7, %v2582_v28, %v2583_v0  ;;  %v3966_v47 = vunpack.c.l.b16 %v3885_v14  ;;  %v6446_v29 = vld [vmem:[%s5422_s29 + $0x7c] sm:$0xf]  ;;  %v6456_v20 = vpop.f32.mrf.mxu1 }
 0x1d9   : > { %v2637_v60 = vunpack.c.l.b16 %v2581_v23  ;;  %v2638_v16 = vunpack.c.l.b16 %v2584_v32  ;;  %v3351_v48 = vsel %vm5434_vm4, %v3346_v25, %v3350_v37  ;;  %v3361_v28 = vsel %vm5434_vm4, %v3356_v21, %v3360_v33 }
 0x1da   : > { %v3992_v42 = vpack.c.b16 %v3967_v30, %v3966_v47  ;;  %v3891_v0 = vrot.slane %v6403_v35, 5  ;;  %v3363_v14 = vshrl.u32 %v5008_v31, 16  ;;  %v1104_v37 = vadd.f32 %v6261_v1, %v5834_v24  ;;  %v4834_v35 = vld [vmem:[%s5422_s29 + $0x9c] sm:$0xe] }
 0x1db   : > { %v2392_v61 = vpop.f32.mrf.mxu0  ;;  %v1738_v56 = vpop.f32.mrf.mxu3  ;;  %v3571_v47 = vunpack.c.l.b16 %v3361_v28  ;;  %v3894_v25 = vrot.slane %v6427_v43, 5  ;;  %v3368_v24 = vrot.slane %v3366_v9, 5  ;;  %v4850_v21 = vrot.slane %v4834_v35, 9 }
 0x1dc   : > { %v1778_v40 = vadd.f32 %v1738_v56, %v1491_v17  ;;  %4974 = vmatmul.msk.bf16.gmra.mxu2 %vm749_vm3, %v5140_v18  ;;  %v2658_v18 = vpack.c.b16 %v2638_v16, %v2637_v60  ;;  %v3893_v30 = vrot.slane %v3891_v0, 4  ;;  %v5141_v60 = vld [vmem:[%s5422_s29 + $0x6c] sm:$0xff]  ;;  %v3365_v16 = vrot.slane %v3363_v14, 4 }
 0x1dd   : > { %v2589_v33 = vrot.slane %v2587_v22, 4  ;;  %v2588_v14 = vsel %vm5600_vm7, %v4850_v21, %v2587_v22 }
 0x1de   : > { %v6448_v17 = vadd.f32 %v2392_v61, %v1778_v40  ;;  %v3372_v61 = vshll.u32 %v6446_v29, 16  ;;  %v3376_v40 = vshrl.u32 %v6446_v29, 16  ;;  %v2639_v22 = vunpack.c.l.b16 %v2588_v14  ;;  %v6936_v14 = vld [vmem:[#allocation6_spill] sm:$0xff] }
 0x1df   : > { %v1454_v7 = vpop.f32.mrf.mxu2 }
 0x1e0   : > { %5039 = vmatmul.msk.bf16.gmra.mxu3 %vm749_vm3, %v3594_v41  ;;  %v1492_v53 = vadd.f32 %v1454_v7, %v1102_v26  ;;  %v5072_v41 = vrot.slane %v5056_v27, 9  ;;  %v3570_v26 = vunpack.c.l.b16 %v3351_v48  ;;  %v6470_v1 = vrot.slane %v3372_v61, 5 }
 0x1e2   : > { %v3892_v43 = vsel %vm5600_vm7, %v5072_v41, %v3891_v0  ;;  %v3595_v27 = vpack.c.b16 %v3571_v47, %v3570_v26 }
 0x1e3   : > { %v2395_v52 = vpop.f32.mrf.mxu0  ;;  %v1741_v34 = vpop.f32.mrf.mxu3  ;;  %v3968_v41 = vunpack.c.l.b16 %v3892_v43 }
 0x1e4   : > { %v1779_v56 = vadd.f32 %v1741_v34, %v1492_v53  ;;  %v5239_v53 = vld [vmem:[%s5422_s29 + $0xa4] sm:$0x1] }
 0x1e5   : > { %v2590_v31 = vrot.slane %v5239_v53, 5 }
 0x1e6   : > { %5088 = vmatmul.msk.bf16.gmra.mxu0 %vm749_vm3, %v3992_v42  ;;  %v6465_v23 = vadd.f32 %v2395_v52, %v1779_v56  ;;  %v3378_v42 = vrot.slane %v3376_v40, 4  ;;  %v6474_v52 = vld [vmem:[%s5422_s29 + $0x80] sm:$0x1]  ;;  %v3369_v56 = vor.u32 %v3368_v24, %v3365_v16  ;;  %v1107_v40 = vadd.f32 %v6286_v4, %v6935_v55 }
 0x1e7   : > { %v1456_v32 = vpop.f32.mrf.mxu2  ;;  %v2591_v9 = vsel %vm5600_vm7, %v2589_v33, %v2590_v31  ;;  %v3382_v0 = vshll.u32 %v6474_v52, 16  ;;  %v3898_v4 = vrot.slane %v6446_v29, 5  ;;  %v5057_v31 = vld [vmem:[%s5422_s29 + $0x78] sm:$0xe] }
 0x1e8   : > { %v1493_v7 = vadd.f32 %v1456_v32, %v1104_v37  ;;  %4866 = vmatmul.msk.bf16.gmra.mxu1 %vm749_vm3, %v2658_v18  ;;  %v3895_v18 = vsel %vm5600_vm7, %v3893_v30, %v3894_v25  ;;  %v3379_v61 = vor.u32 %v3378_v42, %v6470_v1  ;;  %v6489_v37 = vpop.f32.mrf.mxu1  ;;  %v2640_v47 = vunpack.c.l.b16 %v2591_v9  ;;  %v5011_v30 = vld [vmem:[%s5422_s29 + $0x84] sm:$0xf]  ;;  %v6494_v25 = vld [vmem:[%s5422_s29 + $0x88] sm:$0xf] }
 0x1e9   : > { %v3969_v35 = vunpack.c.l.b16 %v3895_v18  ;;  %v3384_v16 = vrot.slane %v3382_v0, 5  ;;  %v3387_v42 = vshrl.u32 %v5011_v30, 16  ;;  %v3396_v43 = vshll.u32 %v6494_v25, 16 }
 0x1ea   : > { %v3400_v18 = vshrl.u32 %v6494_v25, 16  ;;  %v1109_v9 = vadd.f32 %v6311_v44, %v6936_v14  ;;  %v5073_v0 = vrot.slane %v5057_v31, 9  ;;  %v3900_v55 = vrot.slane %v3898_v4, 4  ;;  %v5241_v31 = vld [vmem:[%s5422_s29 + $0xb0] sm:$0x1] }
 0x1eb   : > { %v2397_v34 = vpop.f32.mrf.mxu0  ;;  %v1743_v48 = vpop.f32.mrf.mxu3  ;;  %v3993_v24 = vpack.c.b16 %v3969_v35, %v3968_v41  ;;  %v4835_v41 = vld [vmem:[%s5422_s29 + $0xa8] sm:$0xe] }
 0x1ec   : > { %v1780_v28 = vadd.f32 %v1743_v48, %v1493_v7  ;;  %4975 = vmatmul.msk.bf16.gmra.mxu2 %vm749_vm3, %v5141_v60  ;;  %v3370_v7 = vrot.slane %v3369_v56, 4  ;;  %v3380_v60 = vrot.slane %v3379_v61, 4  ;;  %v3390_v48 = vshll.u32 %v5011_v30, 16 }
 0x1ed   : > { %v2659_v56 = vpack.c.b16 %v2640_v47, %v2639_v22  ;;  %v3402_v22 = vrot.slane %v3400_v18, 4 }
 0x1ee   : > { %v6497_v21 = vadd.f32 %v2397_v34, %v1780_v28  ;;  %v3375_v29 = vsel %vm5434_vm4, %v3370_v7, %v6470_v1  ;;  %v3385_v34 = vsel %vm5434_vm4, %v3380_v60, %v3384_v16  ;;  %v5240_v28 = vld [vmem:[%s5422_s29 + $0xac] sm:$0xf]  ;;  %v3392_v1 = vrot.slane %v3390_v48, 5  ;;  %v5142_v7 = vld [vmem:[%s5422_s29 + $0x78] sm:$0xff] }
 0x1ef   : > { %v1459_v32 = vpop.f32.mrf.mxu2  ;;  %v2594_v61 = vrot.slane %v5240_v28, 5  ;;  %v3572_v60 = vunpack.c.l.b16 %v3375_v29  ;;  %v3573_v16 = vunpack.c.l.b16 %v3385_v34 }
 0x1f0   : > { %5040 = vmatmul.msk.bf16.gmra.mxu3 %vm749_vm3, %v3595_v27  ;;  %v1494_v26 = vadd.f32 %v1459_v32, %v1107_v40  ;;  %v3901_v40 = vrot.slane %v6474_v52, 5  ;;  %v3389_v32 = vrot.slane %v3387_v42, 4  ;;  %v6515_v47 = vpop.f32.mrf.mxu1  ;;  %v4851_v52 = vrot.slane %v4835_v41, 9 }
 0x1f1   : > { %v3899_v42 = vsel %vm5600_vm7, %v5073_v0, %v3898_v4  ;;  %v3596_v34 = vpack.c.b16 %v3573_v16, %v3572_v60  ;;  %v6937_v0 = vld [vmem:[#allocation7_spill] sm:$0xff] }
 0x1f2   : > { %v3902_v18 = vsel %vm5600_vm7, %v3900_v55, %v3901_v40  ;;  %v2595_v4 = vsel %vm5600_vm7, %v4851_v52, %v2594_v61  ;;  %v2803_v55 = vadd.f32 %v6343_v8, %v6937_v0  ;;  %v3970_v40 = vunpack.c.l.b16 %v3899_v42  ;;  %v5014_v16 = vld [vmem:[%s5422_s29 + $0x90] sm:$0xf]  ;;  %v6939_v0 = vld [vmem:[#allocation8_spill] sm:$0xff] }
 0x1f3   : > { %v2400_v33 = vpop.f32.mrf.mxu0  ;;  %v1746_v53 = vpop.f32.mrf.mxu3  ;;  %v3971_v41 = vunpack.c.l.b16 %v3902_v18  ;;  %v5058_v18 = vld [vmem:[%s5422_s29 + $0x84] sm:$0xe] }
 0x1f4   : > { %v1781_v27 = vadd.f32 %v1746_v53, %v1494_v26  ;;  %v3398_v26 = vrot.slane %v3396_v43, 5  ;;  %v2596_v53 = vrot.slane %v2594_v61, 4  ;;  %v6541_v61 = vld [vmem:[%s5422_s29 + $0x94] sm:$0xf] }
 0x1f6   : > { %5089 = vmatmul.msk.bf16.gmra.mxu0 %vm749_vm3, %v3993_v24  ;;  %v6513_v44 = vadd.f32 %v2400_v33, %v1781_v27  ;;  %v6520_v24 = vld [vmem:[%s5422_s29 + $0x8c] sm:$0x1]  ;;  %v2597_v33 = vrot.slane %v5241_v31, 5  ;;  %v3393_v27 = vor.u32 %v3392_v1, %v3389_v32  ;;  %v3403_v14 = vor.u32 %v3402_v22, %v3398_v26 }
 0x1f7   : > { %v1461_v35 = vpop.f32.mrf.mxu2 }
 0x1f8   : > { %v1495_v30 = vadd.f32 %v1461_v35, %v1109_v9  ;;  %4867 = vmatmul.msk.bf16.gmra.mxu1 %vm749_vm3, %v2659_v56  ;;  %v3406_v56 = vshll.u32 %v6520_v24, 16  ;;  %v4379_v9 = vld [vmem:[%s6915_s3] sm:$0xff]  ;;  %v2598_v28 = vsel %vm5600_vm7, %v2596_v53, %v2597_v33  ;;  %v3394_v32 = vrot.slane %v3393_v27, 4  ;;  %v6543_v52 = vpop.f32.mrf.mxu1 }
 0x1f9   : > { %4399 = vmatpush.msrb.mxu1 %v4379_v9  ;;  %v3404_v1 = vrot.slane %v3403_v14, 4  ;;  %v2642_v60 = vunpack.c.l.b16 %v2598_v28  ;;  %v3994_v53 = vpack.c.b16 %v3971_v41, %v3970_v40  ;;  %v3905_v27 = vrot.slane %v6494_v25, 5  ;;  %v6556_v9 = vld [vmem:[%s6914_s2] ss:$0 sm:$0xff] }
 0x1fa   : > { %v3408_v22 = vrot.slane %v3406_v56, 5  ;;  %v3399_v42 = vsel %vm5434_vm4, %v3394_v32, %v3398_v26  ;;  %v3411_v14 = vshrl.u32 %v5014_v16, 16  ;;  %v3424_v28 = vshrl.u32 %v6541_v61, 16 }
 0x1fb   : > { %v2402_v48 = vpop.f32.mrf.mxu0  ;;  %v1748_v43 = vpop.f32.mrf.mxu3  ;;  %v3574_v40 = vunpack.c.l.b16 %v3399_v42  ;;  %v5074_v41 = vrot.slane %v5058_v18, 9  ;;  %v5243_v18 = vld [vmem:[%s5422_s29 + $0xbc] sm:$0x1] }
 0x1fc   : > { %v1782_v29 = vadd.f32 %v1748_v43, %v1495_v30  ;;  %4976 = vmatmul.msk.bf16.gmra.mxu2 %vm749_vm3, %v5142_v7  ;;  %v2641_v7 = vunpack.c.l.b16 %v2595_v4  ;;  %v3409_v43 = vsel %vm5434_vm4, %v3404_v1, %v3408_v22  ;;  %v5242_v4 = vld [vmem:[%s5422_s29 + $0xb8] sm:$0xf]  ;;  %v3907_v22 = vrot.slane %v3905_v27, 4 }
 0x1fd   : > { %v2601_v26 = vrot.slane %v5242_v4, 5  ;;  %v3575_v1 = vunpack.c.l.b16 %v3409_v43  ;;  %v3426_v4 = vrot.slane %v3424_v28, 4 }
 0x1fe   : > { %v6545_v8 = vadd.f32 %v2402_v48, %v1782_v29  ;;  %v2660_v48 = vpack.c.b16 %v2642_v60, %v2641_v7  ;;  %v3414_v29 = vshll.u32 %v5014_v16, 16  ;;  %v3413_v7 = vrot.slane %v3411_v14, 4 }
 0x1ff   : > { %v3010_v35 = vpop.f32.mrf.mxu2  ;;  %v2603_v42 = vrot.slane %v2601_v26, 4  ;;  %v3906_v14 = vsel %vm5600_vm7, %v5074_v41, %v3905_v27 }
 0x200   : > { %5041 = vmatmul.msk.bf16.gmra.mxu3 %vm749_vm3, %v3596_v34  ;;  %v3090_v30 = vadd.f32 %v3010_v35, %v2803_v55  ;;  %6938 = vst [vmem:[#allocation5_spill] sm:$0xff] %v6545_v8  ;;  %v3420_v34 = vshll.u32 %v6541_v61, 16  ;;  %v2804_v55 = vadd.f32 %v6374_v39, %v6939_v0  ;;  %v4836_v35 = vld [vmem:[%s5422_s29 + $0xb4] sm:$0xe]  ;;  %v5143_v39 = vld [vmem:[%s5422_s29 + $0x84] sm:$0xff] }
 0x201   : > { %v6573_v0 = vld [vmem:[%s5422_s29 + $0x98] sm:$0x1] }
 0x202   : > { %v3430_v41 = vshll.u32 %v6573_v0, 16 }
 0x203   : > { %v4062_v31 = vpop.f32.mrf.mxu0  ;;  %v3664_v33 = vpop.f32.mrf.mxu3 }
 0x204   : > { %v3744_v56 = vadd.f32 %v3664_v33, %v3090_v30  ;;  %v3908_v30 = vrot.slane %v6520_v24, 5  ;;  %v3416_v33 = vrot.slane %v3414_v29, 5 }
 0x206   : > { %5090 = vmatmul.msk.bf16.gmra.mxu0 %vm749_vm3, %v3994_v53  ;;  %v4142_v25 = vadd.f32 %v4062_v31, %v3744_v56  ;;  %v6569_v53 = vrot.slane %v3420_v34, 5  ;;  %v4852_v31 = vrot.slane %v4836_v35, 9  ;;  %v2604_v56 = vrot.slane %v5243_v18, 5 }
 0x207   : > { %v3012_v32 = vpop.f32.mrf.mxu2  ;;  %v3597_v34 = vpack.c.b16 %v3575_v1, %v3574_v40  ;;  %v3417_v28 = vor.u32 %v3416_v33, %v3413_v7  ;;  %v5017_v33 = vld [vmem:[%s5422_s29 + $0x9c] sm:$0xf] }
 0x208   : > { %v3091_v60 = vadd.f32 %v3012_v32, %v2804_v55  ;;  %v4178_v16 = vadd.f32 %v6556_v9, %v4142_v25  ;;  %4868 = vmatmul.msk.bf16.gmra.mxu1 %vm749_vm3, %v2660_v48  ;;  %v3909_v48 = vsel %vm5600_vm7, %v3907_v22, %v3908_v30  ;;  %v6579_v55 = vpop.f32.mrf.mxu1  ;;  %v2602_v25 = vsel %vm5600_vm7, %v4852_v31, %v2601_v26  ;;  %v6940_v32 = vld [vmem:[#allocation9_spill] sm:$0xff] }
 0x209   : > { %v2605_v35 = vsel %vm5600_vm7, %v2603_v42, %v2604_v56  ;;  %v3427_v27 = vor.u32 %v3426_v4, %v6569_v53  ;;  %v2805_v22 = vadd.f32 %v6399_v15, %v6940_v32  ;;  %v2643_v7 = vunpack.c.l.b16 %v2602_v25  ;;  %v6594_v31 = vld [vmem:[%s5422_s29 + $0xa0] sm:$0xf] }
 0x20a   : > { %v4210_v43 = vmax.f32 %v4178_v16, 0.0  ;;  %v3973_v16 = vunpack.c.l.b16 %v3909_v48  ;;  %v3418_v42 = vrot.slane %v3417_v28, 4  ;;  %v3432_v56 = vrot.slane %v3430_v41, 5 }
 0x20b   : > { %v4064_v8 = vpop.f32.mrf.mxu0  ;;  %v3666_v24 = vpop.f32.mrf.mxu3  ;;  %v3428_v18 = vrot.slane %v3427_v27, 4  ;;  %v2806_v15 = vadd.f32 %v6429_v50, %v5937_v49  ;;  %v3438_v25 = vshll.u32 %v5017_v33, 16  ;;  %v3448_v32 = vshrl.u32 %v6594_v31, 16 }
 0x20c   : > { %v3745_v29 = vadd.f32 %v3666_v24, %v3091_v60  ;;  %4242 = vxpose.xlu0.b32.start [1/16] (narrow) %v4210_v43, 8  ;;  %4977 = vmatmul.msk.bf16.gmra.mxu2 %vm749_vm3, %v5143_v39  ;;  %v3972_v60 = vunpack.c.l.b16 %v3906_v14  ;;  %v2644_v39 = vunpack.c.l.b16 %v2605_v35  ;;  %v3912_v24 = vrot.slane %v6541_v61, 5 }
 0x20d   : > { %v3444_v35 = vshll.u32 %v6594_v31, 16  ;;  %v4309_v28 = vsel %vm4308_vm8, %v4210_v43, 0.0  ;;  %v3423_v61 = vsel %vm5434_vm4, %v3418_v42, %v6569_v53 }
 0x20e   : > { %v4143_v30 = vadd.f32 %v4064_v8, %v3745_v29  ;;  %v3995_v8 = vpack.c.b16 %v3973_v16, %v3972_v60  ;;  %v5059_v29 = vld [vmem:[%s5422_s29 + $0x90] sm:$0xe]  ;;  %v2661_v50 = vpack.c.b16 %v2644_v39, %v2643_v7  ;;  %v4837_v7 = vld [vmem:[%s5422_s29 + $0xc0] sm:$0xe] }
 0x20f   : > { %v3015_v40 = vpop.f32.mrf.mxu2  ;;  %v6615_v42 = vrot.slane %v3444_v35, 5 }
 0x210   : > { %5042 = vmatmul.msk.bf16.gmra.mxu3 %vm749_vm3, %v3597_v34  ;;  %v3092_v1 = vadd.f32 %v3015_v40, %v2805_v22  ;;  %v4179_v26 = vadd.f32 %v6556_v9, %v4143_v30  ;;  %v3435_v34 = vshrl.u32 %v5017_v33, 16  ;;  %v3433_v22 = vsel %vm5434_vm4, %v3428_v18, %v3432_v56  ;;  %v5244_v30 = vld [vmem:[%s5422_s29 + $0xc4] sm:$0xf]  ;;  %v6610_v16 = vpop.f32.mrf.mxu1 }
 0x211   : > { %v2608_v60 = vrot.slane %v5244_v30, 5  ;;  %v5075_v40 = vrot.slane %v5059_v29, 9  ;;  %v3440_v33 = vrot.slane %v3438_v25, 5  ;;  %v3450_v18 = vrot.slane %v3448_v32, 4  ;;  %v6621_v29 = vld [vmem:[%s5422_s29 + $0xa4] sm:$0x1] }
 0x212   : > { %v4211_v4 = vmax.f32 %v4179_v26, 0.0  ;;  %v3915_v26 = vrot.slane %v6573_v0, 5  ;;  %v3437_v53 = vrot.slane %v3435_v34, 4 }
 0x213   : > { %v4067_v14 = vpop.f32.mrf.mxu0  ;;  %v3669_v48 = vpop.f32.mrf.mxu3  ;;  %v2610_v0 = vrot.slane %v2608_v60, 4  ;;  %v3913_v34 = vsel %vm5600_vm7, %v5075_v40, %v3912_v24 }
 0x214   : > { %v3746_v27 = vadd.f32 %v3669_v48, %v3092_v1  ;;  %4243 = vxpose.xlu0.b32.cont [2/16] (narrow) %v4211_v4, 8  ;;  %v4310_v49 = vsel %vm4308_vm8, %v4211_v4, 0.0  ;;  %v3914_v1 = vrot.slane %v3912_v24, 4  ;;  %v3577_v48 = vunpack.c.l.b16 %v3433_v22 }
 0x215   : > { %v4311_v41 = vadd.f32 %v4310_v49, %v4309_v28  ;;  %v4853_v28 = vrot.slane %v4837_v7, 9  ;;  %v3441_v32 = vor.u32 %v3440_v33, %v3437_v53  ;;  %v3974_v53 = vunpack.c.l.b16 %v3913_v34 }
 0x216   : > { %5091 = vmatmul.msk.bf16.gmra.mxu0 %vm749_vm3, %v3995_v8  ;;  %v4144_v43 = vadd.f32 %v4067_v14, %v3746_v27  ;;  %v5144_v8 = vld [vmem:[%s5422_s29 + $0x90] sm:$0xff]  ;;  %v3576_v14 = vunpack.c.l.b16 %v3423_v61  ;;  %v5245_v27 = vld [vmem:[%s5422_s29 + $0xc8] sm:$0x1]  ;;  %v3454_v61 = vshll.u32 %v6621_v29, 16 }
 0x217   : > { %v3017_v39 = vpop.f32.mrf.mxu2  ;;  %v2611_v49 = vrot.slane %v5245_v27, 5  ;;  %v2609_v24 = vsel %vm5600_vm7, %v4853_v28, %v2608_v60  ;;  %v6644_v27 = vld [vmem:[%s5422_s29 + $0xac] sm:$0xf] }
 0x218   : > { %v3093_v56 = vadd.f32 %v3017_v39, %v2806_v15  ;;  %v4180_v4 = vadd.f32 %v6556_v9, %v4144_v43  ;;  %4869 = vmatmul.msk.bf16.gmra.mxu1 %vm749_vm3, %v2661_v50  ;;  %v3916_v15 = vsel %vm5600_vm7, %v3914_v1, %v3915_v26  ;;  %v3451_v50 = vor.u32 %v3450_v18, %v6615_v42 }
 0x219   : > { %v3598_v7 = vpack.c.b16 %v3577_v48, %v3576_v14  ;;  %v2612_v40 = vsel %vm5600_vm7, %v2610_v0, %v2611_v49  ;;  %v2807_v1 = vadd.f32 %v6456_v20, %v5955_v54  ;;  %v3975_v33 = vunpack.c.l.b16 %v3916_v15  ;;  %v6638_v14 = vpop.f32.mrf.mxu1  ;;  %v5020_v0 = vld [vmem:[%s5422_s29 + $0xa8] sm:$0xf] }
 0x21a   : > { %v4212_v30 = vmax.f32 %v4180_v4, 0.0  ;;  %v3452_v4 = vrot.slane %v3451_v50, 4  ;;  %v2645_v48 = vunpack.c.l.b16 %v2609_v24  ;;  %v2646_v28 = vunpack.c.l.b16 %v2612_v40 }
 0x21b   : > { %v4069_v25 = vpop.f32.mrf.mxu0  ;;  %v3671_v35 = vpop.f32.mrf.mxu3  ;;  %v3996_v54 = vpack.c.b16 %v3975_v33, %v3974_v53  ;;  %v3468_v24 = vshll.u32 %v6644_v27, 16  ;;  %v3472_v40 = vshrl.u32 %v6644_v27, 16 }
 0x21c   : > { %v3747_v22 = vadd.f32 %v3671_v35, %v3093_v56  ;;  %4244 = vxpose.xlu0.b32.cont [3/16] (narrow) %v4212_v30, 8  ;;  %v4312_v43 = vsel %vm4308_vm8, %v4212_v30, 0.0  ;;  %4978 = vmatmul.msk.bf16.gmra.mxu2 %vm749_vm3, %v5144_v8  ;;  %v3442_v56 = vrot.slane %v3441_v32, 4  ;;  %v3456_v8 = vrot.slane %v3454_v61, 5  ;;  %v5060_v61 = vld [vmem:[%s5422_s29 + $0x9c] sm:$0xe] }
 0x21d   : > { %v4313_v39 = vadd.f32 %v4312_v43, %v4311_v41  ;;  %v3919_v35 = vrot.slane %v6594_v31, 5  ;;  %v2662_v50 = vpack.c.b16 %v2646_v28, %v2645_v48  ;;  %v5076_v53 = vrot.slane %v5060_v61, 9 }
 0x21e   : > { %v4145_v26 = vadd.f32 %v4069_v25, %v3747_v22  ;;  %v3447_v34 = vsel %vm5434_vm4, %v3442_v56, %v6615_v42  ;;  %v3457_v25 = vsel %vm5434_vm4, %v3452_v4, %v3456_v8  ;;  %v3459_v22 = vshrl.u32 %v5020_v0, 16  ;;  %v6941_v42 = vld [vmem:[#allocation10_spill] sm:$0xff]  ;;  %v5145_v4 = vld [vmem:[%s5422_s29 + $0x9c] sm:$0xff] }
 0x21f   : > { %v3020_v18 = vpop.f32.mrf.mxu2  ;;  %v3921_v33 = vrot.slane %v3919_v35, 4  ;;  %v3578_v8 = vunpack.c.l.b16 %v3447_v34  ;;  %v3474_v28 = vrot.slane %v3472_v40, 4 }
 0x220   : > { %5043 = vmatmul.msk.bf16.gmra.mxu3 %vm749_vm3, %v3598_v7  ;;  %v3094_v41 = vadd.f32 %v3020_v18, %v2807_v1  ;;  %v4181_v60 = vadd.f32 %v6556_v9, %v4145_v26  ;;  %v3462_v7 = vshll.u32 %v5020_v0, 16  ;;  %v2808_v1 = vadd.f32 %v6489_v37, %v6941_v42 }
 0x221   : > { %v3922_v18 = vrot.slane %v6621_v29, 5  ;;  %v3470_v37 = vrot.slane %v3468_v24, 5  ;;  %v6663_v0 = vpop.f32.mrf.mxu1  ;;  %v3920_v29 = vsel %vm5600_vm7, %v5076_v53, %v3919_v35  ;;  %v6942_v24 = vld [vmem:[#allocation11_spill] sm:$0xff] }
 0x222   : > { %v4213_v20 = vmax.f32 %v4181_v60, 0.0  ;;  %v3461_v60 = vrot.slane %v3459_v22, 4  ;;  %v3464_v48 = vrot.slane %v3462_v7, 5  ;;  %v2809_v35 = vadd.f32 %v6515_v47, %v6942_v24 }
 0x223   : > { %v4072_v49 = vpop.f32.mrf.mxu0  ;;  %v3674_v30 = vpop.f32.mrf.mxu3  ;;  %v3475_v22 = vor.u32 %v3474_v28, %v3470_v37  ;;  %v3976_v42 = vunpack.c.l.b16 %v3920_v29  ;;  %v3926_v47 = vrot.slane %v6644_v27, 5 }
 0x224   : > { %v3748_v15 = vadd.f32 %v3674_v30, %v3094_v41  ;;  %4245 = vxpose.xlu0.b32.cont [4/16] (narrow) %v4213_v20, 8  ;;  %v4314_v32 = vsel %vm4308_vm8, %v4213_v20, 0.0  ;;  %v3579_v41 = vunpack.c.l.b16 %v3457_v25  ;;  %v6666_v20 = vld [vmem:[%s5422_s29 + $0xb0] sm:$0x1]  ;;  %v3465_v61 = vor.u32 %v3464_v48, %v3461_v60  ;;  %v5061_v48 = vld [vmem:[%s5422_s29 + $0xa8] sm:$0xe] }
 0x225   : > { %v4315_v43 = vadd.f32 %v4314_v32, %v4313_v39  ;;  %v3478_v7 = vshll.u32 %v6666_v20, 16  ;;  %v3928_v24 = vrot.slane %v3926_v47, 4 }
 0x226   : > { %5092 = vmatmul.msk.bf16.gmra.mxu0 %vm749_vm3, %v3996_v54  ;;  %v4146_v31 = vadd.f32 %v4072_v49, %v3748_v15  ;;  %v3923_v15 = vsel %vm5600_vm7, %v3921_v33, %v3922_v18  ;;  %v3599_v25 = vpack.c.b16 %v3579_v41, %v3578_v8  ;;  %v5023_v33 = vld [vmem:[%s5422_s29 + $0xb4] sm:$0xf]  ;;  %v6681_v18 = vld [vmem:[%s5422_s29 + $0xb8] sm:$0xf] }
 0x227   : > { %v3022_v26 = vpop.f32.mrf.mxu2  ;;  %v3483_v28 = vshrl.u32 %v5023_v33, 16 }
 0x228   : > { %v3095_v56 = vadd.f32 %v3022_v26, %v2808_v1  ;;  %v4182_v39 = vadd.f32 %v6556_v9, %v4146_v31  ;;  %4870 = vmatmul.msk.bf16.gmra.mxu1 %vm749_vm3, %v2662_v50  ;;  %v3977_v1 = vunpack.c.l.b16 %v3923_v15 }
 0x229   : > { %v6687_v29 = vpop.f32.mrf.mxu1 }
 0x22a   : > { %v4214_v54 = vmax.f32 %v4182_v39, 0.0  ;;  %v3480_v39 = vrot.slane %v3478_v7, 5  ;;  %v5077_v7 = vrot.slane %v5061_v48, 9 }
 0x22b   : > { %v4074_v49 = vpop.f32.mrf.mxu0  ;;  %v3676_v30 = vpop.f32.mrf.mxu3 }
 0x22c   : > { %v3749_v32 = vadd.f32 %v3676_v30, %v3095_v56  ;;  %4246 = vxpose.xlu0.b32.cont [5/16] (narrow) %v4214_v54, 8  ;;  %v4316_v34 = vsel %vm4308_vm8, %v4214_v54, 0.0  ;;  %4979 = vmatmul.msk.bf16.gmra.mxu2 %vm749_vm3, %v5145_v4  ;;  %v3476_v56 = vrot.slane %v3475_v22, 4  ;;  %v3997_v4 = vpack.c.b16 %v3977_v1, %v3976_v42 }
 0x22d   : > { %v4317_v50 = vadd.f32 %v4316_v34, %v4315_v43  ;;  %v3466_v43 = vrot.slane %v3465_v61, 4  ;;  %v3486_v54 = vshll.u32 %v5023_v33, 16  ;;  %v3496_v30 = vshrl.u32 %v6681_v18, 16  ;;  %v6701_v33 = vld [vmem:[%s5422_s29 + $0xbc] sm:$0x1] }
 0x22e   : > { %v4147_v40 = vadd.f32 %v4074_v49, %v3749_v32  ;;  %v3492_v49 = vshll.u32 %v6681_v18, 16  ;;  %v2810_v34 = vadd.f32 %v6543_v52, %v6016_v57  ;;  %v3481_v61 = vsel %vm5434_vm4, %v3476_v56, %v3480_v39 }
 0x22f   : > { %v3025_v31 = vpop.f32.mrf.mxu2  ;;  %v3485_v42 = vrot.slane %v3483_v28, 4  ;;  %v3488_v1 = vrot.slane %v3486_v54, 5  ;;  %v3498_v52 = vrot.slane %v3496_v30, 4  ;;  %v3927_v56 = vsel %vm5600_vm7, %v5077_v7, %v3926_v47  ;;  %v6943_v47 = vld [vmem:[#allocation12_spill] sm:$0xff] }
 0x230   : > { %5044 = vmatmul.msk.bf16.gmra.mxu3 %vm749_vm3, %v3599_v25  ;;  %v3096_v26 = vadd.f32 %v3025_v31, %v2809_v35  ;;  %v4183_v53 = vadd.f32 %v6556_v9, %v4147_v40  ;;  %v3471_v25 = vsel %vm5434_vm4, %v3466_v43, %v3470_v37  ;;  %v3929_v35 = vrot.slane %v6666_v20, 5  ;;  %v5146_v37 = vld [vmem:[%s5422_s29 + $0xa8] sm:$0xff] }
 0x231   : > { %v3494_v57 = vrot.slane %v3492_v49, 5  ;;  %v2811_v30 = vadd.f32 %v6579_v55, %v6943_v47 }
 0x232   : > { %v4215_v8 = vmax.f32 %v4183_v53, 0.0  ;;  %v3581_v53 = vunpack.c.l.b16 %v3481_v61  ;;  %v3930_v20 = vsel %vm5600_vm7, %v3928_v24, %v3929_v35 }
 0x233   : > { %v4077_v41 = vpop.f32.mrf.mxu0  ;;  %v3679_v60 = vpop.f32.mrf.mxu3 }
 0x234   : > { %v3750_v15 = vadd.f32 %v3679_v60, %v3096_v26  ;;  %4247 = vxpose.xlu0.b32.cont [6/16] (narrow) %v4215_v8, 8  ;;  %v4318_v32 = vsel %vm4308_vm8, %v4215_v8, 0.0  ;;  %v3580_v26 = vunpack.c.l.b16 %v3471_v25  ;;  %v3489_v8 = vor.u32 %v3488_v1, %v3485_v42  ;;  %v5026_v42 = vld [vmem:[%s5422_s29 + $0xc0] sm:$0xf] }
 0x235   : > { %v4319_v27 = vadd.f32 %v4318_v32, %v4317_v50  ;;  %v3502_v60 = vshll.u32 %v6701_v33, 16  ;;  %v3979_v25 = vunpack.c.l.b16 %v3930_v20 }
 0x236   : > { %5093 = vmatmul.msk.bf16.gmra.mxu0 %vm749_vm3, %v3997_v4  ;;  %v4148_v22 = vadd.f32 %v4077_v41, %v3750_v15  ;;  %v3499_v41 = vor.u32 %v3498_v52, %v3494_v57  ;;  %v3600_v54 = vpack.c.b16 %v3581_v53, %v3580_v26  ;;  %v6712_v15 = vpop.f32.mrf.mxu1  ;;  %v3933_v52 = vrot.slane %v6681_v18, 5  ;;  %v5062_v53 = vld [vmem:[%s5422_s29 + $0xb4] sm:$0xe] }
 0x237   : > { %v3027_v40 = vpop.f32.mrf.mxu2  ;;  %v3504_v24 = vrot.slane %v3502_v60, 5  ;;  %v2812_v18 = vadd.f32 %v6610_v16, %v6053_v13  ;;  %v5147_v13 = vld [vmem:[%s5422_s29 + $0xb4] sm:$0xff] }
 0x238   : > { %v3097_v50 = vadd.f32 %v3027_v40, %v2810_v34  ;;  %v4184_v31 = vadd.f32 %v6556_v9, %v4148_v22  ;;  %v3978_v34 = vunpack.c.l.b16 %v3927_v56  ;;  %v3490_v22 = vrot.slane %v3489_v8, 4 }
 0x239   : > { %v3500_v7 = vrot.slane %v3499_v41, 4  ;;  %v3510_v56 = vshll.u32 %v5026_v42, 16 }
 0x23a   : > { %v4216_v43 = vmax.f32 %v4184_v31, 0.0  ;;  %v3998_v1 = vpack.c.b16 %v3979_v25, %v3978_v34 }
 0x23b   : > { %v4079_v39 = vpop.f32.mrf.mxu0  ;;  %v3681_v4 = vpop.f32.mrf.mxu3  ;;  %v3505_v26 = vsel %vm5434_vm4, %v3500_v7, %v3504_v24  ;;  %v3512_v34 = vrot.slane %v3510_v56, 5  ;;  %v6738_v7 = vld [vmem:[%s5422_s29 + $0xc8] sm:$0x1] }
 0x23c   : > { %v3751_v48 = vadd.f32 %v3681_v4, %v3097_v50  ;;  %4248 = vxpose.xlu0.b32.cont [7/16] (narrow) %v4216_v43, 8  ;;  %v4320_v28 = vsel %vm4308_vm8, %v4216_v43, 0.0  ;;  %4980 = vmatmul.msk.bf16.gmra.mxu2 %vm749_vm3, %v5146_v37  ;;  %v3495_v37 = vsel %vm5434_vm4, %v3490_v22, %v3494_v57  ;;  %v3507_v43 = vshrl.u32 %v5026_v42, 16 }
 0x23d   : > { %v4321_v49 = vadd.f32 %v4320_v28, %v4319_v27  ;;  %v6718_v27 = vld [vmem:[%s5422_s29 + $0xc4] sm:$0xf]  ;;  %v3582_v60 = vunpack.c.l.b16 %v3495_v37  ;;  %v3936_v28 = vrot.slane %v6701_v33, 5  ;;  %v3583_v47 = vunpack.c.l.b16 %v3505_v26 }
 0x23e   : > { %v4149_v32 = vadd.f32 %v4079_v39, %v3751_v48  ;;  %v3516_v20 = vshll.u32 %v6718_v27, 16  ;;  %v3520_v8 = vshrl.u32 %v6718_v27, 16  ;;  %v5078_v48 = vrot.slane %v5062_v53, 9  ;;  %v6733_v25 = vpop.f32.mrf.mxu1 }
 0x23f   : > { %v3030_v61 = vpop.f32.mrf.mxu2  ;;  %v3601_v42 = vpack.c.b16 %v3583_v47, %v3582_v60  ;;  %v3526_v26 = vshll.u32 %v6738_v7, 16  ;;  %v6755_v47 = vld [vmem:[%s5422_s29 + $0xd0] sm:$0xf] }
 0x240   : > { %5045 = vmatmul.msk.bf16.gmra.mxu3 %vm749_vm3, %v3600_v54  ;;  %v3098_v35 = vadd.f32 %v3030_v61, %v2811_v30  ;;  %v4185_v40 = vadd.f32 %v6556_v9, %v4149_v32  ;;  %v3935_v30 = vrot.slane %v3933_v52, 4  ;;  %v3509_v32 = vrot.slane %v3507_v43, 4 }
 0x241   : > { %v3518_v16 = vrot.slane %v3516_v20, 5  ;;  %v3934_v33 = vsel %vm5600_vm7, %v5078_v48, %v3933_v52  ;;  %v2813_v43 = vadd.f32 %v6638_v14, %v6062_v58  ;;  %v3528_v60 = vrot.slane %v3526_v26, 5  ;;  %v5029_v48 = vld [vmem:[%s5422_s29 + $0xcc] sm:$0xf] }
 0x242   : > { %v4217_v55 = vmax.f32 %v4185_v40, 0.0  ;;  %v3980_v56 = vunpack.c.l.b16 %v3934_v33  ;;  %v6944_v33 = vld [vmem:[#allocation13_spill] sm:$0xff] }
 0x243   : > { %v4082_v50 = vpop.f32.mrf.mxu0  ;;  %v3684_v31 = vpop.f32.mrf.mxu3 }
 0x244   : > { %v3752_v39 = vadd.f32 %v3684_v31, %v3098_v35  ;;  %4249 = vxpose.xlu0.b32.cont [8/16] (narrow) %v4217_v55, 8  ;;  %v4322_v4 = vsel %vm4308_vm8, %v4217_v55, 0.0  ;;  %v3513_v55 = vor.u32 %v3512_v34, %v3509_v32  ;;  %v3940_v32 = vrot.slane %v6718_v27, 5 }
 0x245   : > { %v4323_v41 = vadd.f32 %v4322_v4, %v4321_v49  ;;  %v3522_v49 = vrot.slane %v3520_v8, 4 }
 0x246   : > { %5094 = vmatmul.msk.bf16.gmra.mxu0 %vm749_vm3, %v3998_v1  ;;  %v4150_v57 = vadd.f32 %v4082_v50, %v3752_v39  ;;  %v3937_v1 = vsel %vm5600_vm7, %v3935_v30, %v3936_v28  ;;  %v3514_v20 = vrot.slane %v3513_v55, 4  ;;  %v6752_v28 = vpop.f32.mrf.mxu1 }
 0x247   : > { %v3032_v54 = vpop.f32.mrf.mxu2  ;;  %v3523_v37 = vor.u32 %v3522_v49, %v3518_v16  ;;  %v3981_v39 = vunpack.c.l.b16 %v3937_v1  ;;  %v3531_v49 = vshrl.u32 %v5029_v48, 16 }
 0x248   : > { %v3099_v61 = vadd.f32 %v3032_v54, %v2812_v18  ;;  %v4186_v22 = vadd.f32 %v6556_v9, %v4150_v57  ;;  %v3519_v30 = vsel %vm5434_vm4, %v3514_v20, %v3518_v16  ;;  %v2814_v16 = vadd.f32 %v6663_v0, %v6944_v33 }
 0x249   : > { %v3524_v57 = vrot.slane %v3523_v37, 4 }
 0x24a   : > { %v4218_v24 = vmax.f32 %v4186_v22, 0.0 }
 0x24b   : > { %v4084_v35 = vpop.f32.mrf.mxu0  ;;  %v3686_v40 = vpop.f32.mrf.mxu3  ;;  %v3529_v22 = vsel %vm5434_vm4, %v3524_v57, %v3528_v60 }
 0x24c   : > { %v3753_v50 = vadd.f32 %v3686_v40, %v3099_v61  ;;  %4250 = vxpose.xlu0.b32.cont [9/16] (narrow) %v4218_v24, 8  ;;  %v4324_v31 = vsel %vm4308_vm8, %v4218_v24, 0.0  ;;  %4981 = vmatmul.msk.bf16.gmra.mxu2 %vm749_vm3, %v5147_v13  ;;  %v5063_v13 = vld [vmem:[%s5422_s29 + $0xc0] sm:$0xe]  ;;  %v3540_v40 = vshll.u32 %v6755_v47, 16 }
 0x24d   : > { %v4325_v53 = vadd.f32 %v4324_v31, %v4323_v41  ;;  %v3999_v41 = vpack.c.b16 %v3981_v39, %v3980_v56  ;;  %v5079_v55 = vrot.slane %v5063_v13, 9  ;;  %v3943_v31 = vrot.slane %v6738_v7, 5 }
 0x24e   : > { %v4151_v52 = vadd.f32 %v4084_v35, %v3753_v50  ;;  %v3534_v35 = vshll.u32 %v5029_v48, 16  ;;  %v3942_v50 = vrot.slane %v3940_v32, 4  ;;  %v3533_v56 = vrot.slane %v3531_v49, 4  ;;  %v6777_v48 = vpop.f32.mrf.mxu1 }
 0x24f   : > { %v3035_v4 = vpop.f32.mrf.mxu2  ;;  %v3941_v60 = vsel %vm5600_vm7, %v5079_v55, %v3940_v32 }
 0x250   : > { %5046 = vmatmul.msk.bf16.gmra.mxu3 %vm749_vm3, %v3601_v42  ;;  %v3100_v8 = vadd.f32 %v3035_v4, %v2813_v43  ;;  %v4187_v18 = vadd.f32 %v6556_v9, %v4151_v52  ;;  %v3544_v42 = vshrl.u32 %v6755_v47, 16  ;;  %v3584_v43 = vunpack.c.l.b16 %v3519_v30 }
 0x251   : > { %v3585_v52 = vunpack.c.l.b16 %v3529_v22  ;;  %v3536_v39 = vrot.slane %v3534_v35, 5  ;;  %v3542_v4 = vrot.slane %v3540_v40, 5  ;;  %v3944_v7 = vsel %vm5600_vm7, %v3942_v50, %v3943_v31  ;;  %v6945_v22 = vld [vmem:[#allocation14_spill] sm:$0xff] }
 0x252   : > { %v4219_v54 = vmax.f32 %v4187_v18, 0.0  ;;  %v3546_v20 = vrot.slane %v3544_v42, 4  ;;  %v2815_v13 = vadd.f32 %v6687_v29, %v6945_v22  ;;  %v3982_v49 = vunpack.c.l.b16 %v3941_v60 }
 0x253   : > { %v4087_v58 = vpop.f32.mrf.mxu0  ;;  %v3689_v14 = vpop.f32.mrf.mxu3  ;;  %v3537_v30 = vor.u32 %v3536_v39, %v3533_v56  ;;  %v3983_v35 = vunpack.c.l.b16 %v3944_v7  ;;  %v2816_v39 = vadd.f32 %v6712_v15, %v6128_v3 }
 0x254   : > { %v3754_v34 = vadd.f32 %v3689_v14, %v3100_v8  ;;  %4251 = vxpose.xlu0.b32.cont [10/16] (narrow) %v4219_v54, 8  ;;  %v4326_v61 = vsel %vm4308_vm8, %v4219_v54, 0.0  ;;  %v5031_v8 = vld [vmem:[%s5422_s29 + $0xd4] sm:$0x1] }
 0x255   : > { %v4327_v24 = vadd.f32 %v4326_v61, %v4325_v53  ;;  %v5148_v53 = vld [vmem:[%s5422_s29 + $0xc0] sm:$0xff]  ;;  %v3550_v61 = vshll.u32 %v5031_v8, 16  ;;  %v3950_v60 = vrot.slane %v5031_v8, 5 }
 0x256   : > { %5095 = vmatmul.msk.bf16.gmra.mxu0 %vm749_vm3, %v3999_v41  ;;  %v4152_v27 = vadd.f32 %v4087_v58, %v3754_v34  ;;  %v3602_v58 = vpack.c.b16 %v3585_v52, %v3584_v43  ;;  %v3547_v34 = vor.u32 %v3546_v20, %v3542_v4  ;;  %v6794_v20 = vpop.f32.mrf.mxu1 }
 0x257   : > { %v3037_v1 = vpop.f32.mrf.mxu2 }
 0x258   : > { %v3101_v37 = vadd.f32 %v3037_v1, %v2814_v16  ;;  %v4188_v26 = vadd.f32 %v6556_v9, %v4152_v27  ;;  %v3538_v16 = vrot.slane %v3537_v30, 4  ;;  %v3548_v27 = vrot.slane %v3547_v34, 4 }
 0x259   : > { %v3552_v1 = vrot.slane %v3550_v61, 5 }
 0x25a   : > { %v4220_v0 = vmax.f32 %v4188_v26, 0.0  ;;  %v3543_v52 = vsel %vm5434_vm4, %v3538_v16, %v3542_v4 }
 0x25b   : > { %v4089_v18 = vpop.f32.mrf.mxu0  ;;  %v3691_v57 = vpop.f32.mrf.mxu3  ;;  %v3553_v56 = vsel %vm5434_vm4, %v3548_v27, %v3552_v1  ;;  %v3586_v4 = vunpack.c.l.b16 %v3543_v52 }
 0x25c   : > { %v3755_v41 = vadd.f32 %v3691_v57, %v3101_v37  ;;  %v4328_v54 = vsel %vm4308_vm8, %v4220_v0, 0.0  ;;  %4252 = vxpose.xlu0.b32.cont [11/16] (narrow) %v4220_v0, 8  ;;  %4982 = vmatmul.msk.bf16.gmra.mxu2 %vm749_vm3, %v5148_v53  ;;  %v3947_v37 = vrot.slane %v6755_v47, 5  ;;  %v5064_v53 = vld [vmem:[%s5422_s29 + $0xcc] sm:$0xe] }
 0x25d   : > { %v4329_v14 = vadd.f32 %v4328_v54, %v4327_v24  ;;  %v4000_v24 = vpack.c.b16 %v3983_v35, %v3982_v49  ;;  %v5149_v54 = vld [vmem:[%s5422_s29 + $0xcc] sm:$0xff]  ;;  %s5261_s29 = sshra.s32 %s4428_s26, 4  ;;  %s5262_s29 = int_to_ptr.hbm [resolvable:$true] %s5261_s29 }
 0x25e   : > { %v4153_v32 = vadd.f32 %v4089_v18, %v3755_v41  ;;  %v5080_v18 = vrot.slane %v5064_v53, 9  ;;  %v3949_v57 = vrot.slane %v3947_v37, 4  ;;  %s5263_s9 = scalar_lea.hbm %s5262_s29, 1  ;;  %p5268_p0 = scmp.lt.s32.totalorder %s5262_s29, %s6918_s6 }
 0x25f   : > { %v3040_v40 = vpop.f32.mrf.mxu2  ;;  %p5264_p11 = scmp.ne.s32.totalorder %s5262_s29, %s5263_s9  ;;  %p5269_p1 = scmp.lt.s32.totalorder %s5267_s11, %s5263_s9 }
 0x260   : > { %5047 = vmatmul.msk.bf16.gmra.mxu3 %vm749_vm3, %v3602_v58  ;;  %v3102_v42 = vadd.f32 %v3040_v40, %v2815_v13  ;;  %v4189_v33 = vadd.f32 %v6556_v9, %v4153_v32  ;;  %v3587_v58 = vunpack.c.l.b16 %v3553_v56  ;;  %v3948_v3 = vsel %vm5600_vm7, %v5080_v18, %v3947_v37 }
 0x261   : > { %v3951_v15 = vsel %vm5600_vm7, %v3949_v57, %v3950_v60  ;;  %v2817_v13 = vadd.f32 %v6733_v25, %v6150_v19  ;;  %v3984_v49 = vunpack.c.l.b16 %v3948_v3  ;;  %v2818_v19 = vadd.f32 %v6752_v28, %v6173_v46  ;;  %p5265_p12 = pnand %p5264_p11, %p5384_p5  ;;  %p5270_p2 = por %p5269_p1, %p5268_p0 }
 0x262   : > { %v4221_v55 = vmax.f32 %v4189_v33, 0.0  ;;  %v3603_v8 = vpack.c.b16 %v3587_v58, %v3586_v4  ;;  %v3985_v35 = vunpack.c.l.b16 %v3951_v15  ;;  %v2819_v18 = vadd.f32 %v6777_v48, %v6196_v45 }
 0x263   : > { %v4092_v50 = vpop.f32.mrf.mxu0  ;;  %v3694_v31 = vpop.f32.mrf.mxu3  ;;  %p5266_p13 = pneg %p5265_p12 }
 0x264   : > { %v3756_v29 = vadd.f32 %v3694_v31, %v3102_v42  ;;  %v4330_v26 = vsel %vm4308_vm8, %v4221_v55, 0.0  ;;  %4253 = vxpose.xlu0.b32.cont [12/16] (narrow) %v4221_v55, 8  ;;  %v2768_v42 = vpop.f32.mrf.mxu1  ;;  %v4001_v16 = vpack.c.b16 %v3985_v35, %v3984_v49 }
 0x265   : > { %v4331_v43 = vadd.f32 %v4330_v26, %v4329_v14  ;;  %v2821_v49 = vadd.f32 %v2768_v42, %v6241_v62  ;;  %p5271_p3 = pnand %p5270_p2, %p5266_p13 }
 0x266   : > { %5096 = vmatmul.msk.bf16.gmra.mxu0 %vm749_vm3, %v4000_v24  ;;  %v4154_v47 = vadd.f32 %v4092_v50, %v3756_v29 }
 0x267   : > { %v3042_v0 = vpop.f32.mrf.mxu2 }
 0x268   : > { %v3103_v7 = vadd.f32 %v3042_v0, %v2816_v39  ;;  %v4190_v41 = vadd.f32 %v6556_v9, %v4154_v47 }
 0x26a   : > { %v4222_v36 = vmax.f32 %v4190_v41, 0.0 }
 0x26b   : > { %v4094_v14 = vpop.f32.mrf.mxu0  ;;  %v3696_v30 = vpop.f32.mrf.mxu3 }
 0x26c   : > { %v3757_v34 = vadd.f32 %v3696_v30, %v3103_v7  ;;  %v4332_v61 = vsel %vm4308_vm8, %v4222_v36, 0.0  ;;  %4254 = vxpose.xlu0.b32.cont [13/16] (narrow) %v4222_v36, 8  ;;  %4983 = vmatmul.msk.bf16.gmra.mxu2 %vm749_vm3, %v5149_v54  ;;  %v2770_v53 = vpop.f32.mrf.mxu1  ;;  %v2820_v30 = vadd.f32 %v6794_v20, %v6225_v11 }
 0x26d   : > { %v4333_v22 = vadd.f32 %v4332_v61, %v4331_v43 }
 0x26e   : > { %v4155_v32 = vadd.f32 %v4094_v14, %v3757_v34 }
 0x26f   : > { %v3045_v40 = vpop.f32.mrf.mxu2 }
 0x270   : > { %5048 = vmatmul.msk.bf16.gmra.mxu3 %vm749_vm3, %v3603_v8  ;;  %v3104_v5 = vadd.f32 %v3045_v40, %v2817_v13  ;;  %v4191_v33 = vadd.f32 %v6556_v9, %v4155_v32 }
 0x272   : > { %v4223_v27 = vmax.f32 %v4191_v33, 0.0 }
 0x273   : > { %v4097_v1 = vpop.f32.mrf.mxu0  ;;  %v3699_v24 = vpop.f32.mrf.mxu3 }
 0x274   : > { %v3758_v55 = vadd.f32 %v3699_v24, %v3104_v5  ;;  %v4334_v50 = vsel %vm4308_vm8, %v4223_v27, 0.0  ;;  %4255 = vxpose.xlu0.b32.cont [14/16] (narrow) %v4223_v27, 8  ;;  %v2773_v4 = vpop.f32.mrf.mxu1 }
 0x275   : > { %v4335_v31 = vadd.f32 %v4334_v50, %v4333_v22  ;;  %v2822_v50 = vadd.f32 %v2770_v53, %v6271_v38 }
 0x276   : > { %5097 = vmatmul.msk.bf16.gmra.mxu0 %vm749_vm3, %v4001_v16  ;;  %v4156_v25 = vadd.f32 %v4097_v1, %v3758_v55 }
 0x277   : > { %v3047_v37 = vpop.f32.mrf.mxu2 }
 0x278   : > { %v3105_v29 = vadd.f32 %v3047_v37, %v2818_v19  ;;  %v4192_v26 = vadd.f32 %v6556_v9, %v4156_v25 }
 0x27a   : > { %v4224_v43 = vmax.f32 %v4192_v26, 0.0 }
 0x27b   : > { %v4099_v52 = vpop.f32.mrf.mxu0  ;;  %v3701_v56 = vpop.f32.mrf.mxu3 }
 0x27c   : > { %v3759_v39 = vadd.f32 %v3701_v56, %v3105_v29  ;;  %v4336_v47 = vsel %vm4308_vm8, %v4224_v43, 0.0  ;;  %4256 = vxpose.xlu0.b32.cont [15/16] (narrow) %v4224_v43, 8  ;;  %v2775_v35 = vpop.f32.mrf.mxu1 }
 0x27d   : > { %v4337_v0 = vadd.f32 %v4336_v47, %v4335_v31 }
 0x27e   : > { %v4157_v46 = vadd.f32 %v4099_v52, %v3759_v39  ;;  %v2823_v39 = vadd.f32 %v2773_v4, %v6283_v12  ;;  %v6836_v12 = vld [vmem:[%s6914_s2] ss:$0 sm:$0xff] }
 0x27f   : > { %v3050_v28 = vpop.f32.mrf.mxu2 }
 0x280   : > { %v3106_v57 = vadd.f32 %v3050_v28, %v2819_v18  ;;  %v4193_v60 = vadd.f32 %v6556_v9, %v4157_v46 }
 0x282   : > { %v4225_v7 = vmax.f32 %v4193_v60, 0.0 }
 0x283   : > { %v4102_v41 = vpop.f32.mrf.mxu0  ;;  %v3704_v54 = vpop.f32.mrf.mxu3 }
 0x284   : > { %v3760_v58 = vadd.f32 %v3704_v54, %v3106_v57  ;;  %v4338_v36 = vsel %vm4308_vm8, %v4225_v7, 0.0  ;;  %4257 = vxpose.xlu0.b32.end [16/16] (narrow) %v4225_v7, 8  ;;  %v2778_v25 = vpop.f32.mrf.mxu1  ;;  %v2824_v54 = vadd.f32 %v2775_v35, %v6313_v6 }
 0x285   : > { %v4339_v14 = vadd.f32 %v4338_v36, %v4337_v0  ;;  %v2825_v6 = vadd.f32 %v2778_v25, %v6328_v10 }
 0x286   : > { %v4158_v3 = vadd.f32 %v4102_v41, %v3760_v58 }
 0x287   : > { %v3052_v15 = vpop.f32.mrf.mxu2 }
 0x288   : > { %v3107_v45 = vadd.f32 %v3052_v15, %v2820_v30  ;;  %v4194_v48 = vadd.f32 %v6556_v9, %v4158_v3 }
 0x28a   : > { %v4226_v34 = vmax.f32 %v4194_v48, 0.0 }
 0x28b   : > { %v4104_v61 = vpop.f32.mrf.mxu0  ;;  %v3706_v8 = vpop.f32.mrf.mxu3 }
 0x28c   : > { %v3761_v22 = vadd.f32 %v3706_v8, %v3107_v45  ;;  %4274 = vxpose.xlu1.b32.start [1/16] (narrow) %v4226_v34, 8  ;;  %v4340_v13 = vsel %vm4308_vm8, %v4226_v34, 0.0  ;;  %v2780_v53 = vpop.f32.mrf.mxu1 }
 0x28d   : > { %v4341_v32 = vadd.f32 %v4340_v13, %v4339_v14 }
 0x28e   : > { %v4159_v40 = vadd.f32 %v4104_v61, %v3761_v22 }
 0x28f   : > { %v3055_v5 = vpop.f32.mrf.mxu2 }
 0x290   : > { %v3108_v33 = vadd.f32 %v3055_v5, %v2821_v49  ;;  %v4195_v11 = vadd.f32 %v6556_v9, %v4159_v40 }
 0x292   : > { %v4227_v20 = vmax.f32 %v4195_v11, 0.0  ;;  %v2826_v11 = vadd.f32 %v2780_v53, %v6361_v2 }
 0x293   : > { %v4107_v16 = vpop.f32.mrf.mxu0  ;;  %v3709_v27 = vpop.f32.mrf.mxu3 }
 0x294   : > { %v3762_v1 = vadd.f32 %v3709_v27, %v3108_v33  ;;  %4275 = vxpose.xlu1.b32.cont [2/16] (narrow) %v4227_v20, 8  ;;  %v4342_v24 = vsel %vm4308_vm8, %v4227_v20, 0.0  ;;  %v2783_v15 = vpop.f32.mrf.mxu1 }
 0x295   : > { %v4343_v55 = vadd.f32 %v4342_v24, %v4341_v32 }
 0x296   : > { %v4160_v31 = vadd.f32 %v4107_v16, %v3762_v1 }
 0x297   : > { %v3057_v19 = vpop.f32.mrf.mxu2 }
 0x298   : > { %v3109_v62 = vadd.f32 %v3057_v19, %v2822_v50  ;;  %v4196_v42 = vadd.f32 %v6556_v9, %v4160_v31 }
 0x29a   : > { %v4228_v37 = vmax.f32 %v4196_v42, 0.0 }
 0x29b   : > { %v4109_v29 = vpop.f32.mrf.mxu0  ;;  %v3711_v26 = vpop.f32.mrf.mxu3 }
 0x29c   : > { %v3763_v43 = vadd.f32 %v3711_v26, %v3109_v62  ;;  %4276 = vxpose.xlu1.b32.cont [3/16] (narrow) %v4228_v37, 8  ;;  %v4344_v52 = vsel %vm4308_vm8, %v4228_v37, 0.0  ;;  %v2785_v20 = vpop.f32.mrf.mxu1  ;;  %v2827_v62 = vadd.f32 %v2783_v15, %v6378_v63 }
 0x29d   : > { %v4345_v56 = vadd.f32 %v4344_v52, %v4343_v55 }
 0x29e   : > { %v4161_v47 = vadd.f32 %v4109_v29, %v3763_v43 }
 0x29f   : > { %v3060_v0 = vpop.f32.mrf.mxu2 }
 0x2a0   : > { %v3110_v18 = vadd.f32 %v3060_v0, %v2823_v39  ;;  %v4197_v38 = vadd.f32 %v6556_v9, %v4161_v47 }
 0x2a2   : > { %v4229_v46 = vmax.f32 %v4197_v38, 0.0 }
 0x2a3   : > { %v4112_v28 = vpop.f32.mrf.mxu0  ;;  %v3714_v57 = vpop.f32.mrf.mxu3 }
 0x2a4   : > { %v3764_v60 = vadd.f32 %v3714_v57, %v3110_v18  ;;  %4277 = vxpose.xlu1.b32.cont [4/16] (narrow) %v4229_v46, 8  ;;  %v4346_v7 = vsel %vm4308_vm8, %v4229_v46, 0.0  ;;  %v2788_v29 = vpop.f32.mrf.mxu1  ;;  %v2828_v18 = vadd.f32 %v2785_v20, %v6408_v59 }
 0x2a5   : > { %v4347_v41 = vadd.f32 %v4346_v7, %v4345_v56 }
 0x2a6   : > { %v4162_v58 = vadd.f32 %v4112_v28, %v3764_v60 }
 0x2a7   : > { %v3062_v36 = vpop.f32.mrf.mxu2 }
 0x2a8   : > { %v3111_v14 = vadd.f32 %v3062_v36, %v2824_v54  ;;  %v4198_v9 = vadd.f32 %v6836_v12, %v4162_v58  ;;  %v2829_v36 = vadd.f32 %v2788_v29, %v6420_v51 }
 0x2aa   : > { %v4230_v4 = vmax.f32 %v4198_v9, 0.0 }
 0x2ab   : > { %v4114_v30 = vpop.f32.mrf.mxu0  ;;  %v3716_v3 = vpop.f32.mrf.mxu3 }
 0x2ac   : > { %v3765_v45 = vadd.f32 %v3716_v3, %v3111_v14  ;;  %4278 = vxpose.xlu1.b32.cont [5/16] (narrow) %v4230_v4, 8  ;;  %v4348_v48 = vsel %vm4308_vm8, %v4230_v4, 0.0  ;;  %v2790_v28 = vpop.f32.mrf.mxu1 }
 0x2ad   : > { %v4349_v34 = vadd.f32 %v4348_v48, %v4347_v41 }
 0x2ae   : > { %v4163_v61 = vadd.f32 %v4114_v30, %v3765_v45 }
 0x2af   : > { %v3065_v8 = vpop.f32.mrf.mxu2 }
 0x2b0   : > { %v3112_v22 = vadd.f32 %v3065_v8, %v2825_v6  ;;  %v4199_v13 = vadd.f32 %v6836_v12, %v4163_v61  ;;  %v2830_v61 = vadd.f32 %v2790_v28, %v6448_v17 }
 0x2b2   : > { %v4231_v32 = vmax.f32 %v4199_v13, 0.0 }
 0x2b3   : > { %v4117_v49 = vpop.f32.mrf.mxu0  ;;  %v3719_v35 = vpop.f32.mrf.mxu3 }
 0x2b4   : > { %v3766_v40 = vadd.f32 %v3719_v35, %v3112_v22  ;;  %4279 = vxpose.xlu1.b32.cont [6/16] (narrow) %v4231_v32, 8  ;;  %v4350_v5 = vsel %vm4308_vm8, %v4231_v32, 0.0  ;;  %v2793_v45 = vpop.f32.mrf.mxu1 }
 0x2b5   : > { %v4351_v33 = vadd.f32 %v4350_v5, %v4349_v34 }
 0x2b6   : > { %v4164_v16 = vadd.f32 %v4117_v49, %v3766_v40 }
 0x2b7   : > { %v3067_v27 = vpop.f32.mrf.mxu2 }
 0x2b8   : > { %v3113_v1 = vadd.f32 %v3067_v27, %v2826_v11  ;;  %v4200_v10 = vadd.f32 %v6836_v12, %v4164_v16  ;;  %v2831_v11 = vadd.f32 %v2793_v45, %v6465_v23 }
 0x2ba   : > { %v4232_v24 = vmax.f32 %v4200_v10, 0.0 }
 0x2bb   : > { %v4119_v55 = vpop.f32.mrf.mxu0  ;;  %v3721_v50 = vpop.f32.mrf.mxu3 }
 0x2bc   : > { %v3767_v31 = vadd.f32 %v3721_v50, %v3113_v1  ;;  %4280 = vxpose.xlu1.b32.cont [7/16] (narrow) %v4232_v24, 8  ;;  %v4352_v19 = vsel %vm4308_vm8, %v4232_v24, 0.0  ;;  %v2795_v20 = vpop.f32.mrf.mxu1 }
 0x2bd   : > { %v4353_v25 = vadd.f32 %v4352_v19, %v4351_v33 }
 0x2be   : > { %v4165_v42 = vadd.f32 %v4119_v55, %v3767_v31 }
 0x2bf   : > { %v3070_v37 = vpop.f32.mrf.mxu2 }
 0x2c0   : > { %v3114_v2 = vadd.f32 %v3070_v37, %v2827_v62  ;;  %v4201_v26 = vadd.f32 %v6836_v12, %v4165_v42 }
 0x2c2   : > { %v4233_v43 = vmax.f32 %v4201_v26, 0.0 }
 0x2c3   : > { %v4122_v52 = vpop.f32.mrf.mxu0  ;;  %v3724_v56 = vpop.f32.mrf.mxu3 }
 0x2c4   : > { %v3768_v39 = vadd.f32 %v3724_v56, %v3114_v2  ;;  %4281 = vxpose.xlu1.b32.cont [8/16] (narrow) %v4233_v43, 8  ;;  %v4354_v47 = vsel %vm4308_vm8, %v4233_v43, 0.0  ;;  %v2798_v37 = vpop.f32.mrf.mxu1 }
 0x2c5   : > { %v4355_v0 = vadd.f32 %v4354_v47, %v4353_v25  ;;  %v2832_v25 = vadd.f32 %v2795_v20, %v6497_v21  ;;  %v2833_v47 = vadd.f32 %v2798_v37, %v6513_v44 }
 0x2c6   : > { %v4166_v38 = vadd.f32 %v4122_v52, %v3768_v39 }
 0x2c7   : > { %v3072_v53 = vpop.f32.mrf.mxu2 }
 0x2c8   : > { %v3115_v46 = vadd.f32 %v3072_v53, %v2828_v18  ;;  %v4202_v63 = vadd.f32 %v6836_v12, %v4166_v38 }
 0x2ca   : > { %v4234_v57 = vmax.f32 %v4202_v63, 0.0 }
 0x2cb   : > { %v4124_v60 = vpop.f32.mrf.mxu0  ;;  %v3726_v7 = vpop.f32.mrf.mxu3 }
 0x2cc   : > { %v3769_v41 = vadd.f32 %v3726_v7, %v3115_v46  ;;  %4282 = vxpose.xlu1.b32.cont [9/16] (narrow) %v4234_v57, 8  ;;  %v4356_v54 = vsel %vm4308_vm8, %v4234_v57, 0.0  ;;  %v2800_v53 = vpop.f32.mrf.mxu1 }
 0x2cd   : > { %v4357_v58 = vadd.f32 %v4356_v54, %v4355_v0 }
 0x2ce   : > { %v4167_v14 = vadd.f32 %v4124_v60, %v3769_v41  ;;  %v6946_v41 = vld [vmem:[#allocation5_spill] sm:$0xff] }
 0x2cf   : > { %v3075_v9 = vpop.f32.mrf.mxu2  ;;  %v2834_v54 = vadd.f32 %v2800_v53, %v6946_v41 }
 0x2d0   : > { %v3116_v4 = vadd.f32 %v3075_v9, %v2829_v36  ;;  %v4203_v59 = vadd.f32 %v6836_v12, %v4167_v14 }
 0x2d2   : > { %v4235_v30 = vmax.f32 %v4203_v59, 0.0 }
 0x2d3   : > { %v4127_v3 = vpop.f32.mrf.mxu0  ;;  %v3729_v15 = vpop.f32.mrf.mxu3 }
 0x2d4   : > { %v3770_v48 = vadd.f32 %v3729_v15, %v3116_v4  ;;  %4283 = vxpose.xlu1.b32.cont [10/16] (narrow) %v4235_v30, 8  ;;  %v4358_v34 = vsel %vm4308_vm8, %v4235_v30, 0.0 }
 0x2d5   : > { %v4359_v6 = vadd.f32 %v4358_v34, %v4357_v58 }
 0x2d6   : > { %v4168_v8 = vadd.f32 %v4127_v3, %v3770_v48 }
 0x2d7   : > { %v3077_v22 = vpop.f32.mrf.mxu2 }
 0x2d8   : > { %v3117_v13 = vadd.f32 %v3077_v22, %v2830_v61  ;;  %v4204_v51 = vadd.f32 %v6836_v12, %v4168_v8 }
 0x2da   : > { %v4236_v32 = vmax.f32 %v4204_v51, 0.0 }
 0x2db   : > { %v4129_v49 = vpop.f32.mrf.mxu0  ;;  %v3731_v35 = vpop.f32.mrf.mxu3 }
 0x2dc   : > { %v3771_v40 = vadd.f32 %v3731_v35, %v3117_v13  ;;  %4284 = vxpose.xlu1.b32.cont [11/16] (narrow) %v4236_v32, 8  ;;  %v4360_v5 = vsel %vm4308_vm8, %v4236_v32, 0.0 }
 0x2dd   : > { %v4361_v33 = vadd.f32 %v4360_v5, %v4359_v6  ;;  %v4380_v5 = vld [vmem:[%s6916_s4] sm:$0x1] }
 0x2de   : > { %v4169_v16 = vadd.f32 %v4129_v49, %v3771_v40  ;;  %v4258_v40 = vpop.trf.xlu0 }
 0x2df   : > { %v3080_v27 = vpop.f32.mrf.mxu2  ;;  %4306 = vst [vmem:[%s261_s12] sm:$0xff] %v4258_v40 }
 0x2e0   : > { %v3118_v1 = vadd.f32 %v3080_v27, %v2831_v11  ;;  %v4205_v17 = vadd.f32 %v6836_v12, %v4169_v16 }
 0x2e2   : > { %v4237_v10 = vmax.f32 %v4205_v17, 0.0 }
 0x2e3   : > { %v4132_v24 = vpop.f32.mrf.mxu0  ;;  %v3734_v55 = vpop.f32.mrf.mxu3 }
 0x2e4   : > { %v3772_v50 = vadd.f32 %v3734_v55, %v3118_v1  ;;  %4285 = vxpose.xlu1.b32.cont [12/16] (narrow) %v4237_v10, 8  ;;  %v4362_v31 = vsel %vm4308_vm8, %v4237_v10, 0.0 }
 0x2e5   : > { %v4363_v19 = vadd.f32 %v4362_v31, %v4361_v33 }
 0x2e6   : > { %v4170_v62 = vadd.f32 %v4132_v24, %v3772_v50 }
 0x2e7   : > { %v3082_v42 = vpop.f32.mrf.mxu2 }
 0x2e8   : > { %v3119_v23 = vadd.f32 %v3082_v42, %v2832_v25  ;;  %v4206_v29 = vadd.f32 %v6836_v12, %v4170_v62 }
 0x2ea   : > { %v4238_v2 = vmax.f32 %v4206_v29, 0.0 }
 0x2eb   : > { %v4134_v26 = vpop.f32.mrf.mxu0  ;;  %v3736_v43 = vpop.f32.mrf.mxu3 }
 0x2ec   : > { %v3773_v52 = vadd.f32 %v3736_v43, %v3119_v23  ;;  %4286 = vxpose.xlu1.b32.cont [13/16] (narrow) %v4238_v2, 8  ;;  %v4364_v56 = vsel %vm4308_vm8, %v4238_v2, 0.0 }
 0x2ed   : > { %v4365_v39 = vadd.f32 %v4364_v56, %v4363_v19 }
 0x2ee   : > { %v4171_v0 = vadd.f32 %v4134_v26, %v3773_v52 }
 0x2ef   : > { %v3085_v18 = vpop.f32.mrf.mxu2 }
 0x2f0   : > { %v3120_v38 = vadd.f32 %v3085_v18, %v2833_v47  ;;  %v4207_v21 = vadd.f32 %v6836_v12, %v4171_v0 }
 0x2f2   : > { %v4239_v46 = vmax.f32 %v4207_v21, 0.0 }
 0x2f3   : > { %v4137_v63 = vpop.f32.mrf.mxu0  ;;  %v3739_v28 = vpop.f32.mrf.mxu3 }
 0x2f4   : > { %v3774_v57 = vadd.f32 %v3739_v28, %v3120_v38  ;;  %4287 = vxpose.xlu1.b32.cont [14/16] (narrow) %v4239_v46, 8  ;;  %v4366_v60 = vsel %vm4308_vm8, %v4239_v46, 0.0 }
 0x2f5   : > { %v4367_v7 = vadd.f32 %v4366_v60, %v4365_v39 }
 0x2f6   : > { %v4172_v58 = vadd.f32 %v4137_v63, %v3774_v57 }
 0x2f7   : > { %v3087_v36 = vpop.f32.mrf.mxu2 }
 0x2f8   : > { %v3121_v14 = vadd.f32 %v3087_v36, %v2834_v54  ;;  %v4208_v44 = vadd.f32 %v6836_v12, %v4172_v58 }
 0x2fa   : > { %v4240_v9 = vmax.f32 %v4208_v44, 0.0 }
 0x2fb   : > { %v3741_v4 = vpop.f32.mrf.mxu3  ;;  %v4139_v3 = vpop.f32.mrf.mxu0 }
 0x2fc   : > { %v3775_v59 = vadd.f32 %v3741_v4, %v3121_v14  ;;  %4288 = vxpose.xlu1.b32.cont [15/16] (narrow) %v4240_v9, 8  ;;  %v4368_v30 = vsel %vm4308_vm8, %v4240_v9, 0.0 }
 0x2fd   : > { %v4369_v15 = vadd.f32 %v4368_v30, %v4367_v7 }
 0x2fe   : > { %v4173_v45 = vadd.f32 %v4139_v3, %v3775_v59 }
 0x300   : > { %v4209_v48 = vadd.f32 %v6836_v12, %v4173_v45 }
 0x302   : > { %v4241_v34 = vmax.f32 %v4209_v48, 0.0 }
 0x304   : > { %4289 = vxpose.xlu1.b32.end [16/16] (narrow) %v4241_v34, 8  ;;  %v4370_v6 = vsel %vm4308_vm8, %v4241_v34, 0.0 }
 0x305   : > { %v4371_v61 = vadd.f32 %v4370_v6, %v4369_v15 }
 0x307   : > { %v4372_v8 = vrot.slane %v4371_v61, 4 }
 0x309   : > { %v4373_v22 = vadd.f32 %v4372_v8, %v4371_v61 }
 0x30b   : > { %v4374_v13 = vrot.slane %v4373_v22, 2 }
 0x30d   : > { %v4375_v51 = vadd.f32 %v4374_v13, %v4373_v22 }
 0x30f   : > { %v4376_v32 = vrot.slane %v4375_v51, 1 }
 0x311   : > { %v4377_v49 = vadd.f32 %v4376_v32, %v4375_v51 }
 0x313   : > { %v4378_v35 = vmul.f32 0.00390625, %v4377_v49 }
 0x315   : > { %5098 = vmatmul.msk.f32.vlgmr.msrb.gmra.mxu1 %vm4308_vm8, %v4378_v35 }
 0x330   : > { %v4290_v12 = vpop.trf.xlu1 }
 0x331   : > { %4307 = vst [vmem:[%s261_s12 + $0x8] sm:$0xff] %v4290_v12 }
 0x392   : > { %v4401_v33 = vpop.f32.mrf.mxu1 }
 0x393   : > { %v4402_v11 = vadd.f32 %v4401_v33, %v4380_v5 }
 0x395   : > { %4405 = vst.msk [vmem:[%s251_s20] sm:$0x1] %vm4404_vm9, %v4402_v11 }
 0x396   : > { %5274 = shalt.err (!%p5271_p3)
}
 0x397   : > { %5154 = dma.vmem_to_hbm [thread:$0]  (%p5384_p5), %s4426_s13, 16, %s4428_s26, %s4412_s28  }
 0x398 PF: > { %p5160_p4 = scmp.ge.s32.totalorder %s5309_s24, 2  ;;  %s4447_s14 = sand.u32 1, %s5297_s21  }
 0x399   : > { %s4448_s16 = scalar_lea.sflag [#allocation3], %s4447_s14 }
 0x39a   : > { %p5157_p7 = pnand %p5160_p4, %p5388_p6 }
 0x39c   : > { %p5158_p8 = pneg %p5157_p7 }
 0x39e   : > { %5292 = dma.done.wait (%p5158_p8), %s4448_s16, 16  }
 0x39f   : > { %5294 = vsyncadd (%p5158_p8), %s4448_s16, 4294967280  ;;  %p17_p9 = scmp.ge.s32.totalorder %s5371_s27, 4   ;;  %s6947_s21 = smov %s5301_s22 }
 0x3a0   : > { %s6948_s22 = smov %s5305_s23  ;;  %s6949_s23 = smov %s5382_s30 }
 0x3a1   : > { %s6950_s24 = smov %s5371_s27  ;;  %19 = sbr.rel (!%p17_p9) target bundleno = 3 (0x3), region = 97 }
 0x3a6   :  { %4453 = vsyncpa [#allocation3], 1 }
 0x3a7   :  { %4455 = vsyncpa [#allocation3 + $0x1], 1 }

</bundles_post_ra>
